<compile_context>
chip_gen: v7x
topology: tpu7x:2x2x1
jax: 0.10.0
libtpu: 0.0.40
codegen_flags: <defaults>
</compile_context>

<pallas_src>
import math

import jax
import jax.numpy as jnp
from jax import lax
from jax.experimental import pallas as pl
from jax.experimental.pallas import tpu as pltpu

# ---------------- model config (small, consistent with the module) ----------------
HID_EMB = 32        # config.emb_size
NUM_HEADS = 4       # config.num_heads
NUM_LAYERS = 2      # config.num_layers
FORWARD_EXP = 2     # config.forward_expansion
MAX_LEN = 8         # config.seq_len
N_TOKENS = 12       # vocab size
DISPER_SIZE = 16    # config.disper_size
BOS_IDX = 1
LN_EPS = 1e-5
NEG_INF = -1e30
HEAD_DIM = HID_EMB // NUM_HEADS
FF_DIM = FORWARD_EXP * HID_EMB

LAYER_PARAM_ORDER = ("ln1g", "ln1b", "wqkv", "bqkv", "wo", "bo",
                     "ln2g", "ln2b", "w1", "b1", "w2", "b2")


# ------------------------------- fused Pallas kernel -------------------------------
def _layernorm(v, g, b):
    mu = jnp.mean(v, axis=-1, keepdims=True)
    var = jnp.mean((v - mu) ** 2, axis=-1, keepdims=True)
    return (v - mu) * lax.rsqrt(var + LN_EPS) * g + b


def _make_fused_kernel(N, z_len, S, E, H, D, V, L, max_len):
    NS = N * S                      # batch folded along sublanes
    NT = N * (max_len - 1)          # total token rows
    scale = 1.0 / math.sqrt(D)
    inv_sqrt2 = 1.0 / math.sqrt(2.0)

    def kernel(ids_ref, z_ref, emb_ref, zw_ref, zb_ref, pe_ref,
               ln1g_ref, ln1b_ref, wqkv_ref, bqkv_ref, wo_ref, bo_ref,
               ln2g_ref, ln2b_ref, w1_ref, b1_ref, w2_ref, b2_ref,
               outw_ref, out_ref, x_ref):
        f32 = jnp.float32

        # ---- constants built once in-kernel ----
        # batch-block-diagonal causal mask over the folded [NS, NS] scores
        r = lax.broadcasted_iota(jnp.int32, (NS, NS), 0)
        c = lax.broadcasted_iota(jnp.int32, (NS, NS), 1)
        causal = jnp.full((NS, NS), NEG_INF, f32)
        for b in range(N):
            lo = b * S
            ok = (r >= lo) & (r < lo + S) & (c >= lo) & (c <= r)
            causal = jnp.where(ok, 0.0, causal)

        # per-head lane masks (heads live on contiguous lane chunks of width D)
        lane = lax.broadcasted_iota(jnp.int32, (1, E), 1)
        head_masks = [((lane >= h * D) & (lane < (h + 1) * D)).astype(f32)
                      for h in range(H)]

        # BOS logit row, computed once
        bos_row = jnp.where(
            lax.broadcasted_iota(jnp.int32, (1, V), 1) == BOS_IDX, 1e8, 0.0).astype(f32)

        # ---- input assembly: whole batch at once, placed with slice-stores ----
        zm = jnp.dot(z_ref[...], zw_ref[...], preferred_element_type=f32) + zb_ref[...]   # [N*z_len, E]
        onehot = (ids_ref[...] ==
                  lax.broadcasted_iota(jnp.int32, (NT, V), 1)).astype(f32)                 # [NT, V]
        tok = jnp.dot(onehot, emb_ref[...], preferred_element_type=f32)                    # [NT, E]
        for b in range(N):
            x_ref[pl.ds(b * S, z_len), :] = zm[b * z_len:(b + 1) * z_len, :]
            x_ref[pl.ds(b * S + z_len, max_len - 1), :] = \
                tok[b * (max_len - 1):(b + 1) * (max_len - 1), :]
        x = x_ref[...] + pe_ref[...]                                                       # [NS, E]

        # ---- transformer layers (static unroll, L = 2) ----
        for l in range(L):
            # --- self-attention block (pre-LN, fused QKV projection) ---
            h1 = _layernorm(x, ln1g_ref[l], ln1b_ref[l])
            qkv = jnp.dot(h1, wqkv_ref[l], preferred_element_type=f32) + bqkv_ref[l]       # [NS, 3E]
            q = qkv[:, :E]
            k = qkv[:, E:2 * E]
            v = qkv[:, 2 * E:]

            attn = jnp.zeros((NS, E), f32)
            for h in range(H):
                mh = head_masks[h]
                s = lax.dot_general(q * mh, k, (((1,), (1,)), ((), ())),
                                    preferred_element_type=f32) * scale + causal
                m = jnp.max(s, axis=-1, keepdims=True)
                e = jnp.exp(s - m)
                p = e * pl.reciprocal(jnp.sum(e, axis=-1, keepdims=True), approx=True)
                # head output lands directly in its own lane chunk -> no concat needed
                attn = attn + jnp.dot(p, v * mh, preferred_element_type=f32)

            x = x + jnp.dot(attn, wo_ref[l], preferred_element_type=f32) + bo_ref[l]       # dropout1 = id

            # --- feed-forward block ---
            h2 = _layernorm(x, ln2g_ref[l], ln2b_ref[l])
            f = jnp.dot(h2, w1_ref[l], preferred_element_type=f32) + b1_ref[l]
            f = 0.5 * f * (1.0 + lax.erf(f * inv_sqrt2))          # exact GELU (nn.GELU)
            x = x + jnp.dot(f, w2_ref[l], preferred_element_type=f32) + b2_ref[l]          # dropout2 = id

        # ---- output projection (no bias, no ln_f in this path) + BOS row ----
        logits = jnp.dot(x, outw_ref[...], preferred_element_type=f32)                     # [NS, V]
        for b in range(N):
            out_ref[pl.ds(b * max_len, 1), :] = bos_row
            out_ref[pl.ds(b * max_len + 1, max_len - 1), :] = \
                logits[b * S + z_len:b * S + S, :]

    return kernel


@jax.jit
def gpt_easy_dvq_forward(params, inputs, z):
    """
    inputs: int32 [N, max_len] token ids
    z:      float32 [N, z_len, disper_size]
    returns float32 [N, max_len, n_tokens]
    """
    N, max_len = inputs.shape
    z_len = z.shape[1]
    S = z_len + (max_len - 1)
    NS = N * S
    E = HID_EMB
    V = N_TOKENS

    ids2 = inputs[:, :-1].astype(jnp.int32).reshape(N * (max_len - 1), 1)   # [NT, 1]
    z2 = z.astype(jnp.float32).reshape(N * z_len, z.shape[-1])              # [N*z_len, DSP]
    pe_tiled = jnp.tile(params["pe"][:S], (N, 1))                           # [NS, E]

    kernel = _make_fused_kernel(N=N, z_len=z_len, S=S, E=E, H=NUM_HEADS, D=HEAD_DIM,
                                V=V, L=NUM_LAYERS, max_len=max_len)

    out2d = pl.pallas_call(
        kernel,
        out_shape=jax.ShapeDtypeStruct((N * max_len, V), jnp.float32),
        scratch_shapes=[pltpu.VMEM((NS, E), jnp.float32)],
    )(ids2, z2, params["emb"], params["z_mem_w"], params["z_mem_b"], pe_tiled,
      *params["layers"], params["out_w"])

    return out2d.reshape(N, max_len, V)


# ------------------------------- parameters / glue --------------------------------
def sinusoidal_pe(max_len, d):
    pos = jnp.arange(max_len, dtype=jnp.float32)[:, None]
    div = jnp.exp(jnp.arange(0, d, 2, dtype=jnp.float32) * (-jnp.log(10000.0) / d))
    pe = jnp.zeros((max_len, d), jnp.float32)
    pe = pe.at[:, 0::2].set(jnp.sin(pos * div))
    pe = pe.at[:, 1::2].set(jnp.cos(pos * div))
    return pe                                        # [max_len, d]


def init_layer_params(key):
    E, FE = HID_EMB, FF_DIM
    ks = jax.random.split(key, 5)
    in_proj_w = jax.random.normal(ks[0], (3 * E, E), jnp.float32) * 0.05   # torch [3E, E]
    in_proj_b = jax.random.normal(ks[1], (3 * E,), jnp.float32) * 0.05
    out_proj_w = jax.random.normal(ks[2], (E, E), jnp.float32) * 0.05
    w1 = jax.random.normal(ks[3], (FE, E), jnp.float32) * 0.05
    w2 = jax.random.normal(ks[4], (E, FE), jnp.float32) * 0.05
    return {
        "ln1g": jnp.ones((1, E), jnp.float32), "ln1b": jnp.zeros((1, E), jnp.float32),
        "wqkv": in_proj_w.T,                   # [E, 3E]  (cols 0:E=q, E:2E=k, 2E:=v)
        "bqkv": in_proj_b[None, :],            # [1, 3E]
        "wo": out_proj_w.T,                    # [E, E]
        "bo": jnp.zeros((1, E), jnp.float32),
        "ln2g": jnp.ones((1, E), jnp.float32), "ln2b": jnp.zeros((1, E), jnp.float32),
        "w1": w1.T, "b1": jnp.zeros((1, FE), jnp.float32),
        "w2": w2.T, "b2": jnp.zeros((1, E), jnp.float32),
    }


def init_params(key):
    E, V, DSP = HID_EMB, N_TOKENS, DISPER_SIZE
    keys = jax.random.split(key, 3 + NUM_LAYERS)
    per_layer = [init_layer_params(keys[3 + i]) for i in range(NUM_LAYERS)]
    # stack each per-layer tensor along a leading [L, ...] axis -> one ref per tensor
    layers = [jnp.stack([lp[name] for lp in per_layer], axis=0)
              for name in LAYER_PARAM_ORDER]
    return {
        "emb": jax.random.normal(keys[0], (V, E), jnp.float32) * 0.05,
        "z_mem_w": (jax.random.normal(keys[1], (E, DSP), jnp.float32) * 0.05).T,  # [DSP, E]
        "z_mem_b": jnp.zeros((1, E), jnp.float32),
        "out_w": (jax.random.normal(keys[2], (V, E), jnp.float32) * 0.05).T,      # [E, V]
        "pe": sinusoidal_pe(MAX_LEN + 10, E),
        "layers": layers,
        # z_embedding_layer / small_hid_emb_layer / ln_f exist in __init__ but are
        # unused in GPT_EASY_DVQ's forward path, so they are not materialized.
    }


# --------------------------------------- main --------------------------------------
if __name__ == "__main__":
    key = jax.random.PRNGKey(0)
    k_param, k_in, k_z = jax.random.split(key, 3)

    N = 2
    Z_LEN = 2
    inputs = jax.random.randint(k_in, (N, MAX_LEN), 0, N_TOKENS, dtype=jnp.int32)
    z = jax.random.normal(k_z, (N, Z_LEN, DISPER_SIZE), jnp.float32)

    params = init_params(k_param)
    out = gpt_easy_dvq_forward(params, inputs, z)
    out = jax.block_until_ready(out)

    assert out.shape == (N, MAX_LEN, N_TOKENS), out.shape
    assert bool(jnp.all(jnp.isfinite(out)))
    print("KERNEL_OK")
</pallas_src>

<mosaic_0001>
module attributes {stable_mosaic.version = 11 : i64} {
  func.func @kernel(%arg0: memref<14x1xi32, #tpu.memory_space<vmem>>, %arg1: memref<4x16xf32, #tpu.memory_space<vmem>>, %arg2: memref<12x32xf32, #tpu.memory_space<vmem>>, %arg3: memref<16x32xf32, #tpu.memory_space<vmem>>, %arg4: memref<1x32xf32, #tpu.memory_space<vmem>>, %arg5: memref<18x32xf32, #tpu.memory_space<vmem>>, %arg6: memref<2x1x32xf32, #tpu.memory_space<vmem>>, %arg7: memref<2x1x32xf32, #tpu.memory_space<vmem>>, %arg8: memref<2x32x96xf32, #tpu.memory_space<vmem>>, %arg9: memref<2x1x96xf32, #tpu.memory_space<vmem>>, %arg10: memref<2x32x32xf32, #tpu.memory_space<vmem>>, %arg11: memref<2x1x32xf32, #tpu.memory_space<vmem>>, %arg12: memref<2x1x32xf32, #tpu.memory_space<vmem>>, %arg13: memref<2x1x32xf32, #tpu.memory_space<vmem>>, %arg14: memref<2x32x64xf32, #tpu.memory_space<vmem>>, %arg15: memref<2x1x64xf32, #tpu.memory_space<vmem>>, %arg16: memref<2x64x32xf32, #tpu.memory_space<vmem>>, %arg17: memref<2x1x32xf32, #tpu.memory_space<vmem>>, %arg18: memref<32x12xf32, #tpu.memory_space<vmem>>, %arg19: memref<16x12xf32, #tpu.memory_space<vmem>>, %arg20: memref<18x32xf32, #tpu.memory_space<vmem>>) attributes {dimension_semantics = [], scalar_prefetch = 0 : i64, scratch_operands = 1 : i64, tpu.core_type = #tpu.core_type<tc>} {
    %0 = tpu.iota {dimensions = array<i32: 0>} : vector<18x18xi32>
    %1 = tpu.iota {dimensions = array<i32: 1>} : vector<18x18xi32>
    %cst = arith.constant -1.000000e+30 : f32
    %2 = vector.broadcast %cst : f32 to vector<18x18xf32>
    %c0_i32 = arith.constant 0 : i32
    %3 = vector.broadcast %c0_i32 : i32 to vector<18x18xi32>
    %4 = arith.cmpi sge, %0, %3 : vector<18x18xi32>
    %c9_i32 = arith.constant 9 : i32
    %5 = vector.broadcast %c9_i32 : i32 to vector<18x18xi32>
    %6 = arith.cmpi slt, %0, %5 : vector<18x18xi32>
    %7 = arith.andi %4, %6 : vector<18x18xi1>
    %c0_i32_0 = arith.constant 0 : i32
    %8 = vector.broadcast %c0_i32_0 : i32 to vector<18x18xi32>
    %9 = arith.cmpi sge, %1, %8 : vector<18x18xi32>
    %10 = arith.andi %7, %9 : vector<18x18xi1>
    %11 = arith.cmpi sle, %1, %0 : vector<18x18xi32>
    %12 = arith.andi %10, %11 : vector<18x18xi1>
    %cst_1 = arith.constant 0.000000e+00 : f32
    %13 = vector.broadcast %cst_1 : f32 to vector<18x18xf32>
    %14 = arith.select %12, %13, %2 : vector<18x18xi1>, vector<18x18xf32>
    %c9_i32_2 = arith.constant 9 : i32
    %15 = vector.broadcast %c9_i32_2 : i32 to vector<18x18xi32>
    %16 = arith.cmpi sge, %0, %15 : vector<18x18xi32>
    %c18_i32 = arith.constant 18 : i32
    %17 = vector.broadcast %c18_i32 : i32 to vector<18x18xi32>
    %18 = arith.cmpi slt, %0, %17 : vector<18x18xi32>
    %19 = arith.andi %16, %18 : vector<18x18xi1>
    %c9_i32_3 = arith.constant 9 : i32
    %20 = vector.broadcast %c9_i32_3 : i32 to vector<18x18xi32>
    %21 = arith.cmpi sge, %1, %20 : vector<18x18xi32>
    %22 = arith.andi %19, %21 : vector<18x18xi1>
    %23 = arith.cmpi sle, %1, %0 : vector<18x18xi32>
    %24 = arith.andi %22, %23 : vector<18x18xi1>
    %cst_4 = arith.constant 0.000000e+00 : f32
    %25 = vector.broadcast %cst_4 : f32 to vector<18x18xf32>
    %26 = arith.select %24, %25, %14 : vector<18x18xi1>, vector<18x18xf32>
    %27 = tpu.iota {dimensions = array<i32: 1>} : vector<1x32xi32>
    %c0_i32_5 = arith.constant 0 : i32
    %28 = vector.broadcast %c0_i32_5 : i32 to vector<1x32xi32>
    %29 = arith.cmpi sge, %27, %28 : vector<1x32xi32>
    %c8_i32 = arith.constant 8 : i32
    %30 = vector.broadcast %c8_i32 : i32 to vector<1x32xi32>
    %31 = arith.cmpi slt, %27, %30 : vector<1x32xi32>
    %32 = arith.andi %29, %31 : vector<1x32xi1>
    %33 = arith.extui %32 : vector<1x32xi1> to vector<1x32xi32>
    %34 = arith.sitofp %33 : vector<1x32xi32> to vector<1x32xf32>
    %c8_i32_6 = arith.constant 8 : i32
    %35 = vector.broadcast %c8_i32_6 : i32 to vector<1x32xi32>
    %36 = arith.cmpi sge, %27, %35 : vector<1x32xi32>
    %c16_i32 = arith.constant 16 : i32
    %37 = vector.broadcast %c16_i32 : i32 to vector<1x32xi32>
    %38 = arith.cmpi slt, %27, %37 : vector<1x32xi32>
    %39 = arith.andi %36, %38 : vector<1x32xi1>
    %40 = arith.extui %39 : vector<1x32xi1> to vector<1x32xi32>
    %41 = arith.sitofp %40 : vector<1x32xi32> to vector<1x32xf32>
    %c16_i32_7 = arith.constant 16 : i32
    %42 = vector.broadcast %c16_i32_7 : i32 to vector<1x32xi32>
    %43 = arith.cmpi sge, %27, %42 : vector<1x32xi32>
    %c24_i32 = arith.constant 24 : i32
    %44 = vector.broadcast %c24_i32 : i32 to vector<1x32xi32>
    %45 = arith.cmpi slt, %27, %44 : vector<1x32xi32>
    %46 = arith.andi %43, %45 : vector<1x32xi1>
    %47 = arith.extui %46 : vector<1x32xi1> to vector<1x32xi32>
    %48 = arith.sitofp %47 : vector<1x32xi32> to vector<1x32xf32>
    %c24_i32_8 = arith.constant 24 : i32
    %49 = vector.broadcast %c24_i32_8 : i32 to vector<1x32xi32>
    %50 = arith.cmpi sge, %27, %49 : vector<1x32xi32>
    %c32_i32 = arith.constant 32 : i32
    %51 = vector.broadcast %c32_i32 : i32 to vector<1x32xi32>
    %52 = arith.cmpi slt, %27, %51 : vector<1x32xi32>
    %53 = arith.andi %50, %52 : vector<1x32xi1>
    %54 = arith.extui %53 : vector<1x32xi1> to vector<1x32xi32>
    %55 = arith.sitofp %54 : vector<1x32xi32> to vector<1x32xf32>
    %56 = tpu.iota {dimensions = array<i32: 1>} : vector<1x12xi32>
    %c1_i32 = arith.constant 1 : i32
    %57 = vector.broadcast %c1_i32 : i32 to vector<1x12xi32>
    %58 = arith.cmpi eq, %56, %57 : vector<1x12xi32>
    %cst_9 = arith.constant 1.000000e+08 : f32
    %cst_10 = arith.constant 0.000000e+00 : f32
    %59 = vector.broadcast %cst_9 : f32 to vector<1x12xf32>
    %60 = vector.broadcast %cst_10 : f32 to vector<1x12xf32>
    %61 = arith.select %58, %59, %60 : vector<1x12xi1>, vector<1x12xf32>
    %c0 = arith.constant 0 : index
    %c0_11 = arith.constant 0 : index
    %62 = vector.load %arg1[%c0, %c0_11] : memref<4x16xf32, #tpu.memory_space<vmem>>, vector<4x16xf32>
    %c0_12 = arith.constant 0 : index
    %c0_13 = arith.constant 0 : index
    %63 = vector.load %arg3[%c0_12, %c0_13] : memref<16x32xf32, #tpu.memory_space<vmem>>, vector<16x32xf32>
    %cst_14 = arith.constant dense<0.000000e+00> : vector<4x32xf32>
    %64 = tpu.matmul %62, %63, %cst_14 {dimension_numbers = #tpu.dot_dimension_numbers<[1], [0], [0], [1], [0, 0, 1, 1], [], []>} : vector<4x16xf32>, vector<16x32xf32>, vector<4x32xf32> -> vector<4x32xf32>
    %c0_15 = arith.constant 0 : index
    %c0_16 = arith.constant 0 : index
    %65 = vector.load %arg4[%c0_15, %c0_16] : memref<1x32xf32, #tpu.memory_space<vmem>>, vector<1x32xf32>
    %66 = vector.broadcast %65 : vector<1x32xf32> to vector<4x32xf32>
    %67 = arith.addf %64, %66 : vector<4x32xf32>
    %c0_17 = arith.constant 0 : index
    %c0_18 = arith.constant 0 : index
    %68 = vector.load %arg0[%c0_17, %c0_18] : memref<14x1xi32, #tpu.memory_space<vmem>>, vector<14x1xi32>
    %69 = tpu.iota {dimensions = array<i32: 1>} : vector<14x12xi32>
    %70 = vector.broadcast %68 : vector<14x1xi32> to vector<14x12xi32>
    %71 = arith.cmpi eq, %70, %69 : vector<14x12xi32>
    %72 = arith.extui %71 : vector<14x12xi1> to vector<14x12xi32>
    %73 = arith.sitofp %72 : vector<14x12xi32> to vector<14x12xf32>
    %c0_19 = arith.constant 0 : index
    %c0_20 = arith.constant 0 : index
    %74 = vector.load %arg2[%c0_19, %c0_20] : memref<12x32xf32, #tpu.memory_space<vmem>>, vector<12x32xf32>
    %cst_21 = arith.constant dense<0.000000e+00> : vector<14x32xf32>
    %75 = tpu.matmul %73, %74, %cst_21 {dimension_numbers = #tpu.dot_dimension_numbers<[1], [0], [0], [1], [0, 0, 1, 1], [], []>} : vector<14x12xf32>, vector<12x32xf32>, vector<14x32xf32> -> vector<14x32xf32>
    %76 = vector.extract_strided_slice %67 {offsets = [0, 0], sizes = [2, 32], strides = [1, 1]} : vector<4x32xf32> to vector<2x32xf32>
    %c0_22 = arith.constant 0 : index
    %c0_23 = arith.constant 0 : index
    %77 = vector.load %arg20[%c0_22, %c0_23] : memref<18x32xf32, #tpu.memory_space<vmem>>, vector<2x32xf32>
    tpu.vector_store %arg20[%c0_22, %c0_23], %76 {strides = array<i32>} : memref<18x32xf32, #tpu.memory_space<vmem>>, vector<2x32xf32>,
    %78 = vector.extract_strided_slice %75 {offsets = [0, 0], sizes = [7, 32], strides = [1, 1]} : vector<14x32xf32> to vector<7x32xf32>
    %c2 = arith.constant 2 : index
    %c0_24 = arith.constant 0 : index
    %79 = vector.load %arg20[%c2, %c0_24] : memref<18x32xf32, #tpu.memory_space<vmem>>, vector<7x32xf32>
    tpu.vector_store %arg20[%c2, %c0_24], %78 {strides = array<i32>} : memref<18x32xf32, #tpu.memory_space<vmem>>, vector<7x32xf32>,
    %80 = vector.extract_strided_slice %67 {offsets = [2, 0], sizes = [2, 32], strides = [1, 1]} : vector<4x32xf32> to vector<2x32xf32>
    %c9 = arith.constant 9 : index
    %c0_25 = arith.constant 0 : index
    %81 = vector.load %arg20[%c9, %c0_25] : memref<18x32xf32, #tpu.memory_space<vmem>>, vector<2x32xf32>
    tpu.vector_store %arg20[%c9, %c0_25], %80 {strides = array<i32>} : memref<18x32xf32, #tpu.memory_space<vmem>>, vector<2x32xf32>,
    %82 = vector.extract_strided_slice %75 {offsets = [7, 0], sizes = [7, 32], strides = [1, 1]} : vector<14x32xf32> to vector<7x32xf32>
    %c11 = arith.constant 11 : index
    %c0_26 = arith.constant 0 : index
    %83 = vector.load %arg20[%c11, %c0_26] : memref<18x32xf32, #tpu.memory_space<vmem>>, vector<7x32xf32>
    tpu.vector_store %arg20[%c11, %c0_26], %82 {strides = array<i32>} : memref<18x32xf32, #tpu.memory_space<vmem>>, vector<7x32xf32>,
    %c0_27 = arith.constant 0 : index
    %c0_28 = arith.constant 0 : index
    %84 = vector.load %arg20[%c0_27, %c0_28] : memref<18x32xf32, #tpu.memory_space<vmem>>, vector<18x32xf32>
    %c0_29 = arith.constant 0 : index
    %c0_30 = arith.constant 0 : index
    %85 = vector.load %arg5[%c0_29, %c0_30] : memref<18x32xf32, #tpu.memory_space<vmem>>, vector<18x32xf32>
    %86 = arith.addf %84, %85 : vector<18x32xf32>
    %c0_31 = arith.constant 0 : index
    %c0_32 = arith.constant 0 : index
    %c0_33 = arith.constant 0 : index
    %87 = vector.load %arg6[%c0_31, %c0_32, %c0_33] : memref<2x1x32xf32, #tpu.memory_space<vmem>>, vector<1x1x32xf32>
    %88 = vector.shape_cast %87 : vector<1x1x32xf32> to vector<1x32xf32>
    %c0_34 = arith.constant 0 : index
    %c0_35 = arith.constant 0 : index
    %c0_36 = arith.constant 0 : index
    %89 = vector.load %arg7[%c0_34, %c0_35, %c0_36] : memref<2x1x32xf32, #tpu.memory_space<vmem>>, vector<1x1x32xf32>
    %90 = vector.shape_cast %89 : vector<1x1x32xf32> to vector<1x32xf32>
    %cst_37 = arith.constant dense<0.000000e+00> : vector<18xf32>
    %91 = vector.multi_reduction <add>, %86, %cst_37 [1] : vector<18x32xf32> to vector<18xf32>
    %92 = vector.shape_cast %91 : vector<18xf32> to vector<18x1xf32>
    %cst_38 = arith.constant 3.200000e+01 : f32
    %93 = vector.broadcast %cst_38 : f32 to vector<18x1xf32>
    %94 = arith.divf %92, %93 : vector<18x1xf32>
    %95 = vector.broadcast %94 : vector<18x1xf32> to vector<18x32xf32>
    %96 = arith.subf %86, %95 : vector<18x32xf32>
    %97 = arith.mulf %96, %96 : vector<18x32xf32>
    %cst_39 = arith.constant dense<0.000000e+00> : vector<18xf32>
    %98 = vector.multi_reduction <add>, %97, %cst_39 [1] : vector<18x32xf32> to vector<18xf32>
    %99 = vector.shape_cast %98 : vector<18xf32> to vector<18x1xf32>
    %cst_40 = arith.constant 3.200000e+01 : f32
    %100 = vector.broadcast %cst_40 : f32 to vector<18x1xf32>
    %101 = arith.divf %99, %100 : vector<18x1xf32>
    %102 = vector.broadcast %94 : vector<18x1xf32> to vector<18x32xf32>
    %103 = arith.subf %86, %102 : vector<18x32xf32>
    %cst_41 = arith.constant 9.99999974E-6 : f32
    %104 = vector.broadcast %cst_41 : f32 to vector<18x1xf32>
    %105 = arith.addf %101, %104 : vector<18x1xf32>
    %106 = math.rsqrt %105 : vector<18x1xf32>
    %107 = vector.broadcast %106 : vector<18x1xf32> to vector<18x32xf32>
    %108 = arith.mulf %103, %107 : vector<18x32xf32>
    %109 = vector.broadcast %88 : vector<1x32xf32> to vector<18x32xf32>
    %110 = arith.mulf %108, %109 : vector<18x32xf32>
    %111 = vector.broadcast %90 : vector<1x32xf32> to vector<18x32xf32>
    %112 = arith.addf %110, %111 : vector<18x32xf32>
    %c0_42 = arith.constant 0 : index
    %c0_43 = arith.constant 0 : index
    %c0_44 = arith.constant 0 : index
    %113 = vector.load %arg8[%c0_42, %c0_43, %c0_44] : memref<2x32x96xf32, #tpu.memory_space<vmem>>, vector<1x32x96xf32>
    %114 = vector.shape_cast %113 : vector<1x32x96xf32> to vector<32x96xf32>
    %cst_45 = arith.constant dense<0.000000e+00> : vector<18x96xf32>
    %115 = tpu.matmul %112, %114, %cst_45 {dimension_numbers = #tpu.dot_dimension_numbers<[1], [0], [0], [1], [0, 0, 1, 1], [], []>} : vector<18x32xf32>, vector<32x96xf32>, vector<18x96xf32> -> vector<18x96xf32>
    %c0_46 = arith.constant 0 : index
    %c0_47 = arith.constant 0 : index
    %c0_48 = arith.constant 0 : index
    %116 = vector.load %arg9[%c0_46, %c0_47, %c0_48] : memref<2x1x96xf32, #tpu.memory_space<vmem>>, vector<1x1x96xf32>
    %117 = vector.shape_cast %116 : vector<1x1x96xf32> to vector<1x96xf32>
    %118 = vector.broadcast %117 : vector<1x96xf32> to vector<18x96xf32>
    %119 = arith.addf %115, %118 : vector<18x96xf32>
    %120 = vector.extract_strided_slice %119 {offsets = [0, 0], sizes = [18, 32], strides = [1, 1]} : vector<18x96xf32> to vector<18x32xf32>
    %121 = vector.extract_strided_slice %119 {offsets = [0, 32], sizes = [18, 32], strides = [1, 1]} : vector<18x96xf32> to vector<18x32xf32>
    %122 = vector.extract_strided_slice %119 {offsets = [0, 64], sizes = [18, 32], strides = [1, 1]} : vector<18x96xf32> to vector<18x32xf32>
    %cst_49 = arith.constant 0.000000e+00 : f32
    %123 = vector.broadcast %cst_49 : f32 to vector<18x32xf32>
    %124 = vector.broadcast %34 : vector<1x32xf32> to vector<18x32xf32>
    %125 = arith.mulf %120, %124 : vector<18x32xf32>
    %cst_50 = arith.constant dense<0.000000e+00> : vector<18x18xf32>
    %126 = tpu.matmul %125, %121, %cst_50 {dimension_numbers = #tpu.dot_dimension_numbers<[1], [1], [0], [0], [0, 0, 1, 0], [], []>} : vector<18x32xf32>, vector<18x32xf32>, vector<18x18xf32> -> vector<18x18xf32>
    %cst_51 = arith.constant 0.353553385 : f32
    %127 = vector.broadcast %cst_51 : f32 to vector<18x18xf32>
    %128 = arith.mulf %126, %127 : vector<18x18xf32>
    %129 = arith.addf %128, %26 : vector<18x18xf32>
    %cst_52 = arith.constant dense<0xFF800000> : vector<18xf32>
    %130 = vector.multi_reduction <maximumf>, %129, %cst_52 [1] : vector<18x18xf32> to vector<18xf32>
    %131 = vector.shape_cast %130 : vector<18xf32> to vector<18x1xf32>
    %132 = vector.broadcast %131 : vector<18x1xf32> to vector<18x18xf32>
    %133 = arith.subf %129, %132 : vector<18x18xf32>
    %134 = math.exp %133 : vector<18x18xf32>
    %cst_53 = arith.constant dense<0.000000e+00> : vector<18xf32>
    %135 = vector.multi_reduction <add>, %134, %cst_53 [1] : vector<18x18xf32> to vector<18xf32>
    %136 = vector.shape_cast %135 : vector<18xf32> to vector<18x1xf32>
    %137 = tpu.reciprocal %136 {approx = true} : vector<18x1xf32> -> vector<18x1xf32>
    %138 = vector.broadcast %137 : vector<18x1xf32> to vector<18x18xf32>
    %139 = arith.mulf %134, %138 : vector<18x18xf32>
    %140 = vector.broadcast %34 : vector<1x32xf32> to vector<18x32xf32>
    %141 = arith.mulf %122, %140 : vector<18x32xf32>
    %cst_54 = arith.constant dense<0.000000e+00> : vector<18x32xf32>
    %142 = tpu.matmul %139, %141, %cst_54 {dimension_numbers = #tpu.dot_dimension_numbers<[1], [0], [0], [1], [0, 0, 1, 1], [], []>} : vector<18x18xf32>, vector<18x32xf32>, vector<18x32xf32> -> vector<18x32xf32>
    %143 = arith.addf %123, %142 : vector<18x32xf32>
    %144 = vector.broadcast %41 : vector<1x32xf32> to vector<18x32xf32>
    %145 = arith.mulf %120, %144 : vector<18x32xf32>
    %cst_55 = arith.constant dense<0.000000e+00> : vector<18x18xf32>
    %146 = tpu.matmul %145, %121, %cst_55 {dimension_numbers = #tpu.dot_dimension_numbers<[1], [1], [0], [0], [0, 0, 1, 0], [], []>} : vector<18x32xf32>, vector<18x32xf32>, vector<18x18xf32> -> vector<18x18xf32>
    %cst_56 = arith.constant 0.353553385 : f32
    %147 = vector.broadcast %cst_56 : f32 to vector<18x18xf32>
    %148 = arith.mulf %146, %147 : vector<18x18xf32>
    %149 = arith.addf %148, %26 : vector<18x18xf32>
    %cst_57 = arith.constant dense<0xFF800000> : vector<18xf32>
    %150 = vector.multi_reduction <maximumf>, %149, %cst_57 [1] : vector<18x18xf32> to vector<18xf32>
    %151 = vector.shape_cast %150 : vector<18xf32> to vector<18x1xf32>
    %152 = vector.broadcast %151 : vector<18x1xf32> to vector<18x18xf32>
    %153 = arith.subf %149, %152 : vector<18x18xf32>
    %154 = math.exp %153 : vector<18x18xf32>
    %cst_58 = arith.constant dense<0.000000e+00> : vector<18xf32>
    %155 = vector.multi_reduction <add>, %154, %cst_58 [1] : vector<18x18xf32> to vector<18xf32>
    %156 = vector.shape_cast %155 : vector<18xf32> to vector<18x1xf32>
    %157 = tpu.reciprocal %156 {approx = true} : vector<18x1xf32> -> vector<18x1xf32>
    %158 = vector.broadcast %157 : vector<18x1xf32> to vector<18x18xf32>
    %159 = arith.mulf %154, %158 : vector<18x18xf32>
    %160 = vector.broadcast %41 : vector<1x32xf32> to vector<18x32xf32>
    %161 = arith.mulf %122, %160 : vector<18x32xf32>
    %cst_59 = arith.constant dense<0.000000e+00> : vector<18x32xf32>
    %162 = tpu.matmul %159, %161, %cst_59 {dimension_numbers = #tpu.dot_dimension_numbers<[1], [0], [0], [1], [0, 0, 1, 1], [], []>} : vector<18x18xf32>, vector<18x32xf32>, vector<18x32xf32> -> vector<18x32xf32>
    %163 = arith.addf %143, %162 : vector<18x32xf32>
    %164 = vector.broadcast %48 : vector<1x32xf32> to vector<18x32xf32>
    %165 = arith.mulf %120, %164 : vector<18x32xf32>
    %cst_60 = arith.constant dense<0.000000e+00> : vector<18x18xf32>
    %166 = tpu.matmul %165, %121, %cst_60 {dimension_numbers = #tpu.dot_dimension_numbers<[1], [1], [0], [0], [0, 0, 1, 0], [], []>} : vector<18x32xf32>, vector<18x32xf32>, vector<18x18xf32> -> vector<18x18xf32>
    %cst_61 = arith.constant 0.353553385 : f32
    %167 = vector.broadcast %cst_61 : f32 to vector<18x18xf32>
    %168 = arith.mulf %166, %167 : vector<18x18xf32>
    %169 = arith.addf %168, %26 : vector<18x18xf32>
    %cst_62 = arith.constant dense<0xFF800000> : vector<18xf32>
    %170 = vector.multi_reduction <maximumf>, %169, %cst_62 [1] : vector<18x18xf32> to vector<18xf32>
    %171 = vector.shape_cast %170 : vector<18xf32> to vector<18x1xf32>
    %172 = vector.broadcast %171 : vector<18x1xf32> to vector<18x18xf32>
    %173 = arith.subf %169, %172 : vector<18x18xf32>
    %174 = math.exp %173 : vector<18x18xf32>
    %cst_63 = arith.constant dense<0.000000e+00> : vector<18xf32>
    %175 = vector.multi_reduction <add>, %174, %cst_63 [1] : vector<18x18xf32> to vector<18xf32>
    %176 = vector.shape_cast %175 : vector<18xf32> to vector<18x1xf32>
    %177 = tpu.reciprocal %176 {approx = true} : vector<18x1xf32> -> vector<18x1xf32>
    %178 = vector.broadcast %177 : vector<18x1xf32> to vector<18x18xf32>
    %179 = arith.mulf %174, %178 : vector<18x18xf32>
    %180 = vector.broadcast %48 : vector<1x32xf32> to vector<18x32xf32>
    %181 = arith.mulf %122, %180 : vector<18x32xf32>
    %cst_64 = arith.constant dense<0.000000e+00> : vector<18x32xf32>
    %182 = tpu.matmul %179, %181, %cst_64 {dimension_numbers = #tpu.dot_dimension_numbers<[1], [0], [0], [1], [0, 0, 1, 1], [], []>} : vector<18x18xf32>, vector<18x32xf32>, vector<18x32xf32> -> vector<18x32xf32>
    %183 = arith.addf %163, %182 : vector<18x32xf32>
    %184 = vector.broadcast %55 : vector<1x32xf32> to vector<18x32xf32>
    %185 = arith.mulf %120, %184 : vector<18x32xf32>
    %cst_65 = arith.constant dense<0.000000e+00> : vector<18x18xf32>
    %186 = tpu.matmul %185, %121, %cst_65 {dimension_numbers = #tpu.dot_dimension_numbers<[1], [1], [0], [0], [0, 0, 1, 0], [], []>} : vector<18x32xf32>, vector<18x32xf32>, vector<18x18xf32> -> vector<18x18xf32>
    %cst_66 = arith.constant 0.353553385 : f32
    %187 = vector.broadcast %cst_66 : f32 to vector<18x18xf32>
    %188 = arith.mulf %186, %187 : vector<18x18xf32>
    %189 = arith.addf %188, %26 : vector<18x18xf32>
    %cst_67 = arith.constant dense<0xFF800000> : vector<18xf32>
    %190 = vector.multi_reduction <maximumf>, %189, %cst_67 [1] : vector<18x18xf32> to vector<18xf32>
    %191 = vector.shape_cast %190 : vector<18xf32> to vector<18x1xf32>
    %192 = vector.broadcast %191 : vector<18x1xf32> to vector<18x18xf32>
    %193 = arith.subf %189, %192 : vector<18x18xf32>
    %194 = math.exp %193 : vector<18x18xf32>
    %cst_68 = arith.constant dense<0.000000e+00> : vector<18xf32>
    %195 = vector.multi_reduction <add>, %194, %cst_68 [1] : vector<18x18xf32> to vector<18xf32>
    %196 = vector.shape_cast %195 : vector<18xf32> to vector<18x1xf32>
    %197 = tpu.reciprocal %196 {approx = true} : vector<18x1xf32> -> vector<18x1xf32>
    %198 = vector.broadcast %197 : vector<18x1xf32> to vector<18x18xf32>
    %199 = arith.mulf %194, %198 : vector<18x18xf32>
    %200 = vector.broadcast %55 : vector<1x32xf32> to vector<18x32xf32>
    %201 = arith.mulf %122, %200 : vector<18x32xf32>
    %cst_69 = arith.constant dense<0.000000e+00> : vector<18x32xf32>
    %202 = tpu.matmul %199, %201, %cst_69 {dimension_numbers = #tpu.dot_dimension_numbers<[1], [0], [0], [1], [0, 0, 1, 1], [], []>} : vector<18x18xf32>, vector<18x32xf32>, vector<18x32xf32> -> vector<18x32xf32>
    %203 = arith.addf %183, %202 : vector<18x32xf32>
    %c0_70 = arith.constant 0 : index
    %c0_71 = arith.constant 0 : index
    %c0_72 = arith.constant 0 : index
    %204 = vector.load %arg10[%c0_70, %c0_71, %c0_72] : memref<2x32x32xf32, #tpu.memory_space<vmem>>, vector<1x32x32xf32>
    %205 = vector.shape_cast %204 : vector<1x32x32xf32> to vector<32x32xf32>
    %cst_73 = arith.constant dense<0.000000e+00> : vector<18x32xf32>
    %206 = tpu.matmul %203, %205, %cst_73 {dimension_numbers = #tpu.dot_dimension_numbers<[1], [0], [0], [1], [0, 0, 1, 1], [], []>} : vector<18x32xf32>, vector<32x32xf32>, vector<18x32xf32> -> vector<18x32xf32>
    %207 = arith.addf %86, %206 : vector<18x32xf32>
    %c0_74 = arith.constant 0 : index
    %c0_75 = arith.constant 0 : index
    %c0_76 = arith.constant 0 : index
    %208 = vector.load %arg11[%c0_74, %c0_75, %c0_76] : memref<2x1x32xf32, #tpu.memory_space<vmem>>, vector<1x1x32xf32>
    %209 = vector.shape_cast %208 : vector<1x1x32xf32> to vector<1x32xf32>
    %210 = vector.broadcast %209 : vector<1x32xf32> to vector<18x32xf32>
    %211 = arith.addf %207, %210 : vector<18x32xf32>
    %c0_77 = arith.constant 0 : index
    %c0_78 = arith.constant 0 : index
    %c0_79 = arith.constant 0 : index
    %212 = vector.load %arg12[%c0_77, %c0_78, %c0_79] : memref<2x1x32xf32, #tpu.memory_space<vmem>>, vector<1x1x32xf32>
    %213 = vector.shape_cast %212 : vector<1x1x32xf32> to vector<1x32xf32>
    %c0_80 = arith.constant 0 : index
    %c0_81 = arith.constant 0 : index
    %c0_82 = arith.constant 0 : index
    %214 = vector.load %arg13[%c0_80, %c0_81, %c0_82] : memref<2x1x32xf32, #tpu.memory_space<vmem>>, vector<1x1x32xf32>
    %215 = vector.shape_cast %214 : vector<1x1x32xf32> to vector<1x32xf32>
    %cst_83 = arith.constant dense<0.000000e+00> : vector<18xf32>
    %216 = vector.multi_reduction <add>, %211, %cst_83 [1] : vector<18x32xf32> to vector<18xf32>
    %217 = vector.shape_cast %216 : vector<18xf32> to vector<18x1xf32>
    %cst_84 = arith.constant 3.200000e+01 : f32
    %218 = vector.broadcast %cst_84 : f32 to vector<18x1xf32>
    %219 = arith.divf %217, %218 : vector<18x1xf32>
    %220 = vector.broadcast %219 : vector<18x1xf32> to vector<18x32xf32>
    %221 = arith.subf %211, %220 : vector<18x32xf32>
    %222 = arith.mulf %221, %221 : vector<18x32xf32>
    %cst_85 = arith.constant dense<0.000000e+00> : vector<18xf32>
    %223 = vector.multi_reduction <add>, %222, %cst_85 [1] : vector<18x32xf32> to vector<18xf32>
    %224 = vector.shape_cast %223 : vector<18xf32> to vector<18x1xf32>
    %cst_86 = arith.constant 3.200000e+01 : f32
    %225 = vector.broadcast %cst_86 : f32 to vector<18x1xf32>
    %226 = arith.divf %224, %225 : vector<18x1xf32>
    %227 = vector.broadcast %219 : vector<18x1xf32> to vector<18x32xf32>
    %228 = arith.subf %211, %227 : vector<18x32xf32>
    %cst_87 = arith.constant 9.99999974E-6 : f32
    %229 = vector.broadcast %cst_87 : f32 to vector<18x1xf32>
    %230 = arith.addf %226, %229 : vector<18x1xf32>
    %231 = math.rsqrt %230 : vector<18x1xf32>
    %232 = vector.broadcast %231 : vector<18x1xf32> to vector<18x32xf32>
    %233 = arith.mulf %228, %232 : vector<18x32xf32>
    %234 = vector.broadcast %213 : vector<1x32xf32> to vector<18x32xf32>
    %235 = arith.mulf %233, %234 : vector<18x32xf32>
    %236 = vector.broadcast %215 : vector<1x32xf32> to vector<18x32xf32>
    %237 = arith.addf %235, %236 : vector<18x32xf32>
    %c0_88 = arith.constant 0 : index
    %c0_89 = arith.constant 0 : index
    %c0_90 = arith.constant 0 : index
    %238 = vector.load %arg14[%c0_88, %c0_89, %c0_90] : memref<2x32x64xf32, #tpu.memory_space<vmem>>, vector<1x32x64xf32>
    %239 = vector.shape_cast %238 : vector<1x32x64xf32> to vector<32x64xf32>
    %cst_91 = arith.constant dense<0.000000e+00> : vector<18x64xf32>
    %240 = tpu.matmul %237, %239, %cst_91 {dimension_numbers = #tpu.dot_dimension_numbers<[1], [0], [0], [1], [0, 0, 1, 1], [], []>} : vector<18x32xf32>, vector<32x64xf32>, vector<18x64xf32> -> vector<18x64xf32>
    %c0_92 = arith.constant 0 : index
    %c0_93 = arith.constant 0 : index
    %c0_94 = arith.constant 0 : index
    %241 = vector.load %arg15[%c0_92, %c0_93, %c0_94] : memref<2x1x64xf32, #tpu.memory_space<vmem>>, vector<1x1x64xf32>
    %242 = vector.shape_cast %241 : vector<1x1x64xf32> to vector<1x64xf32>
    %243 = vector.broadcast %242 : vector<1x64xf32> to vector<18x64xf32>
    %244 = arith.addf %240, %243 : vector<18x64xf32>
    %cst_95 = arith.constant 5.000000e-01 : f32
    %245 = vector.broadcast %cst_95 : f32 to vector<18x64xf32>
    %246 = arith.mulf %245, %244 : vector<18x64xf32>
    %cst_96 = arith.constant 0.707106769 : f32
    %247 = vector.broadcast %cst_96 : f32 to vector<18x64xf32>
    %248 = arith.mulf %244, %247 : vector<18x64xf32>
    %249 = math.erf %248 : vector<18x64xf32>
    %cst_97 = arith.constant 1.000000e+00 : f32
    %250 = vector.broadcast %cst_97 : f32 to vector<18x64xf32>
    %251 = arith.addf %250, %249 : vector<18x64xf32>
    %252 = arith.mulf %246, %251 : vector<18x64xf32>
    %c0_98 = arith.constant 0 : index
    %c0_99 = arith.constant 0 : index
    %c0_100 = arith.constant 0 : index
    %253 = vector.load %arg16[%c0_98, %c0_99, %c0_100] : memref<2x64x32xf32, #tpu.memory_space<vmem>>, vector<1x64x32xf32>
    %254 = vector.shape_cast %253 : vector<1x64x32xf32> to vector<64x32xf32>
    %cst_101 = arith.constant dense<0.000000e+00> : vector<18x32xf32>
    %255 = tpu.matmul %252, %254, %cst_101 {dimension_numbers = #tpu.dot_dimension_numbers<[1], [0], [0], [1], [0, 0, 1, 1], [], []>} : vector<18x64xf32>, vector<64x32xf32>, vector<18x32xf32> -> vector<18x32xf32>
    %256 = arith.addf %211, %255 : vector<18x32xf32>
    %c0_102 = arith.constant 0 : index
    %c0_103 = arith.constant 0 : index
    %c0_104 = arith.constant 0 : index
    %257 = vector.load %arg17[%c0_102, %c0_103, %c0_104] : memref<2x1x32xf32, #tpu.memory_space<vmem>>, vector<1x1x32xf32>
    %258 = vector.shape_cast %257 : vector<1x1x32xf32> to vector<1x32xf32>
    %259 = vector.broadcast %258 : vector<1x32xf32> to vector<18x32xf32>
    %260 = arith.addf %256, %259 : vector<18x32xf32>
    %c1 = arith.constant 1 : index
    %c0_105 = arith.constant 0 : index
    %c0_106 = arith.constant 0 : index
    %261 = vector.load %arg6[%c1, %c0_105, %c0_106] : memref<2x1x32xf32, #tpu.memory_space<vmem>>, vector<1x1x32xf32>
    %262 = vector.shape_cast %261 : vector<1x1x32xf32> to vector<1x32xf32>
    %c1_107 = arith.constant 1 : index
    %c0_108 = arith.constant 0 : index
    %c0_109 = arith.constant 0 : index
    %263 = vector.load %arg7[%c1_107, %c0_108, %c0_109] : memref<2x1x32xf32, #tpu.memory_space<vmem>>, vector<1x1x32xf32>
    %264 = vector.shape_cast %263 : vector<1x1x32xf32> to vector<1x32xf32>
    %cst_110 = arith.constant dense<0.000000e+00> : vector<18xf32>
    %265 = vector.multi_reduction <add>, %260, %cst_110 [1] : vector<18x32xf32> to vector<18xf32>
    %266 = vector.shape_cast %265 : vector<18xf32> to vector<18x1xf32>
    %cst_111 = arith.constant 3.200000e+01 : f32
    %267 = vector.broadcast %cst_111 : f32 to vector<18x1xf32>
    %268 = arith.divf %266, %267 : vector<18x1xf32>
    %269 = vector.broadcast %268 : vector<18x1xf32> to vector<18x32xf32>
    %270 = arith.subf %260, %269 : vector<18x32xf32>
    %271 = arith.mulf %270, %270 : vector<18x32xf32>
    %cst_112 = arith.constant dense<0.000000e+00> : vector<18xf32>
    %272 = vector.multi_reduction <add>, %271, %cst_112 [1] : vector<18x32xf32> to vector<18xf32>
    %273 = vector.shape_cast %272 : vector<18xf32> to vector<18x1xf32>
    %cst_113 = arith.constant 3.200000e+01 : f32
    %274 = vector.broadcast %cst_113 : f32 to vector<18x1xf32>
    %275 = arith.divf %273, %274 : vector<18x1xf32>
    %276 = vector.broadcast %268 : vector<18x1xf32> to vector<18x32xf32>
    %277 = arith.subf %260, %276 : vector<18x32xf32>
    %cst_114 = arith.constant 9.99999974E-6 : f32
    %278 = vector.broadcast %cst_114 : f32 to vector<18x1xf32>
    %279 = arith.addf %275, %278 : vector<18x1xf32>
    %280 = math.rsqrt %279 : vector<18x1xf32>
    %281 = vector.broadcast %280 : vector<18x1xf32> to vector<18x32xf32>
    %282 = arith.mulf %277, %281 : vector<18x32xf32>
    %283 = vector.broadcast %262 : vector<1x32xf32> to vector<18x32xf32>
    %284 = arith.mulf %282, %283 : vector<18x32xf32>
    %285 = vector.broadcast %264 : vector<1x32xf32> to vector<18x32xf32>
    %286 = arith.addf %284, %285 : vector<18x32xf32>
    %c1_115 = arith.constant 1 : index
    %c0_116 = arith.constant 0 : index
    %c0_117 = arith.constant 0 : index
    %287 = vector.load %arg8[%c1_115, %c0_116, %c0_117] : memref<2x32x96xf32, #tpu.memory_space<vmem>>, vector<1x32x96xf32>
    %288 = vector.shape_cast %287 : vector<1x32x96xf32> to vector<32x96xf32>
    %cst_118 = arith.constant dense<0.000000e+00> : vector<18x96xf32>
    %289 = tpu.matmul %286, %288, %cst_118 {dimension_numbers = #tpu.dot_dimension_numbers<[1], [0], [0], [1], [0, 0, 1, 1], [], []>} : vector<18x32xf32>, vector<32x96xf32>, vector<18x96xf32> -> vector<18x96xf32>
    %c1_119 = arith.constant 1 : index
    %c0_120 = arith.constant 0 : index
    %c0_121 = arith.constant 0 : index
    %290 = vector.load %arg9[%c1_119, %c0_120, %c0_121] : memref<2x1x96xf32, #tpu.memory_space<vmem>>, vector<1x1x96xf32>
    %291 = vector.shape_cast %290 : vector<1x1x96xf32> to vector<1x96xf32>
    %292 = vector.broadcast %291 : vector<1x96xf32> to vector<18x96xf32>
    %293 = arith.addf %289, %292 : vector<18x96xf32>
    %294 = vector.extract_strided_slice %293 {offsets = [0, 0], sizes = [18, 32], strides = [1, 1]} : vector<18x96xf32> to vector<18x32xf32>
    %295 = vector.extract_strided_slice %293 {offsets = [0, 32], sizes = [18, 32], strides = [1, 1]} : vector<18x96xf32> to vector<18x32xf32>
    %296 = vector.extract_strided_slice %293 {offsets = [0, 64], sizes = [18, 32], strides = [1, 1]} : vector<18x96xf32> to vector<18x32xf32>
    %cst_122 = arith.constant 0.000000e+00 : f32
    %297 = vector.broadcast %cst_122 : f32 to vector<18x32xf32>
    %298 = vector.broadcast %34 : vector<1x32xf32> to vector<18x32xf32>
    %299 = arith.mulf %294, %298 : vector<18x32xf32>
    %cst_123 = arith.constant dense<0.000000e+00> : vector<18x18xf32>
    %300 = tpu.matmul %299, %295, %cst_123 {dimension_numbers = #tpu.dot_dimension_numbers<[1], [1], [0], [0], [0, 0, 1, 0], [], []>} : vector<18x32xf32>, vector<18x32xf32>, vector<18x18xf32> -> vector<18x18xf32>
    %cst_124 = arith.constant 0.353553385 : f32
    %301 = vector.broadcast %cst_124 : f32 to vector<18x18xf32>
    %302 = arith.mulf %300, %301 : vector<18x18xf32>
    %303 = arith.addf %302, %26 : vector<18x18xf32>
    %cst_125 = arith.constant dense<0xFF800000> : vector<18xf32>
    %304 = vector.multi_reduction <maximumf>, %303, %cst_125 [1] : vector<18x18xf32> to vector<18xf32>
    %305 = vector.shape_cast %304 : vector<18xf32> to vector<18x1xf32>
    %306 = vector.broadcast %305 : vector<18x1xf32> to vector<18x18xf32>
    %307 = arith.subf %303, %306 : vector<18x18xf32>
    %308 = math.exp %307 : vector<18x18xf32>
    %cst_126 = arith.constant dense<0.000000e+00> : vector<18xf32>
    %309 = vector.multi_reduction <add>, %308, %cst_126 [1] : vector<18x18xf32> to vector<18xf32>
    %310 = vector.shape_cast %309 : vector<18xf32> to vector<18x1xf32>
    %311 = tpu.reciprocal %310 {approx = true} : vector<18x1xf32> -> vector<18x1xf32>
    %312 = vector.broadcast %311 : vector<18x1xf32> to vector<18x18xf32>
    %313 = arith.mulf %308, %312 : vector<18x18xf32>
    %314 = vector.broadcast %34 : vector<1x32xf32> to vector<18x32xf32>
    %315 = arith.mulf %296, %314 : vector<18x32xf32>
    %cst_127 = arith.constant dense<0.000000e+00> : vector<18x32xf32>
    %316 = tpu.matmul %313, %315, %cst_127 {dimension_numbers = #tpu.dot_dimension_numbers<[1], [0], [0], [1], [0, 0, 1, 1], [], []>} : vector<18x18xf32>, vector<18x32xf32>, vector<18x32xf32> -> vector<18x32xf32>
    %317 = arith.addf %297, %316 : vector<18x32xf32>
    %318 = vector.broadcast %41 : vector<1x32xf32> to vector<18x32xf32>
    %319 = arith.mulf %294, %318 : vector<18x32xf32>
    %cst_128 = arith.constant dense<0.000000e+00> : vector<18x18xf32>
    %320 = tpu.matmul %319, %295, %cst_128 {dimension_numbers = #tpu.dot_dimension_numbers<[1], [1], [0], [0], [0, 0, 1, 0], [], []>} : vector<18x32xf32>, vector<18x32xf32>, vector<18x18xf32> -> vector<18x18xf32>
    %cst_129 = arith.constant 0.353553385 : f32
    %321 = vector.broadcast %cst_129 : f32 to vector<18x18xf32>
    %322 = arith.mulf %320, %321 : vector<18x18xf32>
    %323 = arith.addf %322, %26 : vector<18x18xf32>
    %cst_130 = arith.constant dense<0xFF800000> : vector<18xf32>
    %324 = vector.multi_reduction <maximumf>, %323, %cst_130 [1] : vector<18x18xf32> to vector<18xf32>
    %325 = vector.shape_cast %324 : vector<18xf32> to vector<18x1xf32>
    %326 = vector.broadcast %325 : vector<18x1xf32> to vector<18x18xf32>
    %327 = arith.subf %323, %326 : vector<18x18xf32>
    %328 = math.exp %327 : vector<18x18xf32>
    %cst_131 = arith.constant dense<0.000000e+00> : vector<18xf32>
    %329 = vector.multi_reduction <add>, %328, %cst_131 [1] : vector<18x18xf32> to vector<18xf32>
    %330 = vector.shape_cast %329 : vector<18xf32> to vector<18x1xf32>
    %331 = tpu.reciprocal %330 {approx = true} : vector<18x1xf32> -> vector<18x1xf32>
    %332 = vector.broadcast %331 : vector<18x1xf32> to vector<18x18xf32>
    %333 = arith.mulf %328, %332 : vector<18x18xf32>
    %334 = vector.broadcast %41 : vector<1x32xf32> to vector<18x32xf32>
    %335 = arith.mulf %296, %334 : vector<18x32xf32>
    %cst_132 = arith.constant dense<0.000000e+00> : vector<18x32xf32>
    %336 = tpu.matmul %333, %335, %cst_132 {dimension_numbers = #tpu.dot_dimension_numbers<[1], [0], [0], [1], [0, 0, 1, 1], [], []>} : vector<18x18xf32>, vector<18x32xf32>, vector<18x32xf32> -> vector<18x32xf32>
    %337 = arith.addf %317, %336 : vector<18x32xf32>
    %338 = vector.broadcast %48 : vector<1x32xf32> to vector<18x32xf32>
    %339 = arith.mulf %294, %338 : vector<18x32xf32>
    %cst_133 = arith.constant dense<0.000000e+00> : vector<18x18xf32>
    %340 = tpu.matmul %339, %295, %cst_133 {dimension_numbers = #tpu.dot_dimension_numbers<[1], [1], [0], [0], [0, 0, 1, 0], [], []>} : vector<18x32xf32>, vector<18x32xf32>, vector<18x18xf32> -> vector<18x18xf32>
    %cst_134 = arith.constant 0.353553385 : f32
    %341 = vector.broadcast %cst_134 : f32 to vector<18x18xf32>
    %342 = arith.mulf %340, %341 : vector<18x18xf32>
    %343 = arith.addf %342, %26 : vector<18x18xf32>
    %cst_135 = arith.constant dense<0xFF800000> : vector<18xf32>
    %344 = vector.multi_reduction <maximumf>, %343, %cst_135 [1] : vector<18x18xf32> to vector<18xf32>
    %345 = vector.shape_cast %344 : vector<18xf32> to vector<18x1xf32>
    %346 = vector.broadcast %345 : vector<18x1xf32> to vector<18x18xf32>
    %347 = arith.subf %343, %346 : vector<18x18xf32>
    %348 = math.exp %347 : vector<18x18xf32>
    %cst_136 = arith.constant dense<0.000000e+00> : vector<18xf32>
    %349 = vector.multi_reduction <add>, %348, %cst_136 [1] : vector<18x18xf32> to vector<18xf32>
    %350 = vector.shape_cast %349 : vector<18xf32> to vector<18x1xf32>
    %351 = tpu.reciprocal %350 {approx = true} : vector<18x1xf32> -> vector<18x1xf32>
    %352 = vector.broadcast %351 : vector<18x1xf32> to vector<18x18xf32>
    %353 = arith.mulf %348, %352 : vector<18x18xf32>
    %354 = vector.broadcast %48 : vector<1x32xf32> to vector<18x32xf32>
    %355 = arith.mulf %296, %354 : vector<18x32xf32>
    %cst_137 = arith.constant dense<0.000000e+00> : vector<18x32xf32>
    %356 = tpu.matmul %353, %355, %cst_137 {dimension_numbers = #tpu.dot_dimension_numbers<[1], [0], [0], [1], [0, 0, 1, 1], [], []>} : vector<18x18xf32>, vector<18x32xf32>, vector<18x32xf32> -> vector<18x32xf32>
    %357 = arith.addf %337, %356 : vector<18x32xf32>
    %358 = vector.broadcast %55 : vector<1x32xf32> to vector<18x32xf32>
    %359 = arith.mulf %294, %358 : vector<18x32xf32>
    %cst_138 = arith.constant dense<0.000000e+00> : vector<18x18xf32>
    %360 = tpu.matmul %359, %295, %cst_138 {dimension_numbers = #tpu.dot_dimension_numbers<[1], [1], [0], [0], [0, 0, 1, 0], [], []>} : vector<18x32xf32>, vector<18x32xf32>, vector<18x18xf32> -> vector<18x18xf32>
    %cst_139 = arith.constant 0.353553385 : f32
    %361 = vector.broadcast %cst_139 : f32 to vector<18x18xf32>
    %362 = arith.mulf %360, %361 : vector<18x18xf32>
    %363 = arith.addf %362, %26 : vector<18x18xf32>
    %cst_140 = arith.constant dense<0xFF800000> : vector<18xf32>
    %364 = vector.multi_reduction <maximumf>, %363, %cst_140 [1] : vector<18x18xf32> to vector<18xf32>
    %365 = vector.shape_cast %364 : vector<18xf32> to vector<18x1xf32>
    %366 = vector.broadcast %365 : vector<18x1xf32> to vector<18x18xf32>
    %367 = arith.subf %363, %366 : vector<18x18xf32>
    %368 = math.exp %367 : vector<18x18xf32>
    %cst_141 = arith.constant dense<0.000000e+00> : vector<18xf32>
    %369 = vector.multi_reduction <add>, %368, %cst_141 [1] : vector<18x18xf32> to vector<18xf32>
    %370 = vector.shape_cast %369 : vector<18xf32> to vector<18x1xf32>
    %371 = tpu.reciprocal %370 {approx = true} : vector<18x1xf32> -> vector<18x1xf32>
    %372 = vector.broadcast %371 : vector<18x1xf32> to vector<18x18xf32>
    %373 = arith.mulf %368, %372 : vector<18x18xf32>
    %374 = vector.broadcast %55 : vector<1x32xf32> to vector<18x32xf32>
    %375 = arith.mulf %296, %374 : vector<18x32xf32>
    %cst_142 = arith.constant dense<0.000000e+00> : vector<18x32xf32>
    %376 = tpu.matmul %373, %375, %cst_142 {dimension_numbers = #tpu.dot_dimension_numbers<[1], [0], [0], [1], [0, 0, 1, 1], [], []>} : vector<18x18xf32>, vector<18x32xf32>, vector<18x32xf32> -> vector<18x32xf32>
    %377 = arith.addf %357, %376 : vector<18x32xf32>
    %c1_143 = arith.constant 1 : index
    %c0_144 = arith.constant 0 : index
    %c0_145 = arith.constant 0 : index
    %378 = vector.load %arg10[%c1_143, %c0_144, %c0_145] : memref<2x32x32xf32, #tpu.memory_space<vmem>>, vector<1x32x32xf32>
    %379 = vector.shape_cast %378 : vector<1x32x32xf32> to vector<32x32xf32>
    %cst_146 = arith.constant dense<0.000000e+00> : vector<18x32xf32>
    %380 = tpu.matmul %377, %379, %cst_146 {dimension_numbers = #tpu.dot_dimension_numbers<[1], [0], [0], [1], [0, 0, 1, 1], [], []>} : vector<18x32xf32>, vector<32x32xf32>, vector<18x32xf32> -> vector<18x32xf32>
    %381 = arith.addf %260, %380 : vector<18x32xf32>
    %c1_147 = arith.constant 1 : index
    %c0_148 = arith.constant 0 : index
    %c0_149 = arith.constant 0 : index
    %382 = vector.load %arg11[%c1_147, %c0_148, %c0_149] : memref<2x1x32xf32, #tpu.memory_space<vmem>>, vector<1x1x32xf32>
    %383 = vector.shape_cast %382 : vector<1x1x32xf32> to vector<1x32xf32>
    %384 = vector.broadcast %383 : vector<1x32xf32> to vector<18x32xf32>
    %385 = arith.addf %381, %384 : vector<18x32xf32>
    %c1_150 = arith.constant 1 : index
    %c0_151 = arith.constant 0 : index
    %c0_152 = arith.constant 0 : index
    %386 = vector.load %arg12[%c1_150, %c0_151, %c0_152] : memref<2x1x32xf32, #tpu.memory_space<vmem>>, vector<1x1x32xf32>
    %387 = vector.shape_cast %386 : vector<1x1x32xf32> to vector<1x32xf32>
    %c1_153 = arith.constant 1 : index
    %c0_154 = arith.constant 0 : index
    %c0_155 = arith.constant 0 : index
    %388 = vector.load %arg13[%c1_153, %c0_154, %c0_155] : memref<2x1x32xf32, #tpu.memory_space<vmem>>, vector<1x1x32xf32>
    %389 = vector.shape_cast %388 : vector<1x1x32xf32> to vector<1x32xf32>
    %cst_156 = arith.constant dense<0.000000e+00> : vector<18xf32>
    %390 = vector.multi_reduction <add>, %385, %cst_156 [1] : vector<18x32xf32> to vector<18xf32>
    %391 = vector.shape_cast %390 : vector<18xf32> to vector<18x1xf32>
    %cst_157 = arith.constant 3.200000e+01 : f32
    %392 = vector.broadcast %cst_157 : f32 to vector<18x1xf32>
    %393 = arith.divf %391, %392 : vector<18x1xf32>
    %394 = vector.broadcast %393 : vector<18x1xf32> to vector<18x32xf32>
    %395 = arith.subf %385, %394 : vector<18x32xf32>
    %396 = arith.mulf %395, %395 : vector<18x32xf32>
    %cst_158 = arith.constant dense<0.000000e+00> : vector<18xf32>
    %397 = vector.multi_reduction <add>, %396, %cst_158 [1] : vector<18x32xf32> to vector<18xf32>
    %398 = vector.shape_cast %397 : vector<18xf32> to vector<18x1xf32>
    %cst_159 = arith.constant 3.200000e+01 : f32
    %399 = vector.broadcast %cst_159 : f32 to vector<18x1xf32>
    %400 = arith.divf %398, %399 : vector<18x1xf32>
    %401 = vector.broadcast %393 : vector<18x1xf32> to vector<18x32xf32>
    %402 = arith.subf %385, %401 : vector<18x32xf32>
    %cst_160 = arith.constant 9.99999974E-6 : f32
    %403 = vector.broadcast %cst_160 : f32 to vector<18x1xf32>
    %404 = arith.addf %400, %403 : vector<18x1xf32>
    %405 = math.rsqrt %404 : vector<18x1xf32>
    %406 = vector.broadcast %405 : vector<18x1xf32> to vector<18x32xf32>
    %407 = arith.mulf %402, %406 : vector<18x32xf32>
    %408 = vector.broadcast %387 : vector<1x32xf32> to vector<18x32xf32>
    %409 = arith.mulf %407, %408 : vector<18x32xf32>
    %410 = vector.broadcast %389 : vector<1x32xf32> to vector<18x32xf32>
    %411 = arith.addf %409, %410 : vector<18x32xf32>
    %c1_161 = arith.constant 1 : index
    %c0_162 = arith.constant 0 : index
    %c0_163 = arith.constant 0 : index
    %412 = vector.load %arg14[%c1_161, %c0_162, %c0_163] : memref<2x32x64xf32, #tpu.memory_space<vmem>>, vector<1x32x64xf32>
    %413 = vector.shape_cast %412 : vector<1x32x64xf32> to vector<32x64xf32>
    %cst_164 = arith.constant dense<0.000000e+00> : vector<18x64xf32>
    %414 = tpu.matmul %411, %413, %cst_164 {dimension_numbers = #tpu.dot_dimension_numbers<[1], [0], [0], [1], [0, 0, 1, 1], [], []>} : vector<18x32xf32>, vector<32x64xf32>, vector<18x64xf32> -> vector<18x64xf32>
    %c1_165 = arith.constant 1 : index
    %c0_166 = arith.constant 0 : index
    %c0_167 = arith.constant 0 : index
    %415 = vector.load %arg15[%c1_165, %c0_166, %c0_167] : memref<2x1x64xf32, #tpu.memory_space<vmem>>, vector<1x1x64xf32>
    %416 = vector.shape_cast %415 : vector<1x1x64xf32> to vector<1x64xf32>
    %417 = vector.broadcast %416 : vector<1x64xf32> to vector<18x64xf32>
    %418 = arith.addf %414, %417 : vector<18x64xf32>
    %cst_168 = arith.constant 5.000000e-01 : f32
    %419 = vector.broadcast %cst_168 : f32 to vector<18x64xf32>
    %420 = arith.mulf %419, %418 : vector<18x64xf32>
    %cst_169 = arith.constant 0.707106769 : f32
    %421 = vector.broadcast %cst_169 : f32 to vector<18x64xf32>
    %422 = arith.mulf %418, %421 : vector<18x64xf32>
    %423 = math.erf %422 : vector<18x64xf32>
    %cst_170 = arith.constant 1.000000e+00 : f32
    %424 = vector.broadcast %cst_170 : f32 to vector<18x64xf32>
    %425 = arith.addf %424, %423 : vector<18x64xf32>
    %426 = arith.mulf %420, %425 : vector<18x64xf32>
    %c1_171 = arith.constant 1 : index
    %c0_172 = arith.constant 0 : index
    %c0_173 = arith.constant 0 : index
    %427 = vector.load %arg16[%c1_171, %c0_172, %c0_173] : memref<2x64x32xf32, #tpu.memory_space<vmem>>, vector<1x64x32xf32>
    %428 = vector.shape_cast %427 : vector<1x64x32xf32> to vector<64x32xf32>
    %cst_174 = arith.constant dense<0.000000e+00> : vector<18x32xf32>
    %429 = tpu.matmul %426, %428, %cst_174 {dimension_numbers = #tpu.dot_dimension_numbers<[1], [0], [0], [1], [0, 0, 1, 1], [], []>} : vector<18x64xf32>, vector<64x32xf32>, vector<18x32xf32> -> vector<18x32xf32>
    %430 = arith.addf %385, %429 : vector<18x32xf32>
    %c1_175 = arith.constant 1 : index
    %c0_176 = arith.constant 0 : index
    %c0_177 = arith.constant 0 : index
    %431 = vector.load %arg17[%c1_175, %c0_176, %c0_177] : memref<2x1x32xf32, #tpu.memory_space<vmem>>, vector<1x1x32xf32>
    %432 = vector.shape_cast %431 : vector<1x1x32xf32> to vector<1x32xf32>
    %433 = vector.broadcast %432 : vector<1x32xf32> to vector<18x32xf32>
    %434 = arith.addf %430, %433 : vector<18x32xf32>
    %c0_178 = arith.constant 0 : index
    %c0_179 = arith.constant 0 : index
    %435 = vector.load %arg18[%c0_178, %c0_179] : memref<32x12xf32, #tpu.memory_space<vmem>>, vector<32x12xf32>
    %cst_180 = arith.constant dense<0.000000e+00> : vector<18x12xf32>
    %436 = tpu.matmul %434, %435, %cst_180 {dimension_numbers = #tpu.dot_dimension_numbers<[1], [0], [0], [1], [0, 0, 1, 1], [], []>} : vector<18x32xf32>, vector<32x12xf32>, vector<18x12xf32> -> vector<18x12xf32>
    %c0_181 = arith.constant 0 : index
    %c0_182 = arith.constant 0 : index
    %437 = vector.load %arg19[%c0_181, %c0_182] : memref<16x12xf32, #tpu.memory_space<vmem>>, vector<1x12xf32>
    tpu.vector_store %arg19[%c0_181, %c0_182], %61 {strides = array<i32>} : memref<16x12xf32, #tpu.memory_space<vmem>>, vector<1x12xf32>,
    %438 = vector.extract_strided_slice %436 {offsets = [2, 0], sizes = [7, 12], strides = [1, 1]} : vector<18x12xf32> to vector<7x12xf32>
    %c1_183 = arith.constant 1 : index
    %c0_184 = arith.constant 0 : index
    %439 = vector.load %arg19[%c1_183, %c0_184] : memref<16x12xf32, #tpu.memory_space<vmem>>, vector<7x12xf32>
    tpu.vector_store %arg19[%c1_183, %c0_184], %438 {strides = array<i32>} : memref<16x12xf32, #tpu.memory_space<vmem>>, vector<7x12xf32>,
    %c8 = arith.constant 8 : index
    %c0_185 = arith.constant 0 : index
    %440 = vector.load %arg19[%c8, %c0_185] : memref<16x12xf32, #tpu.memory_space<vmem>>, vector<1x12xf32>
    tpu.vector_store %arg19[%c8, %c0_185], %61 {strides = array<i32>} : memref<16x12xf32, #tpu.memory_space<vmem>>, vector<1x12xf32>,
    %441 = vector.extract_strided_slice %436 {offsets = [11, 0], sizes = [7, 12], strides = [1, 1]} : vector<18x12xf32> to vector<7x12xf32>
    %c9_186 = arith.constant 9 : index
    %c0_187 = arith.constant 0 : index
    %442 = vector.load %arg19[%c9_186, %c0_187] : memref<16x12xf32, #tpu.memory_space<vmem>>, vector<7x12xf32>
    tpu.vector_store %arg19[%c9_186, %c0_187], %441 {strides = array<i32>} : memref<16x12xf32, #tpu.memory_space<vmem>>, vector<7x12xf32>,
    return
  }
}

</mosaic_0001>

<bundles_post_ra>
// kernel: tile.9
= control target key start
LH: loop header
LB: loop body
LE: loop exit
PB: predicated region body
PF: predicated region fallthrough
CT: control target
= control target key end

     0   :  { %vm3_vm0 = vcmask 261120   ;;  %s6_s6 = smov 3  ;;  %s48_s0 = inlined_call_operand.vmem [shape: f32[2,9,32], index: 0, kind: input, shape index: {}]   ;;  %s49_s1 = inlined_call_operand.vmem [shape: f32[18,32], index: 1, kind: output, shape index: {}]  }
   0x1   :  { %v2_v0 = vld [vmem:[%s48_s0] sm:$0xff]   ;;  %v18_v2 = vld [vmem:[%s48_s0 + $0x11] sm:$0xff]  }
   0x2   :  { %v16_v1 = vld [vmem:[%s48_s0 + $0x8] ss:$8 sm:%s6_s6]   ;;  %4 = vst.msk [vmem:[%s49_s1] sm:$0xff] %vm3_vm0, %v2_v0   ;;  %19 = vst.msk [vmem:[%s49_s1 + $0xa] sm:$0xff] %vm3_vm0, %v18_v2  }
   0x3   :  { %17 = vst.msk [vmem:[%s49_s1 + $0x8] sm:$0x3] %vm3_vm0, %v16_v1  }

// kernel: gpt_easy_dvq_forward.1
= control target key start
LH: loop header
LB: loop body
LE: loop exit
PB: predicated region body
PF: predicated region fallthrough
CT: control target
= control target key end

     0   :  { %s5911_s0 = inlined_call_operand.vmem [shape: s32[14,1], index: 0, kind: input, shape index: {}]   ;;  %s5912_s1 = inlined_call_operand.vmem [shape: f32[4,16], index: 1, kind: input, shape index: {}]   ;;  %s5913_s2 = inlined_call_operand.vmem [shape: f32[12,32], index: 2, kind: input, shape index: {}]   ;;  %s5914_s3 = inlined_call_operand.vmem [shape: f32[16,32], index: 3, kind: input, shape index: {}]   ;;  %s5915_s4 = inlined_call_operand.vmem [shape: f32[1,32], index: 4, kind: input, shape index: {}]   ;;  %s5916_s5 = inlined_call_operand.vmem [shape: f32[18,32], index: 5, kind: input, shape index: {}]   ;;  %s5917_s6 = inlined_call_operand.vmem [shape: f32[2,1,32], index: 6, kind: input, shape index: {}]   ;;  %s5918_s7 = inlined_call_operand.vmem [shape: f32[2,1,32], index: 7, kind: input, shape index: {}]   ;;  %s5919_s8 = inlined_call_operand.vmem [shape: f32[2,32,96], index: 8, kind: input, shape index: {}]   ;;  %s5920_s9 = inlined_call_operand.vmem [shape: f32[2,1,96], index: 9, kind: input, shape index: {}]   ;;  %s5921_s10 = inlined_call_operand.vmem [shape: f32[2,32,32], index: 10, kind: input, shape index: {}]   ;;  %s5922_s11 = inlined_call_operand.vmem [shape: f32[2,1,32], index: 11, kind: input, shape index: {}]   ;;  %s5923_s12 = inlined_call_operand.vmem [shape: f32[2,1,32], index: 12, kind: input, shape index: {}]   ;;  %s5924_s13 = inlined_call_operand.vmem [shape: f32[2,1,32], index: 13, kind: input, shape index: {}]   ;;  %s5925_s14 = inlined_call_operand.vmem [shape: f32[2,32,64], index: 14, kind: input, shape index: {}]   ;;  %s5926_s15 = inlined_call_operand.vmem [shape: f32[2,1,64], index: 15, kind: input, shape index: {}]   ;;  %s5927_s16 = inlined_call_operand.vmem [shape: f32[2,64,32], index: 16, kind: input, shape index: {}]   ;;  %s5928_s17 = inlined_call_operand.vmem [shape: f32[2,1,32], index: 17, kind: input, shape index: {}]   ;;  %s5929_s18 = inlined_call_operand.vmem [shape: f32[32,12], index: 18, kind: input, shape index: {}]   ;;  %s5930_s19 = inlined_call_operand.hbm [shape: f32[16,12], index: 19, kind: output, shape index: {}]  }
   0x1   :  { %5935 = sst [smem:[#allocation6_spill]] %s5911_s0 }
   0x2   :  { %5936 = sst [smem:[#allocation7_spill]] %s5912_s1 }
   0x3   :  { %5937 = sst [smem:[#allocation8_spill]] %s5913_s2 }
   0x4   :  { %5938 = sst [smem:[#allocation9_spill]] %s5914_s3 }
   0x5   :  { %5939 = sst [smem:[#allocation10_spill]] %s5924_s13 }
   0x6   :  { %s5940_s20 = sld [smem:[#allocation6_spill]]  ;;  %s5941_s13 = sld [smem:[#allocation9_spill]]  ;;  %v4671_v2 = vmov 0   ;;  %vm238_vm0 = vcmask 1043456   ;;  %v4672_v6 = vmov 0.0|0.0  }
   0x7   :  { %4454 = vset.pattern.permute.xlu0 %v4671_v2  ;;  %s5942_s25 = sld [smem:[#allocation8_spill]]  ;;  %4276 = vmatprep.subr.bf16.mxu0 %v4672_v6 }
   0xc   :  { %v215_v0 = vld [vmem:[%s5940_s20] sm:$0xff]  ;;  %v133_v3 = vld [vmem:[%s5941_s13 + $0x8] sm:$0xff] }
   0xd   :  { %v132_v1 = vld [vmem:[%s5941_s13] sm:$0xff]  ;;  %v230_v5 = vld [vmem:[%s5942_s25 + $0x8] sm:$0xf]  ;;  %218 = vperm.xlu0 %4454, %v215_v0  }
   0xe   :  { %v229_v4 = vld [vmem:[%s5942_s25] sm:$0xff]  ;;  %v4277_v7 = vpack.c.bf16 %v133_v3, %v132_v1 }
   0xf   :  { %v4279_v8 = vpack.c.bf16 %v230_v5, %v229_v4 }
  0x10   :  { %24 = vsyncpa [#allocation4], 0  ;;  %v216_v9 = vld [vmem:[%s5940_s20 + $0x8] sm:$0x3f]  ;;  %vm4673_vm1 = vmmov 1   ;;  %4278 = vmatpush3.bf16.msra.mxu0 %v4277_v7  ;;  %vm4674_vm3 = vmmov 0   ;;  %v63_v12 = vlaneseq }
  0x11   :  { %vm4280_vm2 = vmpackc.low %vm238_vm0, %vm4673_vm1  ;;  %v4675_v10 = vmov 0.0   ;;  %s5943_s0 = sld [smem:[#allocation7_spill]]  ;;  %vm141_vm4 = vcmask 130048   ;;  %221 = vperm.xlu0 %4454, %v216_v9   ;;  %4285 = vmatprep.subr.bf16.mxu0 %v4672_v6  ;;  %vm231_vm5 = vcmask 97280   ;;  %v3521_v18 = vld [vmem:[%s5915_s4] ss:$0 sm:$0xff] }
  0x12   :  { %4281 = vmatprep.subr.msk.bf16.mxu1 %vm4280_vm2, %v4279_v8  ;;  %3857 = vmatprep.mubr.msk.f32.mxu0 %vm4674_vm3, %v4675_v10  ;;  %v4811_v13 = vand.u32 127, %v63_v12  ;;  %vm317_vm8 = vcmask 254976   ;;  %vm321_vm9 = vcmask 257026   ;;  %vm325_vm10 = vcmask 259072   ;;  %v332_v24 = vld [vmem:[%s5916_s5 + $0x10] sm:$0x3] }
  0x13   :  { %4284 = vmatpush3.bf16.msk.msra.mxu1 %vm4280_vm2, %v4279_v8  ;;  %vm319_vm11 = vcmask 260096   ;;  %vm323_vm12 = vcmask 261127   ;;  %v330_v25 = vld [vmem:[%s5916_s5] sm:$0xff]  ;;  %vm338_vm13 = vcmask 261120   ;;  %v331_v30 = vld [vmem:[%s5916_s5 + $0x8] sm:$0xff]  ;;  %v399_v54 = vld [vmem:[%s5919_s8 + $0x10] sm:$0xff] }
  0x14   :  { %4291 = vmatprep.subr.bf16.mxu1 %v4672_v6  ;;  %v397_v51 = vld [vmem:[%s5919_s8] sm:$0xff]  ;;  %v398_v52 = vld [vmem:[%s5919_s8 + $0x8] sm:$0xff]  ;;  %v400_v55 = vld [vmem:[%s5919_s8 + $0x18] sm:$0xff]  ;;  %s4676_s4 = smov 96   ;;  %vm114_vm15 = vcmp.ge.s32.totalorder %v4811_v13, 8  ;;  %vm115_vm0 = vcmp.lt.s32.totalorder %v4811_v13, 16 }
  0x15   :  { %v4286_v53 = vpack.c.bf16 %v398_v52, %v397_v51  ;;  %v4289_v56 = vpack.c.bf16 %v400_v55, %v399_v54  ;;  %v3528_v3 = vld [vmem:[%s5917_s6] ss:$0 sm:$0xff]  ;;  %vm4895_vm14 = vmpackc.low %vm338_vm13, %vm338_vm13  ;;  %vm110_vm1 = vcmp.lt.s32.totalorder %v4811_v13, 8  ;;  %s4678_s22 = smov 64   ;;  %s5946_s26 = sld [smem:[#allocation10_spill]] }
  0x16   :  { %v3529_v5 = vld [vmem:[%s5918_s7] ss:$0 sm:$0xff]  ;;  %vm116_vm2 = vmand %vm114_vm15, %vm115_vm0 }
  0x17   :  { %v131_v11 = vld [vmem:[%s5943_s0] sm:$0xf] }
  0x18   :  { %3858 = vmatmul.mubr.msk.f32.vlgmr.msra.gmra.mrb[0].mxu0 %vm141_vm4, %v131_v11  ;;  %vm119_vm4 = vcmp.ge.s32.totalorder %v4811_v13, 16 }
  0x19   :  { %3875 = vmatprep.mubr.msk.f32.mxu0 %vm4674_vm3, %v4675_v10  ;;  %4287 = vmatpush3.bf16.msra.mxu0 %v4286_v53 }
  0x1a   :  { %4288 = vmatprep.subr.bf16.mxu0 %v4672_v6 }
  0x1d   :  { %4290 = vmatpush3.bf16.msra.mxu0 %v4289_v56  ;;  %v64_v56 = vshrl.u32 %v63_v12, 7 }
  0x1e   :  { %4295 = vmatprep.subr.bf16.mxu0 %v4672_v6 }
  0x8c   :  { %v219_v14 = vpop.permute.xlu0 %218 }
  0x8d   :  { %vm223_vm6 = vcmp.eq.s32.totalorder %v219_v14, %v4811_v13 }
  0x8e   :  { %v3523_v15 = vsel %vm223_vm6, 1.0, %v4675_v10 }
  0x8f   :  { %3864 = vmatprep.mubr.msk.f32.mxu1 %vm231_vm5, %v3523_v15 }
  0x90   :  { %v222_v16 = vpop.permute.xlu0 %221 }
  0x91   :  { %vm224_vm7 = vcmp.eq.s32.totalorder %v222_v16, %v4811_v13 }
  0x92   :  { %v3524_v17 = vsel %vm224_vm7, 1.0, %v4675_v10  ;;  %vm124_vm7 = vcmp.ge.s32.totalorder %v4811_v13, 24 }
  0x93   :  { %3865 = vmatmul.mubr.msk.f32.vlgmr.msra.gmra.mrb[0].mxu1 %vm231_vm5, %v3524_v17  ;;  %vm120_vm5 = vcmp.lt.s32.totalorder %v4811_v13, 24 }
  0x94   :  { %3890 = vmatprep.mubr.msk.f32.mxu1 %vm4674_vm3, %v4675_v10  ;;  %vm121_vm6 = vmand %vm119_vm4, %vm120_vm5 }
  0xeb   :  { %v211_v19 = vpop.f32.mrb[0].mxu0 }
  0xec   :  { %v212_v20 = vadd.f32 %v3521_v18, %v211_v19  ;;  %v3859_v21 = vpop.f32.mrb[1].mxu0 }
  0xee   :  { %318 = vst.msk [vmem:[#allocation2] sm:$0x3] %vm317_vm8, %v212_v20 }
  0xef   :  { %322 = vst.msk [vmem:[#allocation2 + $0x7] sm:$0xc] %vm321_vm9, %v212_v20  ;;  %vm125_vm9 = vcmp.lt.s32.totalorder %v4811_v13, 32 }
 0x166   :  { %v3866_v22 = vpop.f32.mrb[0].mxu1 }
 0x167   :  { %326 = vst.msk [vmem:[#allocation2 + $0xc] sm:$0x3f] %vm325_vm10, %v3866_v22  ;;  %v308_v23 = vpop.f32.mrb[1].mxu1  ;;  %v3530_v22 = vld [vmem:[%s5920_s9] ss:$0 sm:$0xff]  ;;  %vm126_vm10 = vmand %vm124_vm7, %vm125_vm9 }
 0x168   :  { %320 = vst.msk [vmem:[#allocation2 + $0x2] sm:$0x7f] %vm319_vm11, %v308_v23  ;;  %v4976_v52 = vsel %vm126_vm10, 1.0, %v4675_v10  ;;  %vm100_vm11 = vcmp.ge.s32.totalorder %v4811_v13, 9 }
 0x169   :  { %324 = vst.msk [vmem:[#allocation2 + $0x4] sm:$0x80] %vm323_vm12, %v308_v23 }
 0x16e   :  { %v329_v26 = vld [vmem:[#allocation2 + $0x10] sm:$0x3] }
 0x16f   :  { %v4829_v27 = vadd.f32 %v332_v24, %v329_v26  ;;  %v327_v28 = vld [vmem:[#allocation2] sm:$0xff] }
 0x170   :  { %v328_v29 = vld [vmem:[#allocation2 + $0x8] sm:$0xff]  ;;  %v4834_v31 = vadd.f32 %v330_v25, %v327_v28 }
 0x171   :  { %v345_v32 = vsel %vm317_vm8, %v4829_v27, 0.0  ;;  %v4840_v34 = vadd.f32 %v331_v30, %v328_v29 }
 0x172   :  { %346 = vadd.xlane.f32.xlu0 %v345_v32  ;;  %v339_v33 = vsel %vm338_vm13, %v4834_v31, 0.0 }
 0x173   :  { %340 = vadd.xlane.f32.xlu1 %v339_v33  ;;  %v342_v35 = vsel %vm338_vm13, %v4840_v34, 0.0 }
 0x177   :  { %343 = vadd.xlane.f32.xlu1 %v342_v35 }
 0x1ff   :  { %v347_v36 = vpop.xlane.xlu0 %346 }
 0x200   :  { %v341_v37 = vpop.xlane.xlu1 %340  ;;  %v351_v39 = vmul.f32 0.03125, %v347_v36 }
 0x201   :  { %v349_v38 = vmul.f32 0.03125, %v341_v37 }
 0x202   :  { %v354_v44 = vsub.f32 %v4829_v27, %v351_v39  ;;  %v4909_v39 = vsel %vm110_vm1, 1.0, %v4675_v10 }
 0x203   :  { %v352_v40 = vsub.f32 %v4834_v31, %v349_v38 }
 0x204   :  { %v344_v41 = vpop.xlane.xlu1 %343  ;;  %v357_v49 = vmul.f32 %v354_v44, %v354_v44 }
 0x205   :  { %v350_v42 = vmul.f32 0.03125, %v344_v41  ;;  %v355_v43 = vmul.f32 %v352_v40, %v352_v40 }
 0x206   :  { %v364_v50 = vsel %vm317_vm8, %v357_v49, 0.0 }
 0x207   :  { %v353_v45 = vsub.f32 %v4840_v34, %v350_v42  ;;  %v358_v46 = vsel %vm338_vm13, %v355_v43, 0.0 }
 0x208   :  { %359 = vadd.xlane.f32.xlu1 %v358_v46 }
 0x209   :  { %v356_v47 = vmul.f32 %v353_v45, %v353_v45 }
 0x20b   :  { %v361_v48 = vsel %vm338_vm13, %v356_v47, 0.0 }
 0x20c   :  { %362 = vadd.xlane.f32.xlu1 %v361_v48  ;;  %v4948_v48 = vsel %vm121_vm6, 1.0, %v4675_v10  ;;  %vm82_vm6 = vcmp.le.s32.totalorder %v4811_v13, %v64_v56 }
 0x210   :  { %365 = vadd.xlane.f32.xlu1 %v364_v50 }
 0x295   :  { %v360_v57 = vpop.xlane.xlu1 %359 }
 0x296   :  { %v367_v58 = vmul.f32 0.03125, %v360_v57  ;;  %v66_v57 = vadd.s32 16, %v64_v56 }
 0x298   :  { %v370_v59 = vadd.f32 1e-05, %v367_v58  ;;  %vm96_vm12 = vcmp.lt.s32.totalorder %v66_v57, 18  ;;  %vm84_vm15 = vcmp.le.s32.totalorder %v4811_v13, %v66_v57  ;;  %v4677_v58 = vmov -1e+30  }
 0x299   :  { %v363_v60 = vpop.xlane.xlu1 %362  ;;  %vm103_vm0 = vmand %vm96_vm12, %vm100_vm11  ;;  %vm610_vm12 = vcmask 146432  }
 0x29a   :  { %4515 = vrsqrt.f32 %v370_v59  ;;  %v368_v61 = vmul.f32 0.03125, %v363_v60  ;;  %vm106_vm1 = vmand %vm103_vm0, %vm84_vm15  ;;  %v65_v60 = vadd.s32 8, %v64_v56  ;;  %vm810_vm15 = vcmask 1041408  }
 0x29b   :  { %v5001_v59 = vsel %vm106_vm1, 0.0, %v4677_v58  ;;  %vm1769_vm0 = vcmask 523264   ;;  %vm3493_vm1 = vcmask 97282  }
 0x29c   :  { %v371_v62 = vadd.f32 1e-05, %v368_v61  ;;  %vm83_vm4 = vcmp.le.s32.totalorder %v4811_v13, %v65_v60  ;;  %vm92_vm5 = vcmp.ge.s32.totalorder %v65_v60, 9 }
 0x29d   :  { %v366_v63 = vpop.xlane.xlu1 %365  ;;  %vm102_vm9 = vmand %vm92_vm5, %vm100_vm11  ;;  %vm617_vm11 = vcmask 140288  }
 0x29e   :  { %4517 = vrsqrt.f32 %v371_v62  ;;  %v369_v0 = vmul.f32 0.03125, %v366_v63  ;;  %v5005_v62 = vsel %vm82_vm6, 0.0, %v4677_v58  ;;  %vm105_vm10 = vmand %vm102_vm9, %vm83_vm4 }
 0x2a0   :  { %v372_v1 = vadd.f32 1e-05, %v369_v0 }
 0x2a2   :  { %4519 = vrsqrt.f32 %v372_v1 }
 0x2a4   :  { %v4516_v2 = vpop.eup %4515 }
 0x2a5   :  { %v376_v4 = vmul.f32 %v4516_v2, %v352_v40  ;;  %v4912_v40 = vsel %vm116_vm2, 1.0, %v4675_v10  ;;  %vm73_vm2 = vcmp.lt.s32.totalorder %v65_v60, 9 }
 0x2a6   :  { %vm86_vm7 = vmand %vm73_vm2, %vm83_vm4  ;;  %vm3497_vm2 = vcmask 97283  }
 0x2a7   :  { %v385_v7 = vmul.f32 %v3528_v3, %v376_v4  ;;  %v89_v2 = vsel %vm86_vm7, 0.0, %v4677_v58 }
 0x2a8   :  { %v4518_v8 = vpop.eup %4517 }
 0x2a9   :  { %v394_v9 = vadd.f32 %v3529_v5, %v385_v7  ;;  %v377_v11 = vmul.f32 %v4518_v8, %v353_v45  ;;  %v5008_v8 = vsel %vm105_vm10, 0.0, %v89_v2 }
 0x2ab   :  { %3876 = vmatmul.mubr.msk.f32.vlgmr.msra.gmra.mrb[2].mxu0 %vm338_vm13, %v394_v9  ;;  %v386_v14 = vmul.f32 %v3528_v3, %v377_v11 }
 0x2ac   :  { %v4520_v15 = vpop.eup %4519  ;;  %3878 = vmatprep.mubr.msk.f32.mxu0 %vm4674_vm3, %v4675_v10 }
 0x2ad   :  { %v395_v16 = vadd.f32 %v3529_v5, %v386_v14  ;;  %v378_v17 = vmul.f32 %v4520_v15, %v354_v44 }
 0x2af   :  { %3879 = vmatmul.mubr.msk.f32.gmra.mrb[4].mxu0 %vm338_vm13, %v395_v16  ;;  %v387_v18 = vmul.f32 %v3528_v3, %v378_v17 }
 0x2b0   :  { %3881 = vmatprep.mubr.msk.f32.mxu0 %vm4674_vm3, %v4675_v10 }
 0x2b1   :  { %v396_v19 = vadd.f32 %v3529_v5, %v387_v18 }
 0x2b3   :  { %3882 = vmatmul.mubr.msk.f32.gmra.mrb[6].mxu0 %vm338_vm13, %v396_v19 }
 0x2b4   :  { %3905 = vmatprep.mubr.msk.f32.mxu0 %vm4674_vm3, %v4675_v10 }
 0x37e   :  { %v483_v20 = vpop.f32.mrb[2].mxu0 }
 0x37f   :  { %v3877_v21 = vpop.f32.mrb[3].mxu0  ;;  %v4882_v24 = vadd.f32 %v3530_v22, %v483_v20 }
 0x381   :  { %v497_v42 = vmul.f32 %v4909_v39, %v4882_v24  ;;  %v652_v43 = vmul.f32 %v4912_v40, %v4882_v24  ;;  %v995_v49 = vmul.f32 %v4948_v48, %v4882_v24  ;;  %v1238_v53 = vmul.f32 %v4976_v52, %v4882_v24 }
 0x382   :  { %v488_v23 = vpop.f32.mrb[4].mxu0 }
 0x383   :  { %v4884_v25 = vadd.f32 %v3530_v22, %v488_v23  ;;  %v3880_v26 = vpop.f32.mrb[5].mxu0 }
 0x385   :  { %v4455_v28 = vpack.i.bf16 %v4884_v25, %v4882_v24  ;;  %v498_v44 = vmul.f32 %v4909_v39, %v4884_v25  ;;  %v653_v45 = vmul.f32 %v4912_v40, %v4884_v25  ;;  %v996_v50 = vmul.f32 %v4948_v48, %v4884_v25 }
 0x386   :  { %v493_v29 = vpop.f32.mrb[6].mxu0  ;;  %v1239_v54 = vmul.f32 %v4976_v52, %v4884_v25 }
 0x387   :  { %4456 = vrot.lane.b32.xlu1 %v4455_v28, %s4676_s4  ;;  %v3883_v30 = vpop.f32.mrb[7].mxu0  ;;  %v4889_v32 = vadd.f32 %v3530_v22, %v493_v29 }
 0x389   :  { %v499_v46 = vmul.f32 %v4909_v39, %v4889_v32  ;;  %v654_v47 = vmul.f32 %v4912_v40, %v4889_v32  ;;  %v997_v51 = vmul.f32 %v4948_v48, %v4889_v32  ;;  %v1240_v55 = vmul.f32 %v4976_v52, %v4889_v32 }
 0x38b   :  { %507 = vrot.lane.b32.xlu1 %v4889_v32, %s4676_s4 }
 0x3f9   :  { %v4457_v33 = vpop.permute.xlu1 %4456 }
 0x3fa   :  { %v4459_v35 = vunpack.i.h.bf16 %v4457_v33  ;;  %v4458_v36 = vunpack.i.l.bf16 %v4457_v33 }
 0x3fc   :  { %v4292_v38 = vpack.c.bf16 %v4459_v35, %v4458_v36 }
 0x3fd   :  { %v508_v41 = vpop.permute.xlu1 %507 }
 0x3fe   :  { %4294 = vmatpush3.bf16.xpose.msk.msra.mxu1 %vm4895_vm14, %v4292_v38  ;;  %4298 = vmatpush3.bf16.xpose.msk.msra.mxu0 %vm4895_vm14, %v4292_v38 }
 0x3ff   :  { %3888 = vmatprep.subr.mxu1 %v4675_v10  ;;  %3903 = vmatprep.subr.mxu0 %v4675_v10 }
 0x406   :  { %3889 = vmatpush3.xpose.msk.msra.mxu1 %vm338_vm13, %v508_v41  ;;  %3904 = vmatpush3.xpose.msk.msra.mxu0 %vm338_vm13, %v508_v41 }
 0x407   :  { %4305 = vmatprep.subr.bf16.mxu0 %v4672_v6  ;;  %4299 = vmatprep.subr.bf16.mxu1 %v4672_v6 }
 0x409   :  { %3891 = vmatmul.mubr.msk.f32.vlgmr.msra.gmra.mrb[2].mxu1 %vm338_vm13, %v497_v42  ;;  %3906 = vmatmul.mubr.msk.f32.vlgmr.msra.gmra.mrb[8].mxu0 %vm338_vm13, %v652_v43 }
 0x40a   :  { %4308 = vmatpush3.bf16.xpose.msk.msra.mxu0 %vm4895_vm14, %v4292_v38  ;;  %3893 = vmatprep.mubr.msk.f32.mxu1 %vm4674_vm3, %v4675_v10 }
 0x40b   :  { %3908 = vmatprep.mubr.msk.f32.mxu0 %vm4674_vm3, %v4675_v10  ;;  %3948 = vmatprep.subr.mxu0 %v4675_v10 }
 0x40d   :  { %3894 = vmatmul.mubr.msk.f32.gmra.mrb[4].mxu1 %vm338_vm13, %v498_v44  ;;  %3909 = vmatmul.mubr.msk.f32.gmra.mrb[10].mxu0 %vm338_vm13, %v653_v45  ;;  %v4465_v44 = vpack.i.bf16 %v4976_v52, %v4948_v48 }
 0x40e   :  { %3896 = vmatprep.mubr.msk.f32.mxu1 %vm4674_vm3, %v4675_v10  ;;  %3911 = vmatprep.mubr.msk.f32.mxu0 %vm4674_vm3, %v4675_v10 }
 0x411   :  { %3897 = vmatmul.mubr.msk.f32.gmra.mrb[6].mxu1 %vm338_vm13, %v499_v46  ;;  %3912 = vmatmul.mubr.msk.f32.gmra.mrb[12].mxu0 %vm338_vm13, %v654_v47 }
 0x412   :  { %3949 = vmatpush3.xpose.msk.msra.mxu0 %vm338_vm13, %v508_v41  ;;  %3950 = vmatprep.mubr.msk.f32.mxu0 %vm4674_vm3, %v4675_v10 }
 0x413   :  { %4312 = vmatprep.subr.bf16.mxu0 %v4672_v6  ;;  %3920 = vmatprep.mubr.msk.f32.mxu1 %vm4674_vm3, %v4675_v10 }
 0x415   :  { %3951 = vmatmul.mubr.msk.f32.vlgmr.msra.gmra.mrb[14].mxu0 %vm338_vm13, %v995_v49 }
 0x416   :  { %4315 = vmatpush3.bf16.xpose.msk.msra.mxu0 %vm4895_vm14, %v4292_v38  ;;  %3953 = vmatprep.mubr.msk.f32.mxu0 %vm4674_vm3, %v4675_v10  ;;  %v4460_v38 = vpack.i.bf16 %v4909_v39, %v4912_v40 }
 0x417   :  { %3978 = vmatprep.subr.mxu0 %v4675_v10 }
 0x419   :  { %3954 = vmatmul.mubr.msk.f32.gmra.mrb[16].mxu0 %vm338_vm13, %v996_v50 }
 0x41a   :  { %3956 = vmatprep.mubr.msk.f32.mxu0 %vm4674_vm3, %v4675_v10 }
 0x41d   :  { %3957 = vmatmul.mubr.msk.f32.gmra.mrb[18].mxu0 %vm338_vm13, %v997_v51 }
 0x41e   :  { %3979 = vmatpush3.xpose.msk.msra.mxu0 %vm338_vm13, %v508_v41  ;;  %3980 = vmatprep.mubr.msk.f32.mxu0 %vm4674_vm3, %v4675_v10 }
 0x41f   :  { %4319 = vmatprep.subr.bf16.mxu0 %v4672_v6 }
 0x421   :  { %3981 = vmatmul.mubr.msk.f32.vlgmr.msra.gmra.mrb[20].mxu0 %vm338_vm13, %v1238_v53 }
 0x422   :  { %3983 = vmatprep.mubr.msk.f32.mxu0 %vm4674_vm3, %v4675_v10 }
 0x425   :  { %3984 = vmatmul.mubr.msk.f32.gmra.mrb[22].mxu0 %vm338_vm13, %v1239_v54 }
 0x426   :  { %3986 = vmatprep.mubr.msk.f32.mxu0 %vm4674_vm3, %v4675_v10 }
 0x429   :  { %3987 = vmatmul.mubr.msk.f32.gmra.mrb[24].mxu0 %vm338_vm13, %v1240_v55 }
 0x42a   :  { %4012 = vmatprep.mubr.msk.f32.mxu0 %vm4674_vm3, %v4675_v10 }
 0x4dc   :  { %v590_v12 = vpop.f32.mrb[2].mxu1  ;;  %v730_v61 = vpop.f32.mrb[8].mxu0 }
 0x4dd   :  { %v744_v63 = vmul.f32 0.35355338, %v730_v61  ;;  %v3892_v0 = vpop.f32.mrb[3].mxu1  ;;  %v3907_v1 = vpop.f32.mrb[9].mxu0  ;;  %v604_v3 = vmul.f32 0.35355338, %v590_v12 }
 0x4df   :  { %v747_v4 = vadd.f32 %v744_v63, %v5005_v62  ;;  %v607_v16 = vadd.f32 %v604_v3, %v5005_v62 }
 0x4e0   :  { %v595_v5 = vpop.f32.mrb[4].mxu1  ;;  %v735_v7 = vpop.f32.mrb[10].mxu0 }
 0x4e1   :  { %v745_v9 = vmul.f32 0.35355338, %v735_v7  ;;  %v3895_v11 = vpop.f32.mrb[5].mxu1  ;;  %v3910_v14 = vpop.f32.mrb[11].mxu0  ;;  %v750_v15 = vsel %vm610_vm12, %v747_v4, -inf  ;;  %v611_v22 = vsel %vm610_vm12, %v607_v16, -inf }
 0x4e2   :  { %751 = vmax.xlane.f32.xlu0 %v750_v15 }
 0x4e3   :  { %v5013_v17 = vadd.f32 %v745_v9, %v5008_v8  ;;  %v605_v9 = vmul.f32 0.35355338, %v595_v5 }
 0x4e4   :  { %v600_v18 = vpop.f32.mrb[6].mxu1  ;;  %v740_v19 = vpop.f32.mrb[12].mxu0 }
 0x4e5   :  { %v3898_v20 = vpop.f32.mrb[7].mxu1  ;;  %v3913_v21 = vpop.f32.mrb[13].mxu0  ;;  %v753_v23 = vsel %vm610_vm12, %v5013_v17, -inf  ;;  %v746_v15 = vmul.f32 0.35355338, %v740_v19 }
 0x4e6   :  { %612 = vmax.xlane.f32.xlu0 %v611_v22  ;;  %754 = vmax.xlane.f32.xlu1 %v753_v23  ;;  %v5060_v20 = vadd.f32 %v605_v9, %v5008_v8  ;;  %v606_v22 = vmul.f32 0.35355338, %v600_v18 }
 0x4e8   :  { %v1073_v26 = vpop.f32.mrb[14].mxu0  ;;  %v614_v23 = vsel %vm610_vm12, %v5060_v20, -inf }
 0x4e9   :  { %v3952_v28 = vpop.f32.mrb[15].mxu0 }
 0x4ea   :  { %v5065_v28 = vadd.f32 %v746_v15, %v5001_v59 }
 0x4ec   :  { %v1078_v29 = vpop.f32.mrb[16].mxu0  ;;  %v756_v5 = vsel %vm617_vm11, %v5065_v28, -inf }
 0x4ed   :  { %v3955_v30 = vpop.f32.mrb[17].mxu0  ;;  %v1088_v18 = vmul.f32 0.35355338, %v1078_v29 }
 0x4f0   :  { %v1083_v33 = vpop.f32.mrb[18].mxu0 }
 0x4f1   :  { %v3958_v35 = vpop.f32.mrb[19].mxu0 }
 0x4f4   :  { %v5018_v36 = vpop.f32.mrb[20].mxu0 }
 0x4f5   :  { %v3982_v41 = vpop.f32.mrb[21].mxu0 }
 0x4f6   :  { %v1089_v41 = vmul.f32 0.35355338, %v1083_v33 }
 0x4f7   :  { %4461 = vrot.lane.b32.xlu1 %v4460_v38, %s4678_s22 }
 0x4f8   :  { %v5022_v42 = vpop.f32.mrb[22].mxu0 }
 0x4f9   :  { %v3985_v43 = vpop.f32.mrb[23].mxu0  ;;  %v1331_v33 = vmul.f32 0.35355338, %v5022_v42 }
 0x4fc   :  { %v5027_v45 = vpop.f32.mrb[24].mxu0  ;;  %4466 = vrot.lane.b32.xlu0 %v4465_v44, %s4678_s22  ;;  %v5086_v44 = vadd.f32 %v1088_v18, %v5008_v8 }
 0x4fd   :  { %v3988_v46 = vpop.f32.mrb[25].mxu0 }
 0x4fe   :  { %v1330_v46 = vmul.f32 0.35355338, %v5018_v36 }
 0x56f   :  { %v752_v47 = vpop.xlane.xlu0 %751 }
 0x570   :  { %v759_v7 = vsub.f32 %v747_v4, %v752_v47  ;;  %v1087_v4 = vmul.f32 0.35355338, %v1073_v26  ;;  %v1096_v47 = vsel %vm610_vm12, %v5086_v44, -inf }
 0x572   :  { %v762_v11 = vmul.f32 1.442695, %v759_v7  ;;  %v5077_v35 = vadd.f32 %v1087_v4, %v5005_v62 }
 0x573   :  { %v613_v49 = vpop.xlane.xlu0 %612  ;;  %v5030_v50 = vpop.xlane.xlu1 %754 }
 0x574   :  { %v621_v14 = vsub.f32 %v607_v16, %v613_v49  ;;  %4521 = vpow2.f32 %v762_v11  ;;  %v5070_v16 = vadd.f32 %v606_v22, %v5001_v59  ;;  %v1093_v43 = vsel %vm610_vm12, %v5077_v35, -inf }
 0x575   :  { %v5094_v49 = vadd.f32 %v1089_v41, %v5001_v59 }
 0x576   :  { %v624_v21 = vmul.f32 1.442695, %v621_v14  ;;  %v618_v30 = vsel %vm617_vm11, %v5070_v16, -inf }
 0x577   :  { %v5032_v51 = vpop.permute.xlu0 %4466  ;;  %v4462_v53 = vpop.permute.xlu1 %4461 }
 0x578   :  { %v5034_v54 = vunpack.i.h.bf16 %v4462_v53  ;;  %v5036_v55 = vunpack.i.l.bf16 %v4462_v53  ;;  %v5039_v56 = vunpack.i.l.bf16 %v5032_v51  ;;  %4523 = vpow2.f32 %v624_v21 }
 0x579   :  { %v1099_v53 = vsel %vm617_vm11, %v5094_v49, -inf }
 0x57a   :  { %v649_v57 = vmul.f32 %v5034_v54, %v4882_v24  ;;  %v789_v58 = vmul.f32 %v5036_v55, %v4889_v32  ;;  %v787_v60 = vmul.f32 %v5036_v55, %v4882_v24  ;;  %v788_v12 = vmul.f32 %v5036_v55, %v4884_v25 }
 0x57b   :  { %v650_v61 = vmul.f32 %v5034_v54, %v4884_v25  ;;  %v1130_v1 = vmul.f32 %v5039_v56, %v4882_v24  ;;  %v1131_v2 = vmul.f32 %v5039_v56, %v4884_v25 }
 0x57c   :  { %797 = vrot.lane.b32.xlu1 %v789_v58, %s4678_s22  ;;  %v4470_v63 = vpack.i.bf16 %v788_v12, %v787_v60  ;;  %v1332_v58 = vmul.f32 0.35355338, %v5027_v45  ;;  %v5106_v60 = vadd.f32 %v1331_v33, %v5008_v8  ;;  %v651_v45 = vmul.f32 %v5034_v54, %v4889_v32 }
 0x57d   :  { %v4475_v0 = vpack.i.bf16 %v650_v61, %v649_v57  ;;  %v4480_v3 = vpack.i.bf16 %v1131_v2, %v1130_v1  ;;  %v5100_v57 = vadd.f32 %v1330_v46, %v5005_v62 }
 0x57e   :  { %4471 = vrot.lane.b32.xlu0 %v4470_v63, %s4678_s22  ;;  %v5072_v19 = vpop.eup %4521  ;;  %v1339_v12 = vsel %vm610_vm12, %v5106_v60, -inf  ;;  %v5111_v42 = vadd.f32 %v1332_v58, %v5001_v59  ;;  %v760_v63 = vsub.f32 %v5013_v17, %v5030_v50 }
 0x57f   :  { %v768_v26 = vsel %vm610_vm12, %v5072_v19, 0.0  ;;  %v1336_v36 = vsel %vm610_vm12, %v5100_v57, -inf }
 0x580   :  { %4476 = vrot.lane.b32.xlu1 %v4475_v0, %s4678_s22  ;;  %v1342_v61 = vsel %vm617_vm11, %v5111_v42, -inf  ;;  %v764_v0 = vmul.f32 1.442695, %v760_v63 }
 0x582   :  { %v5081_v38 = vpop.eup %4523  ;;  %4525 = vpow2.f32 %v764_v0 }
 0x583   :  { %v630_v29 = vsel %vm610_vm12, %v5081_v38, 0.0 }
 0x584   :  { %4481 = vrot.lane.b32.xlu1 %v4480_v3, %s4678_s22 }
 0x58c   :  { %v5120_v1 = vpop.eup %4525 }
 0x58d   :  { %v771_v9 = vsel %vm610_vm12, %v5120_v1, 0.0 }
 0x59d   :  { %615 = vmax.xlane.f32.xlu0 %v614_v23 }
 0x5a1   :  { %757 = vmax.xlane.f32.xlu0 %v756_v5 }
 0x5a5   :  { %619 = vmax.xlane.f32.xlu0 %v618_v30 }
 0x5a8   :  { %769 = vadd.xlane.f32.xlu1 %v768_v26 }
 0x5a9   :  { %1094 = vmax.xlane.f32.xlu0 %v1093_v43 }
 0x5ac   :  { %631 = vadd.xlane.f32.xlu1 %v630_v29 }
 0x5ad   :  { %1097 = vmax.xlane.f32.xlu0 %v1096_v47 }
 0x5b1   :  { %1100 = vmax.xlane.f32.xlu0 %v1099_v53 }
 0x5b5   :  { %1337 = vmax.xlane.f32.xlu0 %v1336_v36 }
 0x5b9   :  { %1340 = vmax.xlane.f32.xlu0 %v1339_v12 }
 0x5bd   :  { %1343 = vmax.xlane.f32.xlu0 %v1342_v61 }
 0x5d3   :  { %900 = vrot.lane.b32.xlu0 %v651_v45, %s4678_s22 }
 0x5ee   :  { %v798_v14 = vpop.permute.xlu1 %797 }
 0x5f0   :  { %v4472_v2 = vpop.permute.xlu0 %4471 }
 0x5f1   :  { %v4474_v3 = vunpack.i.h.bf16 %v4472_v2  ;;  %v4473_v7 = vunpack.i.l.bf16 %v4472_v2 }
 0x5f2   :  { %772 = vadd.xlane.f32.xlu0 %v771_v9  ;;  %v4477_v50 = vpop.permute.xlu1 %4476 }
 0x5f3   :  { %v4300_v11 = vpack.c.bf16 %v4474_v3, %v4473_v7  ;;  %v4479_v58 = vunpack.i.h.bf16 %v4477_v50  ;;  %v4478_v36 = vunpack.i.l.bf16 %v4477_v50 }
 0x5f5   :  { %4301 = vmatpush3.bf16.msra.mxu1 %v4300_v11  ;;  %v4303_v2 = vpack.c.bf16 %v4479_v58, %v4478_v36 }
 0x5f6   :  { %3918 = vmatprep.subr.mxu1 %v4675_v10  ;;  %v5129_v4 = vpop.permute.xlu1 %4481 }
 0x5f9   :  { %3919 = vmatpush3.msk.msra.mxu1 %vm810_vm15, %v798_v14 }
 0x5fa   :  { %4302 = vmatprep.subr.bf16.mxu1 %v4672_v6 }
 0x62a   :  { %v616_v17 = vpop.xlane.xlu0 %615 }
 0x62b   :  { %v622_v15 = vsub.f32 %v5060_v20, %v616_v17 }
 0x62d   :  { %v626_v21 = vmul.f32 1.442695, %v622_v15 }
 0x62e   :  { %v758_v22 = vpop.xlane.xlu0 %757 }
 0x62f   :  { %4527 = vpow2.f32 %v626_v21  ;;  %v761_v23 = vsub.f32 %v5065_v28, %v758_v22 }
 0x631   :  { %v766_v5 = vmul.f32 1.442695, %v761_v23 }
 0x632   :  { %v620_v18 = vpop.xlane.xlu0 %619 }
 0x633   :  { %4529 = vpow2.f32 %v766_v5  ;;  %v623_v30 = vsub.f32 %v5070_v16, %v620_v18 }
 0x635   :  { %v628_v26 = vmul.f32 1.442695, %v623_v30  ;;  %v770_v41 = vpop.xlane.xlu1 %769 }
 0x636   :  { %4531 = vrcp.f32 %v770_v41  ;;  %v1095_v43 = vpop.xlane.xlu0 %1094  ;;  %v5177_v41 = vunpack.i.h.bf16 %v5032_v51 }
 0x637   :  { %4533 = vpow2.f32 %v628_v26  ;;  %v1102_v29 = vsub.f32 %v5077_v35, %v1095_v43 }
 0x638   :  { %v1373_v43 = vmul.f32 %v5177_v41, %v4882_v24 }
 0x639   :  { %v5133_v20 = vpop.eup %4527  ;;  %v1105_v46 = vmul.f32 1.442695, %v1102_v29  ;;  %v1374_v29 = vmul.f32 %v5177_v41, %v4884_v25 }
 0x63a   :  { %v1098_v47 = vpop.xlane.xlu0 %1097  ;;  %v633_v28 = vsel %vm610_vm12, %v5133_v20, 0.0 }
 0x63b   :  { %4535 = vpow2.f32 %v1105_v46  ;;  %v1103_v33 = vsub.f32 %v5086_v44, %v1098_v47  ;;  %634 = vadd.xlane.f32.xlu0 %v633_v28  ;;  %v4485_v46 = vpack.i.bf16 %v1374_v29, %v1373_v43  ;;  %v1132_v47 = vmul.f32 %v5039_v56, %v4889_v32 }
 0x63c   :  { %v1375_v28 = vmul.f32 %v5177_v41, %v4889_v32  ;;  %v1481_v32 = vld [vmem:[%s5921_s10] sm:$0xff] }
 0x63d   :  { %v5138_v53 = vpop.eup %4529  ;;  %v1107_v16 = vmul.f32 1.442695, %v1103_v33 }
 0x63e   :  { %v1101_v12 = vpop.xlane.xlu0 %1100  ;;  %v774_v35 = vsel %vm617_vm11, %v5138_v53, 0.0 }
 0x63f   :  { %4537 = vpow2.f32 %v1107_v16  ;;  %v1104_v61 = vsub.f32 %v5094_v49, %v1101_v12  ;;  %775 = vadd.xlane.f32.xlu1 %v774_v35  ;;  %v1483_v12 = vld [vmem:[%s5921_s10 + $0x10] sm:$0xff] }
 0x640   :  { %v4532_v45 = vpop.eup %4531 }
 0x641   :  { %v5143_v63 = vpop.eup %4533  ;;  %v780_v0 = vmul.f32 %v4532_v45, %v5072_v19  ;;  %v1109_v44 = vmul.f32 1.442695, %v1104_v61  ;;  %v632_v45 = vpop.xlane.xlu1 %631 }
 0x642   :  { %v1338_v3 = vpop.xlane.xlu0 %1337  ;;  %v636_v7 = vsel %vm617_vm11, %v5143_v63, 0.0 }
 0x643   :  { %4539 = vpow2.f32 %v1109_v44  ;;  %v1345_v9 = vsub.f32 %v5100_v57, %v1338_v3  ;;  %3921 = vmatmul.mubr.msk.f32.vlgmr.msra.gmra.mrb[8].mxu1 %vm610_vm12, %v780_v0  ;;  %637 = vadd.xlane.f32.xlu1 %v636_v7 }
 0x644   :  { %4304 = vmatpush3.bf16.msra.mxu1 %v4303_v2  ;;  %3923 = vmatprep.mubr.msk.f32.mxu1 %vm4674_vm3, %v4675_v10 }
 0x645   :  { %v5152_v49 = vpop.eup %4535  ;;  %v1348_v11 = vmul.f32 1.442695, %v1345_v9  ;;  %3933 = vmatprep.subr.mxu1 %v4675_v10 }
 0x646   :  { %v1341_v19 = vpop.xlane.xlu0 %1340  ;;  %v1111_v14 = vsel %vm610_vm12, %v5152_v49, 0.0 }
 0x647   :  { %4541 = vpow2.f32 %v1348_v11  ;;  %v1346_v17 = vsub.f32 %v5106_v60, %v1341_v19  ;;  %1112 = vadd.xlane.f32.xlu1 %v1111_v14  ;;  %v4484_v19 = vunpack.i.h.bf16 %v5129_v4  ;;  %v4483_v14 = vunpack.i.l.bf16 %v5129_v4 }
 0x649   :  { %v5158_v57 = vpop.eup %4537  ;;  %v1350_v50 = vmul.f32 1.442695, %v1346_v17 }
 0x64a   :  { %v1344_v15 = vpop.xlane.xlu0 %1343  ;;  %v1114_v21 = vsel %vm610_vm12, %v5158_v57, 0.0 }
 0x64b   :  { %4543 = vpow2.f32 %v1350_v50  ;;  %1115 = vadd.xlane.f32.xlu0 %v1114_v21  ;;  %v1347_v51 = vsub.f32 %v5111_v42, %v1344_v15  ;;  %v1482_v42 = vld [vmem:[%s5921_s10 + $0x8] sm:$0xff]  ;;  %v4310_v21 = vpack.c.bf16 %v4484_v19, %v4483_v14 }
 0x64c   :  { %v4320_v35 = vpack.c.bf16 %v1482_v42, %v1481_v32 }
 0x64d   :  { %v5162_v22 = vpop.eup %4539  ;;  %v1352_v33 = vmul.f32 1.442695, %v1347_v51 }
 0x64e   :  { %v901_v23 = vpop.permute.xlu0 %900  ;;  %v1117_v5 = vsel %vm617_vm11, %v5162_v22, 0.0  ;;  %4321 = vmatpush3.bf16.msra.mxu0 %v4320_v35 }
 0x64f   :  { %1118 = vadd.xlane.f32.xlu1 %v1117_v5  ;;  %3934 = vmatpush3.msk.msra.mxu1 %vm810_vm15, %v901_v23  ;;  %4545 = vpow2.f32 %v1352_v33 }
 0x650   :  { %4309 = vmatprep.subr.bf16.mxu1 %v4672_v6  ;;  %4322 = vmatprep.subr.bf16.mxu0 %v4672_v6 }
 0x651   :  { %v5168_v60 = vpop.eup %4541 }
 0x652   :  { %v1354_v18 = vsel %vm610_vm12, %v5168_v60, 0.0 }
 0x653   :  { %1355 = vadd.xlane.f32.xlu0 %v1354_v18 }
 0x655   :  { %v5172_v30 = vpop.eup %4543 }
 0x656   :  { %v1357_v26 = vsel %vm610_vm12, %v5172_v30, 0.0 }
 0x657   :  { %1358 = vadd.xlane.f32.xlu1 %v1357_v26 }
 0x659   :  { %v5191_v25 = vpop.eup %4545 }
 0x65a   :  { %v1360_v16 = vsel %vm617_vm11, %v5191_v25, 0.0 }
 0x668   :  { %4486 = vrot.lane.b32.xlu1 %v4485_v46, %s4678_s22 }
 0x669   :  { %1140 = vrot.lane.b32.xlu0 %v1132_v47, %s4678_s22 }
 0x66c   :  { %1383 = vrot.lane.b32.xlu1 %v1375_v28, %s4678_s22 }
 0x67f   :  { %v773_v24 = vpop.xlane.xlu0 %772 }
 0x680   :  { %4547 = vrcp.f32 %v773_v24 }
 0x688   :  { %1361 = vadd.xlane.f32.xlu0 %v1360_v16 }
 0x68a   :  { %v4548_v58 = vpop.eup %4547 }
 0x68b   :  { %v781_v36 = vmul.f32 %v4548_v58, %v5120_v1  ;;  %v1484_v1 = vld [vmem:[%s5921_s10 + $0x18] sm:$0xff] }
 0x68c   :  { %v4323_v61 = vpack.c.bf16 %v1484_v1, %v1483_v12 }
 0x68d   :  { %3924 = vmatmul.mubr.msk.f32.gmra.mrb[10].mxu1 %vm610_vm12, %v781_v36 }
 0x68e   :  { %3926 = vmatprep.mubr.msk.f32.mxu1 %vm4674_vm3, %v4675_v10  ;;  %4324 = vmatpush3.bf16.msra.mxu0 %v4323_v61 }
 0x68f   :  { %4325 = vmatprep.subr.bf16.mxu0 %v4672_v6 }
 0x6c8   :  { %v635_v44 = vpop.xlane.xlu0 %634 }
 0x6cc   :  { %v776_v0 = vpop.xlane.xlu1 %775 }
 0x6cd   :  { %4549 = vrcp.f32 %v776_v0 }
 0x6ce   :  { %4551 = vrcp.f32 %v632_v45  ;;  %v3577_v45 = vld [vmem:[%s5922_s11] ss:$0 sm:$0xff] }
 0x6cf   :  { %4553 = vrcp.f32 %v635_v44 }
 0x6d0   :  { %v638_v2 = vpop.xlane.xlu1 %637 }
 0x6d1   :  { %4555 = vrcp.f32 %v638_v2 }
 0x6d4   :  { %v1113_v7 = vpop.xlane.xlu1 %1112 }
 0x6d5   :  { %4557 = vrcp.f32 %v1113_v7 }
 0x6d7   :  { %v4550_v3 = vpop.eup %4549 }
 0x6d8   :  { %v782_v9 = vmul.f32 %v4550_v3, %v5138_v53  ;;  %v4552_v11 = vpop.eup %4551  ;;  %v1116_v50 = vpop.xlane.xlu0 %1115 }
 0x6d9   :  { %v642_v17 = vmul.f32 %v4552_v11, %v5081_v38  ;;  %v4554_v15 = vpop.eup %4553  ;;  %4559 = vrcp.f32 %v1116_v50 }
 0x6da   :  { %3927 = vmatmul.mubr.msk.f32.gmra.mrb[12].mxu1 %vm610_vm12, %v782_v9  ;;  %v643_v23 = vmul.f32 %v4554_v15, %v5133_v20 }
 0x6db   :  { %3935 = vmatprep.mubr.msk.f32.mxu1 %vm4674_vm3, %v4675_v10  ;;  %v4556_v5 = vpop.eup %4555 }
 0x6dc   :  { %v1119_v53 = vpop.xlane.xlu1 %1118  ;;  %v644_v26 = vmul.f32 %v4556_v5, %v5143_v63 }
 0x6dd   :  { %4561 = vrcp.f32 %v1119_v53 }
 0x6de   :  { %3936 = vmatmul.mubr.msk.f32.vlgmr.msra.gmra.mrb[8].mxu1 %vm610_vm12, %v642_v17 }
 0x6df   :  { %4311 = vmatpush3.bf16.msra.mxu1 %v4310_v21  ;;  %3938 = vmatprep.mubr.msk.f32.mxu1 %vm4674_vm3, %v4675_v10  ;;  %v4558_v43 = vpop.eup %4557 }
 0x6e0   :  { %v1356_v4 = vpop.xlane.xlu0 %1355  ;;  %3963 = vmatprep.subr.mxu1 %v4675_v10  ;;  %v1123_v20 = vmul.f32 %v4558_v43, %v5152_v49 }
 0x6e1   :  { %4563 = vrcp.f32 %v1356_v4 }
 0x6e2   :  { %3939 = vmatmul.mubr.msk.f32.gmra.mrb[10].mxu1 %vm610_vm12, %v643_v23 }
 0x6e3   :  { %3941 = vmatprep.mubr.msk.f32.mxu1 %vm4674_vm3, %v4675_v10  ;;  %v4560_v46 = vpop.eup %4559 }
 0x6e4   :  { %v1359_v38 = vpop.xlane.xlu1 %1358  ;;  %v1141_v18 = vpop.permute.xlu0 %1140  ;;  %v1124_v51 = vmul.f32 %v4560_v46, %v5158_v57 }
 0x6e5   :  { %3964 = vmatpush3.msk.msra.mxu1 %vm810_vm15, %v1141_v18  ;;  %4565 = vrcp.f32 %v1359_v38 }
 0x6e6   :  { %3942 = vmatmul.mubr.msk.f32.gmra.mrb[12].mxu1 %vm610_vm12, %v644_v26  ;;  %4316 = vmatprep.subr.bf16.mxu1 %v4672_v6 }
 0x6e7   :  { %3965 = vmatprep.mubr.msk.f32.mxu1 %vm4674_vm3, %v4675_v10  ;;  %v4562_v33 = vpop.eup %4561 }
 0x6e8   :  { %v4487_v29 = vpop.permute.xlu1 %4486  ;;  %v1125_v24 = vmul.f32 %v4562_v33, %v5162_v22 }
 0x6e9   :  { %v4489_v47 = vunpack.i.h.bf16 %v4487_v29  ;;  %v4488_v28 = vunpack.i.l.bf16 %v4487_v29  ;;  %v1647_v29 = vld [vmem:[%s5925_s14 + $0x8] sm:$0xff] }
 0x6ea   :  { %3966 = vmatmul.mubr.msk.f32.vlgmr.msra.gmra.mrb[8].mxu1 %vm610_vm12, %v1123_v20  ;;  %v1646_v20 = vld [vmem:[%s5925_s14] sm:$0xff] }
 0x6eb   :  { %v4317_v63 = vpack.c.bf16 %v4489_v47, %v4488_v28  ;;  %3968 = vmatprep.mubr.msk.f32.mxu1 %vm4674_vm3, %v4675_v10  ;;  %v4564_v16 = vpop.eup %4563  ;;  %v4326_v46 = vpack.c.bf16 %v1647_v29, %v1646_v20  ;;  %v1648_v47 = vld [vmem:[%s5925_s14 + $0x10] sm:$0xff]  ;;  %v1649_v28 = vld [vmem:[%s5925_s14 + $0x18] sm:$0xff]  ;;  %v3580_v20 = vld [vmem:[%s5926_s15] ss:$0 sm:$0xff] }
 0x6ec   :  { %v1384_v49 = vpop.permute.xlu1 %1383  ;;  %v1366_v57 = vmul.f32 %v4564_v16, %v5168_v60 }
 0x6ed   :  { %4318 = vmatpush3.bf16.msra.mxu1 %v4317_v63  ;;  %v4329_v63 = vpack.c.bf16 %v1649_v28, %v1648_v47 }
 0x6ee   :  { %3969 = vmatmul.mubr.msk.f32.gmra.mrb[10].mxu1 %vm610_vm12, %v1124_v51  ;;  %3993 = vmatprep.subr.mxu1 %v4675_v10 }
 0x6ef   :  { %3971 = vmatprep.mubr.msk.f32.mxu1 %vm4674_vm3, %v4675_v10  ;;  %v4566_v58 = vpop.eup %4565 }
 0x6f0   :  { %v1367_v22 = vmul.f32 %v4566_v58, %v5172_v30 }
 0x6f1   :  { %3994 = vmatpush3.msk.msra.mxu1 %vm810_vm15, %v1384_v49 }
 0x6f2   :  { %3972 = vmatmul.mubr.msk.f32.gmra.mrb[12].mxu1 %vm610_vm12, %v1125_v24  ;;  %4331 = vmatprep.subr.bf16.mxu1 %v4672_v6 }
 0x6f3   :  { %3995 = vmatprep.mubr.msk.f32.mxu1 %vm4674_vm3, %v4675_v10 }
 0x6f6   :  { %3996 = vmatmul.mubr.msk.f32.vlgmr.msra.gmra.mrb[8].mxu1 %vm610_vm12, %v1366_v57 }
 0x6f7   :  { %3998 = vmatprep.mubr.msk.f32.mxu1 %vm4674_vm3, %v4675_v10 }
 0x6fa   :  { %3999 = vmatmul.mubr.msk.f32.gmra.mrb[10].mxu1 %vm610_vm12, %v1367_v22 }
 0x6fb   :  { %4001 = vmatprep.mubr.msk.f32.mxu1 %vm4674_vm3, %v4675_v10 }
 0x715   :  { %v1362_v36 = vpop.xlane.xlu0 %1361 }
 0x716   :  { %4567 = vrcp.f32 %v1362_v36 }
 0x720   :  { %v4568_v32 = vpop.eup %4567 }
 0x721   :  { %v1368_v42 = vmul.f32 %v4568_v32, %v5191_v25 }
 0x723   :  { %4002 = vmatmul.mubr.msk.f32.gmra.mrb[12].mxu1 %vm610_vm12, %v1368_v42 }
 0x724   :  { %4054 = vmatprep.mubr.msk.f32.mxu1 %vm4674_vm3, %v4675_v10 }
 0x7c9   :  { %v1464_v60 = vpop.f32.mrb[8].mxu1 }
 0x7ca   :  { %v3997_v12 = vpop.f32.mrb[9].mxu1  ;;  %4013 = vmatmul.mubr.msk.f32.vlgmr.msra.gmra.mrb[26].mxu0 %vm338_vm13, %v1464_v60 }
 0x7cb   :  { %4015 = vmatprep.mubr.msk.f32.mxu0 %vm4674_vm3, %v4675_v10  ;;  %4327 = vmatpush3.bf16.msra.mxu0 %v4326_v46  ;;  %v3578_v12 = vld [vmem:[%s5923_s12] ss:$0 sm:$0xff] }
 0x7cc   :  { %4328 = vmatprep.subr.bf16.mxu0 %v4672_v6 }
 0x7cd   :  { %v1469_v30 = vpop.f32.mrb[10].mxu1 }
 0x7ce   :  { %v4000_v35 = vpop.f32.mrb[11].mxu1  ;;  %4016 = vmatmul.mubr.msk.f32.gmra.mrb[28].mxu0 %vm338_vm13, %v1469_v30 }
 0x7cf   :  { %4018 = vmatprep.mubr.msk.f32.mxu0 %vm4674_vm3, %v4675_v10  ;;  %4330 = vmatpush3.bf16.msra.mxu0 %v4329_v63  ;;  %v3579_v35 = vld [vmem:[%s5946_s26] ss:$0 sm:$0xff] }
 0x7d0   :  { %4343 = vmatprep.subr.bf16.mxu0 %v4672_v6 }
 0x7f6   :  { %v1474_v25 = vpop.f32.mrb[12].mxu1 }
 0x7f7   :  { %v4003_v1 = vpop.f32.mrb[13].mxu1  ;;  %4019 = vmatmul.mubr.msk.f32.gmra.mrb[30].mxu0 %vm338_vm13, %v1474_v25 }
 0x7f8   :  { %4029 = vmatprep.mubr.msk.f32.mxu0 %vm4674_vm3, %v4675_v10 }
 0x89d   :  { %v1560_v61 = vpop.f32.mrb[26].mxu0 }
 0x89e   :  { %v1574_v0 = vadd.f32 %v1560_v61, %v4834_v31  ;;  %v4014_v44 = vpop.f32.mrb[27].mxu0 }
 0x8a0   :  { %v5274_v2 = vadd.f32 %v3577_v45, %v1574_v0 }
 0x8a1   :  { %v1565_v3 = vpop.f32.mrb[28].mxu0 }
 0x8a2   :  { %v1575_v7 = vadd.f32 %v1565_v3, %v4840_v34  ;;  %v4017_v9 = vpop.f32.mrb[29].mxu0  ;;  %v1589_v11 = vsel %vm338_vm13, %v5274_v2, 0.0 }
 0x8a3   :  { %1590 = vadd.xlane.f32.xlu1 %v1589_v11 }
 0x8a4   :  { %v5279_v19 = vadd.f32 %v3577_v45, %v1575_v7 }
 0x8a6   :  { %v1592_v14 = vsel %vm338_vm13, %v5279_v19, 0.0 }
 0x8a7   :  { %1593 = vadd.xlane.f32.xlu0 %v1592_v14 }
 0x8ca   :  { %v1570_v17 = vpop.f32.mrb[30].mxu0 }
 0x8cb   :  { %v1576_v31 = vadd.f32 %v1570_v17, %v4829_v27  ;;  %v4020_v50 = vpop.f32.mrb[31].mxu0 }
 0x8cc   :  { %v1761_v50 = vld [vmem:[%s5927_s16] sm:$0xff] }
 0x8cd   :  { %v5284_v15 = vadd.f32 %v3577_v45, %v1576_v31 }
 0x8cf   :  { %v1595_v34 = vsel %vm317_vm8, %v5284_v15, 0.0 }
 0x8d0   :  { %1596 = vadd.xlane.f32.xlu0 %v1595_v34  ;;  %v1762_v34 = vld [vmem:[%s5927_s16 + $0x8] sm:$0xff] }
 0x930   :  { %v1591_v21 = vpop.xlane.xlu1 %1590 }
 0x931   :  { %v1598_v53 = vmul.f32 0.03125, %v1591_v21  ;;  %v4332_v21 = vpack.c.bf16 %v1762_v34, %v1761_v50 }
 0x933   :  { %v1601_v4 = vsub.f32 %v5274_v2, %v1598_v53  ;;  %4333 = vmatpush3.bf16.msra.mxu1 %v4332_v21  ;;  %v1763_v53 = vld [vmem:[%s5927_s16 + $0x10] sm:$0xff] }
 0x934   :  { %v1594_v23 = vpop.xlane.xlu0 %1593  ;;  %4334 = vmatprep.subr.bf16.mxu1 %v4672_v6 }
 0x935   :  { %v1599_v5 = vmul.f32 0.03125, %v1594_v23  ;;  %v1604_v38 = vmul.f32 %v1601_v4, %v1601_v4 }
 0x937   :  { %v1602_v18 = vsub.f32 %v5279_v19, %v1599_v5  ;;  %v1607_v26 = vsel %vm338_vm13, %v1604_v38, 0.0  ;;  %v1765_v5 = vld [vmem:[%s5927_s16 + $0x20] sm:$0xff]  ;;  %v1766_v38 = vld [vmem:[%s5927_s16 + $0x28] sm:$0xff] }
 0x938   :  { %1608 = vadd.xlane.f32.xlu0 %v1607_v26  ;;  %v1767_v26 = vld [vmem:[%s5927_s16 + $0x30] sm:$0xff] }
 0x939   :  { %v1605_v27 = vmul.f32 %v1602_v18, %v1602_v18 }
 0x93b   :  { %v1610_v43 = vsel %vm338_vm13, %v1605_v27, 0.0  ;;  %v1768_v27 = vld [vmem:[%s5927_s16 + $0x38] sm:$0xff] }
 0x93c   :  { %1611 = vadd.xlane.f32.xlu0 %v1610_v43  ;;  %v4341_v43 = vpack.c.bf16 %v1768_v27, %v1767_v26 }
 0x95d   :  { %v1597_v51 = vpop.xlane.xlu0 %1596 }
 0x95e   :  { %v1600_v33 = vmul.f32 0.03125, %v1597_v51 }
 0x960   :  { %v1603_v49 = vsub.f32 %v5284_v15, %v1600_v33 }
 0x962   :  { %v1606_v24 = vmul.f32 %v1603_v49, %v1603_v49 }
 0x964   :  { %v1613_v16 = vsel %vm317_vm8, %v1606_v24, 0.0 }
 0x965   :  { %1614 = vadd.xlane.f32.xlu1 %v1613_v16 }
 0x9c5   :  { %v1609_v57 = vpop.xlane.xlu0 %1608 }
 0x9c6   :  { %v1616_v58 = vmul.f32 0.03125, %v1609_v57 }
 0x9c8   :  { %v1619_v22 = vadd.f32 1e-05, %v1616_v58 }
 0x9c9   :  { %v1612_v36 = vpop.xlane.xlu0 %1611 }
 0x9ca   :  { %4569 = vrsqrt.f32 %v1619_v22  ;;  %v1617_v32 = vmul.f32 0.03125, %v1612_v36 }
 0x9cc   :  { %v1620_v42 = vadd.f32 1e-05, %v1617_v32 }
 0x9ce   :  { %4571 = vrsqrt.f32 %v1620_v42 }
 0x9d4   :  { %v4570_v60 = vpop.eup %4569 }
 0x9d5   :  { %v1625_v30 = vmul.f32 %v4570_v60, %v1601_v4  ;;  %v1764_v4 = vld [vmem:[%s5927_s16 + $0x18] sm:$0xff] }
 0x9d6   :  { %v4335_v23 = vpack.c.bf16 %v1764_v4, %v1763_v53 }
 0x9d7   :  { %v1634_v25 = vmul.f32 %v3578_v12, %v1625_v30 }
 0x9d8   :  { %v4572_v1 = vpop.eup %4571  ;;  %4336 = vmatpush3.bf16.msra.mxu1 %v4335_v23 }
 0x9d9   :  { %v1643_v61 = vadd.f32 %v3579_v35, %v1634_v25  ;;  %v1626_v45 = vmul.f32 %v4572_v1, %v1602_v18  ;;  %4337 = vmatprep.subr.bf16.mxu1 %v4672_v6  ;;  %v4338_v18 = vpack.c.bf16 %v1766_v38, %v1765_v5 }
 0x9db   :  { %4030 = vmatmul.mubr.msk.f32.vlgmr.msra.gmra.mrb[32].mxu0 %vm338_vm13, %v1643_v61  ;;  %v1635_v0 = vmul.f32 %v3578_v12, %v1626_v45 }
 0x9dc   :  { %4032 = vmatprep.mubr.msk.f32.mxu0 %vm4674_vm3, %v4675_v10  ;;  %4339 = vmatpush3.bf16.msra.mxu1 %v4338_v18 }
 0x9dd   :  { %v1644_v44 = vadd.f32 %v3579_v35, %v1635_v0  ;;  %4340 = vmatprep.subr.bf16.mxu1 %v4672_v6 }
 0x9df   :  { %4033 = vmatmul.mubr.msk.f32.gmra.mrb[34].mxu0 %vm338_vm13, %v1644_v44  ;;  %v3587_v44 = vld [vmem:[%s5928_s17] ss:$0 sm:$0xff] }
 0x9e0   :  { %4035 = vmatprep.mubr.msk.f32.mxu0 %vm4674_vm3, %v4675_v10  ;;  %4342 = vmatpush3.bf16.msra.mxu1 %v4341_v43 }
 0x9e1   :  { %4349 = vmatprep.subr.bf16.mxu1 %v4672_v6 }
 0x9f2   :  { %v1615_v3 = vpop.xlane.xlu1 %1614 }
 0x9f3   :  { %v1618_v7 = vmul.f32 0.03125, %v1615_v3 }
 0x9f5   :  { %v1621_v9 = vadd.f32 1e-05, %v1618_v7 }
 0x9f7   :  { %4573 = vrsqrt.f32 %v1621_v9 }
 0xa01   :  { %v4574_v11 = vpop.eup %4573 }
 0xa02   :  { %v1627_v14 = vmul.f32 %v4574_v11, %v1603_v49 }
 0xa04   :  { %v1636_v17 = vmul.f32 %v3578_v12, %v1627_v14 }
 0xa06   :  { %v1645_v31 = vadd.f32 %v3579_v35, %v1636_v17 }
 0xa08   :  { %4036 = vmatmul.mubr.msk.f32.gmra.mrb[36].mxu0 %vm338_vm13, %v1645_v31 }
 0xa09   :  { %4071 = vmatprep.mubr.msk.f32.mxu0 %vm4674_vm3, %v4675_v10 }
 0xaae   :  { %v1732_v29 = vpop.f32.mrb[32].mxu0 }
 0xaaf   :  { %v1733_v46 = vadd.f32 %v3580_v20, %v1732_v29  ;;  %v4031_v47 = vpop.f32.mrb[33].mxu0 }
 0xab0   :  { %v3593_v47 = vld [vmem:[%s5919_s8 + $0x28] sm:$0xff] }
 0xab1   :  { %v1749_v28 = vmul.f32 0.70710677, %v1733_v46  ;;  %v1746_v16 = vmul.f32 0.5, %v1733_v46  ;;  %v3592_v46 = vld [vmem:[%s5919_s8 + $0x20] sm:$0xff] }
 0xab2   :  { %v1737_v63 = vpop.f32.mrb[34].mxu0 }
 0xab3   :  { %4575 = verf.f32 %v1749_v28  ;;  %v1738_v51 = vadd.f32 %v3580_v20, %v1737_v63  ;;  %v4034_v33 = vpop.f32.mrb[35].mxu0  ;;  %v4344_v28 = vpack.c.bf16 %v3593_v47, %v3592_v46  ;;  %v3594_v63 = vld [vmem:[%s5919_s8 + $0x30] sm:$0xff] }
 0xab5   :  { %v1750_v49 = vmul.f32 0.70710677, %v1738_v51  ;;  %v1747_v36 = vmul.f32 0.5, %v1738_v51  ;;  %4345 = vmatpush3.bf16.msra.mxu0 %v4344_v28  ;;  %v3595_v51 = vld [vmem:[%s5919_s8 + $0x38] sm:$0xff] }
 0xab6   :  { %4346 = vmatprep.subr.bf16.mxu0 %v4672_v6  ;;  %v4347_v33 = vpack.c.bf16 %v3595_v51, %v3594_v63 }
 0xab7   :  { %4577 = verf.f32 %v1750_v49 }
 0xab9   :  { %4348 = vmatpush3.bf16.msra.mxu0 %v4347_v33 }
 0xaba   :  { %4353 = vmatprep.subr.bf16.mxu0 %v4672_v6 }
 0xabd   :  { %v4576_v24 = vpop.eup %4575 }
 0xabe   :  { %v1755_v57 = vadd.f32 1.0, %v4576_v24 }
 0xac0   :  { %v1758_v58 = vmul.f32 %v1755_v57, %v1746_v16 }
 0xac1   :  { %v4578_v22 = vpop.eup %4577 }
 0xac2   :  { %v1756_v32 = vadd.f32 1.0, %v4578_v22  ;;  %4055 = vmatmul.mubr.msk.f32.vlgmr.msra.gmra.mrb[14].mxu1 %vm1769_vm0, %v1758_v58 }
 0xac3   :  { %4057 = vmatprep.mubr.msk.f32.mxu1 %vm4674_vm3, %v4675_v10 }
 0xac4   :  { %v1759_v42 = vmul.f32 %v1756_v32, %v1747_v36 }
 0xac6   :  { %4058 = vmatmul.mubr.msk.f32.gmra.mrb[16].mxu1 %vm1769_vm0, %v1759_v42 }
 0xac7   :  { %4060 = vmatprep.mubr.msk.f32.mxu1 %vm4674_vm3, %v4675_v10 }
 0xadb   :  { %v1742_v60 = vpop.f32.mrb[36].mxu0 }
 0xadc   :  { %v1743_v12 = vadd.f32 %v3580_v20, %v1742_v60  ;;  %v4037_v30 = vpop.f32.mrb[37].mxu0 }
 0xade   :  { %v1751_v35 = vmul.f32 0.70710677, %v1743_v12  ;;  %v1748_v1 = vmul.f32 0.5, %v1743_v12 }
 0xae0   :  { %4579 = verf.f32 %v1751_v35  ;;  %v3590_v35 = vld [vmem:[%s5917_s6 + $0x1] ss:$0 sm:$0xff] }
 0xaea   :  { %v4580_v25 = vpop.eup %4579 }
 0xaeb   :  { %v1757_v61 = vadd.f32 1.0, %v4580_v25 }
 0xaed   :  { %v1760_v45 = vmul.f32 %v1757_v61, %v1748_v1  ;;  %v3591_v1 = vld [vmem:[%s5918_s7 + $0x1] ss:$0 sm:$0xff] }
 0xaef   :  { %4061 = vmatmul.mubr.msk.f32.gmra.mrb[18].mxu1 %vm1769_vm0, %v1760_v45 }
 0xaf0   :  { %4086 = vmatprep.mubr.msk.f32.mxu1 %vm4674_vm3, %v4675_v10 }
 0xb95   :  { %v1845_v0 = vpop.f32.mrb[14].mxu1 }
 0xb96   :  { %v1859_v3 = vadd.f32 %v1845_v0, %v5274_v2  ;;  %v4056_v7 = vpop.f32.mrb[15].mxu1 }
 0xb98   :  { %v5367_v9 = vadd.f32 %v3587_v44, %v1859_v3 }
 0xb99   :  { %v1850_v11 = vpop.f32.mrb[16].mxu1 }
 0xb9a   :  { %v1860_v14 = vadd.f32 %v1850_v11, %v5279_v19  ;;  %v4059_v17 = vpop.f32.mrb[17].mxu1  ;;  %v1876_v31 = vsel %vm338_vm13, %v5367_v9, 0.0 }
 0xb9b   :  { %1877 = vadd.xlane.f32.xlu0 %v1876_v31 }
 0xb9c   :  { %v5372_v50 = vadd.f32 %v3587_v44, %v1860_v14 }
 0xb9e   :  { %v1879_v34 = vsel %vm338_vm13, %v5372_v50, 0.0 }
 0xb9f   :  { %1880 = vadd.xlane.f32.xlu1 %v1879_v34 }
 0xbc2   :  { %v1855_v21 = vpop.f32.mrb[18].mxu1 }
 0xbc3   :  { %v1861_v2 = vadd.f32 %v1855_v21, %v5284_v15  ;;  %v4062_v53 = vpop.f32.mrb[19].mxu1 }
 0xbc4   :  { %v3597_v53 = vld [vmem:[%s5920_s9 + $0x1] ss:$0 sm:$0xff] }
 0xbc5   :  { %v5377_v4 = vadd.f32 %v3587_v44, %v1861_v2 }
 0xbc7   :  { %v1882_v19 = vsel %vm317_vm8, %v5377_v4, 0.0 }
 0xbc8   :  { %1883 = vadd.xlane.f32.xlu0 %v1882_v19 }
 0xc28   :  { %v1878_v23 = vpop.xlane.xlu0 %1877 }
 0xc29   :  { %v1885_v5 = vmul.f32 0.03125, %v1878_v23 }
 0xc2b   :  { %v1888_v38 = vsub.f32 %v5367_v9, %v1885_v5 }
 0xc2c   :  { %v1881_v18 = vpop.xlane.xlu1 %1880 }
 0xc2d   :  { %v1886_v26 = vmul.f32 0.03125, %v1881_v18  ;;  %v1891_v27 = vmul.f32 %v1888_v38, %v1888_v38 }
 0xc2f   :  { %v1889_v43 = vsub.f32 %v5372_v50, %v1886_v26  ;;  %v1894_v20 = vsel %vm338_vm13, %v1891_v27, 0.0 }
 0xc30   :  { %1895 = vadd.xlane.f32.xlu1 %v1894_v20 }
 0xc31   :  { %v1892_v15 = vmul.f32 %v1889_v43, %v1889_v43 }
 0xc33   :  { %v1897_v29 = vsel %vm338_vm13, %v1892_v15, 0.0 }
 0xc34   :  { %1898 = vadd.xlane.f32.xlu0 %v1897_v29 }
 0xc55   :  { %v1884_v49 = vpop.xlane.xlu0 %1883 }
 0xc56   :  { %v1887_v24 = vmul.f32 0.03125, %v1884_v49 }
 0xc58   :  { %v1890_v16 = vsub.f32 %v5377_v4, %v1887_v24 }
 0xc5a   :  { %v1893_v57 = vmul.f32 %v1890_v16, %v1890_v16 }
 0xc5c   :  { %v1900_v58 = vsel %vm317_vm8, %v1893_v57, 0.0 }
 0xc5d   :  { %1901 = vadd.xlane.f32.xlu1 %v1900_v58 }
 0xcbd   :  { %v1896_v22 = vpop.xlane.xlu1 %1895 }
 0xcbe   :  { %v1903_v36 = vmul.f32 0.03125, %v1896_v22 }
 0xcc0   :  { %v1906_v32 = vadd.f32 1e-05, %v1903_v36 }
 0xcc1   :  { %v1899_v42 = vpop.xlane.xlu0 %1898 }
 0xcc2   :  { %4581 = vrsqrt.f32 %v1906_v32  ;;  %v1904_v60 = vmul.f32 0.03125, %v1899_v42 }
 0xcc4   :  { %v1907_v12 = vadd.f32 1e-05, %v1904_v60 }
 0xcc6   :  { %4583 = vrsqrt.f32 %v1907_v12 }
 0xccc   :  { %v4582_v30 = vpop.eup %4581 }
 0xccd   :  { %v1912_v25 = vmul.f32 %v4582_v30, %v1888_v38 }
 0xccf   :  { %v1921_v61 = vmul.f32 %v3590_v35, %v1912_v25 }
 0xcd0   :  { %v4584_v45 = vpop.eup %4583 }
 0xcd1   :  { %v1930_v0 = vadd.f32 %v3591_v1, %v1921_v61  ;;  %v1913_v44 = vmul.f32 %v4584_v45, %v1889_v43 }
 0xcd3   :  { %4072 = vmatmul.mubr.msk.f32.vlgmr.msra.gmra.mrb[38].mxu0 %vm338_vm13, %v1930_v0  ;;  %v1922_v3 = vmul.f32 %v3590_v35, %v1913_v44 }
 0xcd4   :  { %4074 = vmatprep.mubr.msk.f32.mxu0 %vm4674_vm3, %v4675_v10 }
 0xcd5   :  { %v1931_v7 = vadd.f32 %v3591_v1, %v1922_v3 }
 0xcd7   :  { %4075 = vmatmul.mubr.msk.f32.gmra.mrb[40].mxu0 %vm338_vm13, %v1931_v7 }
 0xcd8   :  { %4077 = vmatprep.mubr.msk.f32.mxu0 %vm4674_vm3, %v4675_v10 }
 0xcea   :  { %v1902_v11 = vpop.xlane.xlu1 %1901 }
 0xceb   :  { %v1905_v14 = vmul.f32 0.03125, %v1902_v11 }
 0xced   :  { %v1908_v17 = vadd.f32 1e-05, %v1905_v14 }
 0xcef   :  { %4585 = vrsqrt.f32 %v1908_v17 }
 0xcf9   :  { %v4586_v31 = vpop.eup %4585 }
 0xcfa   :  { %v1914_v34 = vmul.f32 %v4586_v31, %v1890_v16 }
 0xcfc   :  { %v1923_v21 = vmul.f32 %v3590_v35, %v1914_v34 }
 0xcfe   :  { %v1932_v2 = vadd.f32 %v3591_v1, %v1923_v21 }
 0xd00   :  { %4078 = vmatmul.mubr.msk.f32.gmra.mrb[42].mxu0 %vm338_vm13, %v1932_v2 }
 0xd01   :  { %4101 = vmatprep.mubr.msk.f32.mxu0 %vm4674_vm3, %v4675_v10 }
 0xda6   :  { %v2021_v19 = vpop.f32.mrb[38].mxu0 }
 0xda7   :  { %v4073_v23 = vpop.f32.mrb[39].mxu0  ;;  %v5419_v5 = vadd.f32 %v3597_v53, %v2021_v19 }
 0xda9   :  { %v5427_v43 = vmul.f32 %v5034_v54, %v5419_v5  ;;  %v5431_v20 = vmul.f32 %v5036_v55, %v5419_v5  ;;  %v5443_v46 = vmul.f32 %v5039_v56, %v5419_v5  ;;  %v5452_v28 = vmul.f32 %v5177_v41, %v5419_v5 }
 0xdaa   :  { %v2026_v38 = vpop.f32.mrb[40].mxu0  ;;  %v2035_v12 = vmul.f32 %v4909_v39, %v5419_v5  ;;  %v2184_v30 = vmul.f32 %v4912_v40, %v5419_v5  ;;  %v2522_v45 = vmul.f32 %v4948_v48, %v5419_v5  ;;  %v2761_v37 = vmul.f32 %v4976_v52, %v5419_v5 }
 0xdab   :  { %v5421_v18 = vadd.f32 %v3597_v53, %v2026_v38  ;;  %v4076_v26 = vpop.f32.mrb[41].mxu0 }
 0xdad   :  { %v4490_v27 = vpack.i.bf16 %v5421_v18, %v5419_v5  ;;  %v5435_v15 = vmul.f32 %v5034_v54, %v5421_v18  ;;  %v5439_v29 = vmul.f32 %v5036_v55, %v5421_v18  ;;  %v5447_v47 = vmul.f32 %v5039_v56, %v5421_v18 }
 0xdae   :  { %v5456_v63 = vmul.f32 %v5177_v41, %v5421_v18  ;;  %v2036_v35 = vmul.f32 %v4909_v39, %v5421_v18  ;;  %v2185_v25 = vmul.f32 %v4912_v40, %v5421_v18 }
 0xdaf   :  { %4491 = vrot.lane.b32.xlu0 %v4490_v27, %s4676_s4  ;;  %v4500_v51 = vpack.i.bf16 %v5435_v15, %v5427_v43  ;;  %v4495_v33 = vpack.i.bf16 %v5439_v29, %v5431_v20  ;;  %v4505_v49 = vpack.i.bf16 %v5447_v47, %v5443_v46 }
 0xdb0   :  { %v4510_v24 = vpack.i.bf16 %v5456_v63, %v5452_v28  ;;  %v3644_v28 = vld [vmem:[%s5921_s10 + $0x38] sm:$0xff] }
 0xdd3   :  { %v2031_v16 = vpop.f32.mrb[42].mxu0 }
 0xdd4   :  { %v5466_v57 = vadd.f32 %v3597_v53, %v2031_v16  ;;  %v4079_v58 = vpop.f32.mrb[43].mxu0 }
 0xdd6   :  { %2045 = vrot.lane.b32.xlu1 %v5466_v57, %s4676_s4  ;;  %v2037_v1 = vmul.f32 %v4909_v39, %v5466_v57  ;;  %v2186_v61 = vmul.f32 %v4912_v40, %v5466_v57  ;;  %v2523_v39 = vmul.f32 %v4948_v48, %v5421_v18  ;;  %v2524_v40 = vmul.f32 %v4948_v48, %v5466_v57 }
 0xdd7   :  { %v2762_v48 = vmul.f32 %v4976_v52, %v5421_v18  ;;  %v2763_v0 = vmul.f32 %v4976_v52, %v5466_v57 }
 0xe21   :  { %v4492_v22 = vpop.permute.xlu0 %4491 }
 0xe22   :  { %v4494_v36 = vunpack.i.h.bf16 %v4492_v22  ;;  %v4493_v32 = vunpack.i.l.bf16 %v4492_v22 }
 0xe24   :  { %v4350_v42 = vpack.c.bf16 %v4494_v36, %v4493_v32 }
 0xe26   :  { %4352 = vmatpush3.bf16.xpose.msk.msra.mxu1 %vm4895_vm14, %v4350_v42  ;;  %4356 = vmatpush3.bf16.xpose.msk.msra.mxu0 %vm4895_vm14, %v4350_v42 }
 0xe27   :  { %4084 = vmatprep.subr.mxu1 %v4675_v10  ;;  %4099 = vmatprep.subr.mxu0 %v4675_v10 }
 0xe48   :  { %v2046_v60 = vpop.permute.xlu1 %2045 }
 0xe49   :  { %4085 = vmatpush3.xpose.msk.msra.mxu1 %vm338_vm13, %v2046_v60  ;;  %4100 = vmatpush3.xpose.msk.msra.mxu0 %vm338_vm13, %v2046_v60 }
 0xe4a   :  { %4363 = vmatprep.subr.bf16.mxu0 %v4672_v6  ;;  %4357 = vmatprep.subr.bf16.mxu1 %v4672_v6 }
 0xe4c   :  { %4087 = vmatmul.mubr.msk.f32.vlgmr.msra.gmra.mrb[20].mxu1 %vm338_vm13, %v2035_v12  ;;  %4102 = vmatmul.mubr.msk.f32.vlgmr.msra.gmra.mrb[44].mxu0 %vm338_vm13, %v2184_v30 }
 0xe4d   :  { %4366 = vmatpush3.bf16.xpose.msk.msra.mxu0 %vm4895_vm14, %v4350_v42  ;;  %4089 = vmatprep.mubr.msk.f32.mxu1 %vm4674_vm3, %v4675_v10 }
 0xe4e   :  { %4104 = vmatprep.mubr.msk.f32.mxu0 %vm4674_vm3, %v4675_v10  ;;  %4144 = vmatprep.subr.mxu0 %v4675_v10 }
 0xe50   :  { %4090 = vmatmul.mubr.msk.f32.gmra.mrb[22].mxu1 %vm338_vm13, %v2036_v35  ;;  %4105 = vmatmul.mubr.msk.f32.gmra.mrb[46].mxu0 %vm338_vm13, %v2185_v25 }
 0xe51   :  { %4092 = vmatprep.mubr.msk.f32.mxu1 %vm4674_vm3, %v4675_v10  ;;  %4107 = vmatprep.mubr.msk.f32.mxu0 %vm4674_vm3, %v4675_v10 }
 0xe54   :  { %4093 = vmatmul.mubr.msk.f32.gmra.mrb[24].mxu1 %vm338_vm13, %v2037_v1  ;;  %4108 = vmatmul.mubr.msk.f32.gmra.mrb[48].mxu0 %vm338_vm13, %v2186_v61 }
 0xe55   :  { %4145 = vmatpush3.xpose.msk.msra.mxu0 %vm338_vm13, %v2046_v60  ;;  %4146 = vmatprep.mubr.msk.f32.mxu0 %vm4674_vm3, %v4675_v10 }
 0xe56   :  { %4370 = vmatprep.subr.bf16.mxu0 %v4672_v6  ;;  %4116 = vmatprep.mubr.msk.f32.mxu1 %vm4674_vm3, %v4675_v10 }
 0xe58   :  { %4147 = vmatmul.mubr.msk.f32.vlgmr.msra.gmra.mrb[50].mxu0 %vm338_vm13, %v2522_v45 }
 0xe59   :  { %4373 = vmatpush3.bf16.xpose.msk.msra.mxu0 %vm4895_vm14, %v4350_v42  ;;  %4149 = vmatprep.mubr.msk.f32.mxu0 %vm4674_vm3, %v4675_v10  ;;  %vm3491_vm14 = vcmask 90112  }
 0xe5a   :  { %4174 = vmatprep.subr.mxu0 %v4675_v10 }
 0xe5c   :  { %4150 = vmatmul.mubr.msk.f32.gmra.mrb[52].mxu0 %vm338_vm13, %v2523_v39 }
 0xe5d   :  { %4152 = vmatprep.mubr.msk.f32.mxu0 %vm4674_vm3, %v4675_v10 }
 0xe60   :  { %4153 = vmatmul.mubr.msk.f32.gmra.mrb[54].mxu0 %vm338_vm13, %v2524_v40 }
 0xe61   :  { %4175 = vmatpush3.xpose.msk.msra.mxu0 %vm338_vm13, %v2046_v60  ;;  %4176 = vmatprep.mubr.msk.f32.mxu0 %vm4674_vm3, %v4675_v10 }
 0xe62   :  { %4377 = vmatprep.subr.bf16.mxu0 %v4672_v6 }
 0xe64   :  { %4177 = vmatmul.mubr.msk.f32.vlgmr.msra.gmra.mrb[56].mxu0 %vm338_vm13, %v2761_v37 }
 0xe65   :  { %4179 = vmatprep.mubr.msk.f32.mxu0 %vm4674_vm3, %v4675_v10 }
 0xe68   :  { %4180 = vmatmul.mubr.msk.f32.gmra.mrb[58].mxu0 %vm338_vm13, %v2762_v48 }
 0xe69   :  { %4182 = vmatprep.mubr.msk.f32.mxu0 %vm4674_vm3, %v4675_v10 }
 0xe6c   :  { %4183 = vmatmul.mubr.msk.f32.gmra.mrb[60].mxu0 %vm338_vm13, %v2763_v0 }
 0xe6d   :  { %4208 = vmatprep.mubr.msk.f32.mxu0 %vm4674_vm3, %v4675_v10 }
 0xf1f   :  { %v2128_v44 = vpop.f32.mrb[20].mxu1  ;;  %v2262_v3 = vpop.f32.mrb[44].mxu0 }
 0xf20   :  { %v2276_v7 = vmul.f32 0.35355338, %v2262_v3  ;;  %v4088_v11 = vpop.f32.mrb[21].mxu1  ;;  %v4103_v14 = vpop.f32.mrb[45].mxu0  ;;  %v2142_v17 = vmul.f32 0.35355338, %v2128_v44 }
 0xf22   :  { %v5551_v31 = vadd.f32 %v2276_v7, %v5005_v62  ;;  %v5556_v5 = vadd.f32 %v2142_v17, %v5005_v62 }
 0xf23   :  { %v2133_v34 = vpop.f32.mrb[22].mxu1  ;;  %v2267_v21 = vpop.f32.mrb[46].mxu0 }
 0xf24   :  { %v2277_v2 = vmul.f32 0.35355338, %v2267_v21  ;;  %v4091_v53 = vpop.f32.mrb[23].mxu1  ;;  %v4106_v19 = vpop.f32.mrb[47].mxu0  ;;  %v2143_v52 = vmul.f32 0.35355338, %v2133_v34 }
 0xf25   :  { %v2282_v23 = vsel %vm610_vm12, %v5551_v31, -inf  ;;  %v2148_v36 = vsel %vm610_vm12, %v5556_v5, -inf }
 0xf26   :  { %2283 = vmax.xlane.f32.xlu1 %v2282_v23  ;;  %v5559_v38 = vadd.f32 %v2277_v2, %v5008_v8  ;;  %v5566_v42 = vadd.f32 %v2143_v52, %v5008_v8 }
 0xf27   :  { %v2138_v18 = vpop.f32.mrb[24].mxu1  ;;  %v2272_v26 = vpop.f32.mrb[48].mxu0 }
 0xf28   :  { %v2144_v27 = vmul.f32 0.35355338, %v2138_v18  ;;  %v4094_v16 = vpop.f32.mrb[25].mxu1  ;;  %v4109_v58 = vpop.f32.mrb[49].mxu0  ;;  %v2278_v22 = vmul.f32 0.35355338, %v2272_v26 }
 0xf29   :  { %v2285_v32 = vsel %vm610_vm12, %v5559_v38, -inf  ;;  %v2151_v1 = vsel %vm610_vm12, %v5566_v42, -inf }
 0xf2a   :  { %2149 = vmax.xlane.f32.xlu1 %v2148_v36  ;;  %2286 = vmax.xlane.f32.xlu0 %v2285_v32  ;;  %v5569_v60 = vadd.f32 %v2144_v27, %v5001_v59  ;;  %v5576_v61 = vadd.f32 %v2278_v22, %v5001_v59 }
 0xf2b   :  { %v2600_v12 = vpop.f32.mrb[50].mxu0 }
 0xf2c   :  { %v4148_v30 = vpop.f32.mrb[51].mxu0  ;;  %v2154_v35 = vsel %vm617_vm11, %v5569_v60, -inf  ;;  %v2614_v25 = vmul.f32 0.35355338, %v2600_v12  ;;  %v2288_v37 = vsel %vm617_vm11, %v5576_v61, -inf }
 0xf2e   :  { %2155 = vmax.xlane.f32.xlu1 %v2154_v35  ;;  %2152 = vmax.xlane.f32.xlu0 %v2151_v1  ;;  %v5581_v48 = vadd.f32 %v2614_v25, %v5005_v62 }
 0xf2f   :  { %v2605_v45 = vpop.f32.mrb[52].mxu0 }
 0xf30   :  { %v2615_v39 = vmul.f32 0.35355338, %v2605_v45  ;;  %v4151_v40 = vpop.f32.mrb[53].mxu0  ;;  %v2620_v14 = vsel %vm610_vm12, %v5581_v48, -inf }
 0xf32   :  { %2289 = vmax.xlane.f32.xlu0 %v2288_v37  ;;  %v5584_v0 = vadd.f32 %v2615_v39, %v5008_v8 }
 0xf33   :  { %v2610_v44 = vpop.f32.mrb[54].mxu0 }
 0xf34   :  { %v2616_v3 = vmul.f32 0.35355338, %v2610_v44  ;;  %v4154_v7 = vpop.f32.mrb[55].mxu0  ;;  %v2623_v11 = vsel %vm610_vm12, %v5584_v0, -inf }
 0xf35   :  { %2624 = vmax.xlane.f32.xlu1 %v2623_v11 }
 0xf36   :  { %2621 = vmax.xlane.f32.xlu0 %v2620_v14  ;;  %v5591_v17 = vadd.f32 %v2616_v3, %v5001_v59 }
 0xf37   :  { %v2839_v34 = vpop.f32.mrb[56].mxu0 }
 0xf38   :  { %v2853_v21 = vmul.f32 0.35355338, %v2839_v34  ;;  %v4178_v2 = vpop.f32.mrb[57].mxu0  ;;  %v2626_v53 = vsel %vm617_vm11, %v5591_v17, -inf }
 0xf3a   :  { %2627 = vmax.xlane.f32.xlu0 %v2626_v53  ;;  %v5596_v19 = vadd.f32 %v2853_v21, %v5005_v62  ;;  %v2317_v62 = vmul.f32 %v5036_v55, %v5466_v57 }
 0xf3b   :  { %v2844_v52 = vpop.f32.mrb[58].mxu0 }
 0xf3c   :  { %v2854_v23 = vmul.f32 0.35355338, %v2844_v52  ;;  %v4181_v18 = vpop.f32.mrb[59].mxu0  ;;  %v2859_v26 = vsel %vm610_vm12, %v5596_v19, -inf }
 0xf3d   :  { %2860 = vmax.xlane.f32.xlu1 %v2859_v26 }
 0xf3e   :  { %v5601_v27 = vadd.f32 %v2854_v23, %v5008_v8 }
 0xf3f   :  { %v2849_v16 = vpop.f32.mrb[60].mxu0 }
 0xf40   :  { %v4184_v58 = vpop.f32.mrb[61].mxu0  ;;  %v2862_v22 = vsel %vm610_vm12, %v5601_v27, -inf  ;;  %v2855_v8 = vmul.f32 0.35355338, %v2849_v16 }
 0xf41   :  { %2863 = vmax.xlane.f32.xlu0 %v2862_v22 }
 0xf42   :  { %v5617_v36 = vadd.f32 %v2855_v8, %v5001_v59 }
 0xf44   :  { %v2865_v32 = vsel %vm617_vm11, %v5617_v36, -inf }
 0xf4e   :  { %2325 = vrot.lane.b32.xlu1 %v2317_v62, %s4678_s22 }
 0xf52   :  { %4501 = vrot.lane.b32.xlu1 %v4500_v51, %s4678_s22 }
 0xf57   :  { %4496 = vrot.lane.b32.xlu0 %v4495_v33, %s4678_s22 }
 0xf76   :  { %2866 = vmax.xlane.f32.xlu1 %v2865_v32 }
 0xfb3   :  { %v2284_v55 = vpop.xlane.xlu1 %2283 }
 0xfb4   :  { %v2291_v12 = vsub.f32 %v5551_v31, %v2284_v55 }
 0xfb6   :  { %v2294_v30 = vmul.f32 1.442695, %v2291_v12 }
 0xfb7   :  { %v2150_v35 = vpop.xlane.xlu1 %2149  ;;  %v2287_v43 = vpop.xlane.xlu0 %2286 }
 0xfb8   :  { %4587 = vpow2.f32 %v2294_v30  ;;  %v2157_v15 = vsub.f32 %v5556_v5, %v2150_v35  ;;  %v2292_v20 = vsub.f32 %v5559_v38, %v2287_v43 }
 0xfba   :  { %v2160_v29 = vmul.f32 1.442695, %v2157_v15  ;;  %v2296_v51 = vmul.f32 1.442695, %v2292_v20 }
 0xfbb   :  { %v2156_v33 = vpop.xlane.xlu1 %2155  ;;  %v2153_v59 = vpop.xlane.xlu0 %2152 }
 0xfbc   :  { %4589 = vpow2.f32 %v2160_v29  ;;  %v2159_v25 = vsub.f32 %v5569_v60, %v2156_v33  ;;  %v2158_v1 = vsub.f32 %v5566_v42, %v2153_v59  ;;  %v2183_v59 = vmul.f32 %v5034_v54, %v5466_v57 }
 0xfbd   :  { %4591 = vpow2.f32 %v2296_v51 }
 0xfbe   :  { %v2164_v45 = vmul.f32 1.442695, %v2159_v25  ;;  %v2162_v31 = vmul.f32 1.442695, %v2158_v1 }
 0xfbf   :  { %v2290_v39 = vpop.xlane.xlu0 %2289 }
 0xfc0   :  { %v2293_v40 = vsub.f32 %v5576_v61, %v2290_v39  ;;  %4593 = vpow2.f32 %v2162_v31 }
 0xfc1   :  { %4595 = vpow2.f32 %v2164_v45 }
 0xfc2   :  { %v5627_v37 = vpop.eup %4587  ;;  %v2298_v5 = vmul.f32 1.442695, %v2293_v40  ;;  %v2625_v38 = vpop.xlane.xlu1 %2624 }
 0xfc3   :  { %v2622_v44 = vpop.xlane.xlu0 %2621  ;;  %v2630_v3 = vsub.f32 %v5584_v0, %v2625_v38  ;;  %v2300_v60 = vsel %vm610_vm12, %v5627_v37, 0.0  ;;  %v3643_v38 = vld [vmem:[%s5921_s10 + $0x30] sm:$0xff] }
 0xfc4   :  { %4597 = vpow2.f32 %v2298_v5  ;;  %v2629_v42 = vsub.f32 %v5581_v48, %v2622_v44  ;;  %2301 = vadd.xlane.f32.xlu0 %v2300_v60 }
 0xfc5   :  { %v2634_v7 = vmul.f32 1.442695, %v2630_v3 }
 0xfc6   :  { %v5633_v11 = vpop.eup %4589  ;;  %v2632_v61 = vmul.f32 1.442695, %v2629_v42 }
 0xfc7   :  { %4599 = vpow2.f32 %v2634_v7  ;;  %v2628_v14 = vpop.xlane.xlu0 %2627  ;;  %v2166_v34 = vsel %vm610_vm12, %v5633_v11, 0.0  ;;  %v5637_v21 = vpop.eup %4591 }
 0xfc8   :  { %4601 = vpow2.f32 %v2632_v61  ;;  %v2631_v0 = vsub.f32 %v5591_v17, %v2628_v14  ;;  %2167 = vadd.xlane.f32.xlu1 %v2166_v34  ;;  %v2303_v23 = vsel %vm610_vm12, %v5637_v21, 0.0 }
 0xfca   :  { %v2636_v2 = vmul.f32 1.442695, %v2631_v0  ;;  %v2861_v53 = vpop.xlane.xlu1 %2860  ;;  %v5640_v52 = vpop.eup %4593 }
 0xfcb   :  { %v2868_v48 = vsub.f32 %v5596_v19, %v2861_v53  ;;  %v5645_v18 = vpop.eup %4595  ;;  %v2169_v26 = vsel %vm610_vm12, %v5640_v52, 0.0 }
 0xfcc   :  { %4603 = vpow2.f32 %v2636_v2  ;;  %2304 = vadd.xlane.f32.xlu1 %v2303_v23  ;;  %2170 = vadd.xlane.f32.xlu0 %v2169_v26  ;;  %v2172_v19 = vsel %vm617_vm11, %v5645_v18, 0.0 }
 0xfcd   :  { %v2871_v16 = vmul.f32 1.442695, %v2868_v48 }
 0xfce   :  { %v5649_v17 = vpop.eup %4597  ;;  %v2864_v58 = vpop.xlane.xlu0 %2863 }
 0xfcf   :  { %4605 = vpow2.f32 %v2871_v16  ;;  %v2306_v22 = vsel %vm617_vm11, %v5649_v17, 0.0  ;;  %v2326_v33 = vpop.permute.xlu1 %2325  ;;  %v2869_v25 = vsub.f32 %v5601_v27, %v2864_v58  ;;  %v2894_v27 = vmul.f32 %v5177_v41, %v5466_v57 }
 0xfd0   :  { %2173 = vadd.xlane.f32.xlu1 %v2172_v19  ;;  %2307 = vadd.xlane.f32.xlu0 %v2306_v22  ;;  %v4381_v41 = vpack.c.bf16 %v3644_v28, %v3643_v38 }
 0xfd1   :  { %v5655_v62 = vpop.eup %4599  ;;  %v2873_v1 = vmul.f32 1.442695, %v2869_v25 }
 0xfd2   :  { %v5657_v8 = vpop.eup %4601  ;;  %v4497_v32 = vpop.permute.xlu0 %4496  ;;  %v2641_v55 = vsel %vm610_vm12, %v5655_v62, 0.0 }
 0xfd3   :  { %v4499_v12 = vunpack.i.h.bf16 %v4497_v32  ;;  %v4498_v30 = vunpack.i.l.bf16 %v4497_v32  ;;  %v2638_v35 = vsel %vm610_vm12, %v5657_v8, 0.0  ;;  %v4502_v45 = vpop.permute.xlu1 %4501  ;;  %4607 = vpow2.f32 %v2873_v1 }
 0xfd4   :  { %2642 = vadd.xlane.f32.xlu0 %v2641_v55  ;;  %2639 = vadd.xlane.f32.xlu1 %v2638_v35  ;;  %v4504_v3 = vunpack.i.h.bf16 %v4502_v45  ;;  %v4503_v60 = vunpack.i.l.bf16 %v4502_v45 }
 0xfd5   :  { %v4358_v15 = vpack.c.bf16 %v4499_v12, %v4498_v30 }
 0xfd6   :  { %v5663_v43 = vpop.eup %4603  ;;  %v4361_v34 = vpack.c.bf16 %v4504_v3, %v4503_v60 }
 0xfd7   :  { %v2644_v20 = vsel %vm617_vm11, %v5663_v43, 0.0  ;;  %4359 = vmatpush3.bf16.msra.mxu1 %v4358_v15 }
 0xfd8   :  { %2645 = vadd.xlane.f32.xlu1 %v2644_v20  ;;  %4114 = vmatprep.subr.mxu1 %v4675_v10 }
 0xfd9   :  { %v5667_v29 = vpop.eup %4605 }
 0xfda   :  { %v2877_v51 = vsel %vm610_vm12, %v5667_v29, 0.0 }
 0xfdb   :  { %2878 = vadd.xlane.f32.xlu0 %v2877_v51  ;;  %4115 = vmatpush3.msk.msra.mxu1 %vm810_vm15, %v2326_v33 }
 0xfdc   :  { %4360 = vmatprep.subr.bf16.mxu1 %v4672_v6 }
 0xfdd   :  { %v5683_v5 = vpop.eup %4607 }
 0xfde   :  { %v2880_v46 = vsel %vm610_vm12, %v5683_v5, 0.0 }
 0xfe9   :  { %4506 = vrot.lane.b32.xlu1 %v4505_v49, %s4678_s22  ;;  %v2655_v49 = vmul.f32 %v5039_v56, %v5466_v57  ;;  %v3642_v56 = vld [vmem:[%s5921_s10 + $0x28] sm:$0xff] }
 0xff1   :  { %2427 = vrot.lane.b32.xlu0 %v2183_v59, %s4678_s22 }
0x1003   :  { %v2867_v31 = vpop.xlane.xlu1 %2866 }
0x1004   :  { %v2870_v39 = vsub.f32 %v5617_v36, %v2867_v31  ;;  %v3641_v36 = vld [vmem:[%s5921_s10 + $0x20] sm:$0xff] }
0x1005   :  { %v4378_v44 = vpack.c.bf16 %v3642_v56, %v3641_v36 }
0x1006   :  { %v2875_v40 = vmul.f32 1.442695, %v2870_v39 }
0x1007   :  { %4379 = vmatpush3.bf16.msra.mxu0 %v4378_v44 }
0x1008   :  { %4609 = vpow2.f32 %v2875_v40  ;;  %4380 = vmatprep.subr.bf16.mxu0 %v4672_v6 }
0x100b   :  { %4382 = vmatpush3.bf16.msra.mxu0 %v4381_v41  ;;  %v3649_v41 = vld [vmem:[%s5922_s11 + $0x1] ss:$0 sm:$0xff] }
0x100c   :  { %4383 = vmatprep.subr.bf16.mxu0 %v4672_v6 }
0x100d   :  { %2881 = vadd.xlane.f32.xlu1 %v2880_v46 }
0x1012   :  { %v5687_v47 = vpop.eup %4609 }
0x1013   :  { %v2883_v54 = vsel %vm617_vm11, %v5687_v47, 0.0 }
0x1014   :  { %2884 = vadd.xlane.f32.xlu0 %v2883_v54 }
0x101e   :  { %2663 = vrot.lane.b32.xlu1 %v2655_v49, %s4678_s22 }
0x1022   :  { %4511 = vrot.lane.b32.xlu1 %v4510_v24, %s4678_s22 }
0x1026   :  { %2902 = vrot.lane.b32.xlu1 %v2894_v27, %s4678_s22 }
0x1051   :  { %v2302_v63 = vpop.xlane.xlu0 %2301 }
0x1052   :  { %4611 = vrcp.f32 %v2302_v63 }
0x1055   :  { %v2168_v24 = vpop.xlane.xlu1 %2167 }
0x1059   :  { %v2305_v57 = vpop.xlane.xlu1 %2304  ;;  %v2171_v42 = vpop.xlane.xlu0 %2170 }
0x105a   :  { %4613 = vrcp.f32 %v2305_v57 }
0x105c   :  { %v4612_v7 = vpop.eup %4611 }
0x105d   :  { %v2312_v61 = vmul.f32 %v4612_v7, %v5627_v37  ;;  %v2174_v14 = vpop.xlane.xlu1 %2173  ;;  %v2308_v0 = vpop.xlane.xlu0 %2307 }
0x105e   :  { %4615 = vrcp.f32 %v2308_v0 }
0x105f   :  { %4117 = vmatmul.mubr.msk.f32.vlgmr.msra.gmra.mrb[26].mxu1 %vm610_vm12, %v2312_v61  ;;  %4617 = vrcp.f32 %v2168_v24 }
0x1060   :  { %4362 = vmatpush3.bf16.msra.mxu1 %v4361_v34  ;;  %4119 = vmatprep.mubr.msk.f32.mxu1 %vm4674_vm3, %v4675_v10  ;;  %4619 = vrcp.f32 %v2171_v42 }
0x1061   :  { %4129 = vmatprep.subr.mxu1 %v4675_v10  ;;  %v2640_v2 = vpop.xlane.xlu1 %2639  ;;  %v2643_v48 = vpop.xlane.xlu0 %2642  ;;  %4621 = vrcp.f32 %v2174_v14 }
0x1062   :  { %4623 = vrcp.f32 %v2640_v2 }
0x1063   :  { %4625 = vrcp.f32 %v2643_v48 }
0x1064   :  { %v4614_v53 = vpop.eup %4613 }
0x1065   :  { %v2313_v23 = vmul.f32 %v4614_v53, %v5637_v21  ;;  %v2646_v37 = vpop.xlane.xlu1 %2645 }
0x1066   :  { %4627 = vrcp.f32 %v2646_v37 }
0x1067   :  { %4120 = vmatmul.mubr.msk.f32.gmra.mrb[28].mxu1 %vm610_vm12, %v2313_v23 }
0x1068   :  { %v2879_v26 = vpop.xlane.xlu0 %2878  ;;  %4122 = vmatprep.mubr.msk.f32.mxu1 %vm4674_vm3, %v4675_v10  ;;  %v4616_v16 = vpop.eup %4615 }
0x1069   :  { %v4507_v58 = vpop.permute.xlu1 %4506  ;;  %v2314_v22 = vmul.f32 %v4616_v16, %v5649_v17  ;;  %v4618_v19 = vpop.eup %4617  ;;  %4629 = vrcp.f32 %v2879_v26 }
0x106a   :  { %v4509_v32 = vunpack.i.h.bf16 %v4507_v58  ;;  %v4508_v55 = vunpack.i.l.bf16 %v4507_v58  ;;  %v2178_v21 = vmul.f32 %v4618_v19, %v5633_v11  ;;  %v4620_v30 = vpop.eup %4619 }
0x106b   :  { %4123 = vmatmul.mubr.msk.f32.gmra.mrb[30].mxu1 %vm610_vm12, %v2314_v22  ;;  %v2179_v17 = vmul.f32 %v4620_v30, %v5640_v52  ;;  %v4622_v15 = vpop.eup %4621 }
0x106c   :  { %v2428_v12 = vpop.permute.xlu0 %2427  ;;  %4131 = vmatprep.mubr.msk.f32.mxu1 %vm4674_vm3, %v4675_v10  ;;  %v4368_v35 = vpack.c.bf16 %v4509_v32, %v4508_v55  ;;  %v2180_v11 = vmul.f32 %v4622_v15, %v5645_v18  ;;  %v4624_v52 = vpop.eup %4623 }
0x106d   :  { %4130 = vmatpush3.msk.msra.mxu1 %vm810_vm15, %v2428_v12  ;;  %v2650_v51 = vmul.f32 %v4624_v52, %v5657_v8  ;;  %v4626_v59 = vpop.eup %4625 }
0x106e   :  { %4367 = vmatprep.subr.bf16.mxu1 %v4672_v6  ;;  %v2651_v1 = vmul.f32 %v4626_v59, %v5655_v62 }
0x106f   :  { %4132 = vmatmul.mubr.msk.f32.vlgmr.msra.gmra.mrb[26].mxu1 %vm610_vm12, %v2178_v21 }
0x1070   :  { %4369 = vmatpush3.bf16.msra.mxu1 %v4368_v35  ;;  %4134 = vmatprep.mubr.msk.f32.mxu1 %vm4674_vm3, %v4675_v10  ;;  %v4628_v45 = vpop.eup %4627  ;;  %v3654_v35 = vld [vmem:[%s5925_s14 + $0x20] sm:$0xff] }
0x1071   :  { %4159 = vmatprep.subr.mxu1 %v4675_v10  ;;  %v2652_v40 = vmul.f32 %v4628_v45, %v5663_v43 }
0x1073   :  { %4135 = vmatmul.mubr.msk.f32.gmra.mrb[28].mxu1 %vm610_vm12, %v2179_v17  ;;  %v4630_v46 = vpop.eup %4629  ;;  %v3655_v17 = vld [vmem:[%s5925_s14 + $0x28] sm:$0xff] }
0x1074   :  { %4137 = vmatprep.mubr.msk.f32.mxu1 %vm4674_vm3, %v4675_v10  ;;  %v2889_v62 = vmul.f32 %v4630_v46, %v5667_v29  ;;  %v4384_v15 = vpack.c.bf16 %v3655_v17, %v3654_v35 }
0x1077   :  { %4138 = vmatmul.mubr.msk.f32.gmra.mrb[30].mxu1 %vm610_vm12, %v2180_v11  ;;  %v3656_v11 = vld [vmem:[%s5925_s14 + $0x30] sm:$0xff] }
0x1078   :  { %4161 = vmatprep.mubr.msk.f32.mxu1 %vm4674_vm3, %v4675_v10 }
0x109a   :  { %v2882_v20 = vpop.xlane.xlu1 %2881 }
0x109b   :  { %4631 = vrcp.f32 %v2882_v20  ;;  %v3657_v20 = vld [vmem:[%s5925_s14 + $0x38] sm:$0xff] }
0x109c   :  { %v4387_v52 = vpack.c.bf16 %v3657_v20, %v3656_v11 }
0x109e   :  { %v2664_v33 = vpop.permute.xlu1 %2663 }
0x109f   :  { %4160 = vmatpush3.msk.msra.mxu1 %vm810_vm15, %v2664_v33 }
0x10a0   :  { %4162 = vmatmul.mubr.msk.f32.vlgmr.msra.gmra.mrb[26].mxu1 %vm610_vm12, %v2650_v51  ;;  %4374 = vmatprep.subr.bf16.mxu1 %v4672_v6 }
0x10a1   :  { %4164 = vmatprep.mubr.msk.f32.mxu1 %vm4674_vm3, %v4675_v10  ;;  %v2885_v18 = vpop.xlane.xlu0 %2884 }
0x10a2   :  { %v4512_v25 = vpop.permute.xlu1 %4511  ;;  %4633 = vrcp.f32 %v2885_v18 }
0x10a3   :  { %v4514_v31 = vunpack.i.h.bf16 %v4512_v25  ;;  %v4513_v39 = vunpack.i.l.bf16 %v4512_v25 }
0x10a4   :  { %4165 = vmatmul.mubr.msk.f32.gmra.mrb[28].mxu1 %vm610_vm12, %v2651_v1 }
0x10a5   :  { %v4375_v8 = vpack.c.bf16 %v4514_v31, %v4513_v39  ;;  %4167 = vmatprep.mubr.msk.f32.mxu1 %vm4674_vm3, %v4675_v10  ;;  %v4632_v49 = vpop.eup %4631 }
0x10a6   :  { %v2903_v54 = vpop.permute.xlu1 %2902  ;;  %v2890_v43 = vmul.f32 %v4632_v49, %v5683_v5 }
0x10a7   :  { %4376 = vmatpush3.bf16.msra.mxu1 %v4375_v8 }
0x10a8   :  { %4168 = vmatmul.mubr.msk.f32.gmra.mrb[30].mxu1 %vm610_vm12, %v2652_v40  ;;  %4189 = vmatprep.subr.mxu1 %v4675_v10  ;;  %v3652_v40 = vld [vmem:[%s5923_s12 + $0x1] ss:$0 sm:$0xff] }
0x10a9   :  { %4191 = vmatprep.mubr.msk.f32.mxu1 %vm4674_vm3, %v4675_v10 }
0x10ab   :  { %4190 = vmatpush3.msk.msra.mxu1 %vm810_vm15, %v2903_v54 }
0x10ac   :  { %4192 = vmatmul.mubr.msk.f32.vlgmr.msra.gmra.mrb[26].mxu1 %vm610_vm12, %v2889_v62  ;;  %4389 = vmatprep.subr.bf16.mxu1 %v4672_v6  ;;  %v4634_v27 = vpop.eup %4633  ;;  %v3653_v62 = vld [vmem:[%s5946_s26 + $0x1] ss:$0 sm:$0xff] }
0x10ad   :  { %4194 = vmatprep.mubr.msk.f32.mxu1 %vm4674_vm3, %v4675_v10  ;;  %v2891_v29 = vmul.f32 %v4634_v27, %v5687_v47 }
0x10b0   :  { %4195 = vmatmul.mubr.msk.f32.gmra.mrb[28].mxu1 %vm610_vm12, %v2890_v43 }
0x10b1   :  { %4197 = vmatprep.mubr.msk.f32.mxu1 %vm4674_vm3, %v4675_v10 }
0x10b4   :  { %4198 = vmatmul.mubr.msk.f32.gmra.mrb[30].mxu1 %vm610_vm12, %v2891_v29 }
0x10b5   :  { %4250 = vmatprep.mubr.msk.f32.mxu1 %vm4674_vm3, %v4675_v10 }
0x117f   :  { %v2983_v36 = vpop.f32.mrb[26].mxu1 }
0x1180   :  { %v4193_v56 = vpop.f32.mrb[27].mxu1  ;;  %4209 = vmatmul.mubr.msk.f32.vlgmr.msra.gmra.mrb[62].mxu0 %vm338_vm13, %v2983_v36 }
0x1181   :  { %4211 = vmatprep.mubr.msk.f32.mxu0 %vm4674_vm3, %v4675_v10  ;;  %4385 = vmatpush3.bf16.msra.mxu0 %v4384_v15 }
0x1182   :  { %4386 = vmatprep.subr.bf16.mxu0 %v4672_v6 }
0x1183   :  { %v2988_v5 = vpop.f32.mrb[28].mxu1 }
0x1184   :  { %v4196_v38 = vpop.f32.mrb[29].mxu1  ;;  %4212 = vmatmul.mubr.msk.f32.gmra.mrb[64].mxu0 %vm338_vm13, %v2988_v5 }
0x1185   :  { %4214 = vmatprep.mubr.msk.f32.mxu0 %vm4674_vm3, %v4675_v10  ;;  %4388 = vmatpush3.bf16.msra.mxu0 %v4387_v52 }
0x1186   :  { %4401 = vmatprep.subr.bf16.mxu0 %v4672_v6 }
0x1187   :  { %v2993_v47 = vpop.f32.mrb[30].mxu1 }
0x1188   :  { %v4199_v44 = vpop.f32.mrb[31].mxu1  ;;  %4215 = vmatmul.mubr.msk.f32.gmra.mrb[66].mxu0 %vm338_vm13, %v2993_v47 }
0x1189   :  { %4225 = vmatprep.mubr.msk.f32.mxu0 %vm4674_vm3, %v4675_v10  ;;  %v3663_v44 = vld [vmem:[%s5927_s16 + $0x40] sm:$0xff] }
0x1253   :  { %v3080_v28 = vpop.f32.mrb[62].mxu0 }
0x1254   :  { %v3094_v63 = vadd.f32 %v3080_v28, %v5367_v9  ;;  %v4210_v24 = vpop.f32.mrb[63].mxu0  ;;  %v3664_v28 = vld [vmem:[%s5927_s16 + $0x48] sm:$0xff] }
0x1255   :  { %v3666_v24 = vld [vmem:[%s5927_s16 + $0x58] sm:$0xff] }
0x1256   :  { %v5785_v57 = vadd.f32 %v3649_v41, %v3094_v63  ;;  %v3665_v63 = vld [vmem:[%s5927_s16 + $0x50] sm:$0xff] }
0x1257   :  { %v3085_v3 = vpop.f32.mrb[64].mxu0 }
0x1258   :  { %v3095_v60 = vadd.f32 %v3085_v3, %v5372_v50  ;;  %v4213_v42 = vpop.f32.mrb[65].mxu0  ;;  %v3112_v7 = vsel %vm338_vm13, %v5785_v57, 0.0  ;;  %v4393_v3 = vpack.c.bf16 %v3666_v24, %v3665_v63 }
0x1259   :  { %3113 = vadd.xlane.f32.xlu1 %v3112_v7  ;;  %v3668_v42 = vld [vmem:[%s5927_s16 + $0x68] sm:$0xff] }
0x125a   :  { %v5790_v61 = vadd.f32 %v3649_v41, %v3095_v60  ;;  %v3667_v60 = vld [vmem:[%s5927_s16 + $0x60] sm:$0xff] }
0x125b   :  { %v3090_v14 = vpop.f32.mrb[66].mxu0  ;;  %v4396_v7 = vpack.c.bf16 %v3668_v42, %v3667_v60 }
0x125c   :  { %v3096_v34 = vadd.f32 %v3090_v14, %v5377_v4  ;;  %v4216_v0 = vpop.f32.mrb[67].mxu0  ;;  %v3115_v9 = vsel %vm338_vm13, %v5790_v61, 0.0  ;;  %v3669_v14 = vld [vmem:[%s5927_s16 + $0x70] sm:$0xff] }
0x125d   :  { %3116 = vadd.xlane.f32.xlu0 %v3115_v9  ;;  %v3398_v9 = vld [vmem:[%s5929_s18] sm:$0xff] }
0x125e   :  { %v5795_v2 = vadd.f32 %v3649_v41, %v3096_v34  ;;  %v4390_v41 = vpack.c.bf16 %v3664_v28, %v3663_v44  ;;  %v3670_v34 = vld [vmem:[%s5927_s16 + $0x78] sm:$0xff] }
0x125f   :  { %v4399_v0 = vpack.c.bf16 %v3670_v34, %v3669_v14 }
0x1260   :  { %v3118_v50 = vsel %vm317_vm8, %v5795_v2, 0.0  ;;  %4391 = vmatpush3.bf16.msra.mxu1 %v4390_v41 }
0x1261   :  { %3119 = vadd.xlane.f32.xlu0 %v3118_v50  ;;  %4392 = vmatprep.subr.bf16.mxu1 %v4672_v6  ;;  %v3399_v50 = vld [vmem:[%s5929_s18 + $0x8] sm:$0xff] }
0x1264   :  { %4394 = vmatpush3.bf16.msra.mxu1 %v4393_v3 }
0x1265   :  { %4395 = vmatprep.subr.bf16.mxu1 %v4672_v6 }
0x1268   :  { %4397 = vmatpush3.bf16.msra.mxu1 %v4396_v7 }
0x1269   :  { %4398 = vmatprep.subr.bf16.mxu1 %v4672_v6 }
0x126c   :  { %4400 = vmatpush3.bf16.msra.mxu1 %v4399_v0 }
0x12e6   :  { %v3114_v53 = vpop.xlane.xlu1 %3113 }
0x12e7   :  { %v3121_v48 = vmul.f32 0.03125, %v3114_v53  ;;  %v4402_v53 = vpack.c.bf16 %v3399_v50, %v3398_v9 }
0x12e9   :  { %v3124_v23 = vsub.f32 %v5785_v57, %v3121_v48  ;;  %v3659_v48 = vld [vmem:[%s5926_s15 + $0x1] ss:$0 sm:$0xff] }
0x12ea   :  { %v3117_v37 = vpop.xlane.xlu0 %3116 }
0x12eb   :  { %v3122_v26 = vmul.f32 0.03125, %v3117_v37  ;;  %v3127_v16 = vmul.f32 %v3124_v23, %v3124_v23 }
0x12ed   :  { %v3125_v4 = vsub.f32 %v5790_v61, %v3122_v26  ;;  %v3130_v58 = vsel %vm338_vm13, %v3127_v16, 0.0 }
0x12ee   :  { %3131 = vadd.xlane.f32.xlu0 %v3130_v58  ;;  %v3120_v22 = vpop.xlane.xlu0 %3119 }
0x12ef   :  { %v3123_v19 = vmul.f32 0.03125, %v3120_v22  ;;  %v3128_v32 = vmul.f32 %v3125_v4, %v3125_v4 }
0x12f1   :  { %v3126_v55 = vsub.f32 %v5795_v2, %v3123_v19  ;;  %v3133_v12 = vsel %vm338_vm13, %v3128_v32, 0.0 }
0x12f2   :  { %3134 = vadd.xlane.f32.xlu0 %v3133_v12 }
0x12f3   :  { %v3129_v21 = vmul.f32 %v3126_v55, %v3126_v55 }
0x12f5   :  { %v3136_v30 = vsel %vm317_vm8, %v3129_v21, 0.0  ;;  %vm129_vm8 = vcmp.eq.s32.totalorder %v4811_v13, 1 }
0x12f6   :  { %3137 = vadd.xlane.f32.xlu0 %v3136_v30 }
0x137b   :  { %v3132_v51 = vpop.xlane.xlu0 %3131 }
0x137c   :  { %v3139_v33 = vmul.f32 0.03125, %v3132_v51 }
0x137e   :  { %v3142_v59 = vadd.f32 1e-05, %v3139_v33 }
0x137f   :  { %v3135_v18 = vpop.xlane.xlu0 %3134 }
0x1380   :  { %4635 = vrsqrt.f32 %v3142_v59  ;;  %v3140_v25 = vmul.f32 0.03125, %v3135_v18 }
0x1382   :  { %v3143_v1 = vadd.f32 1e-05, %v3140_v25  ;;  %v3400_v25 = vld [vmem:[%s5929_s18 + $0x10] sm:$0xff] }
0x1383   :  { %v3138_v45 = vpop.xlane.xlu0 %3137 }
0x1384   :  { %4637 = vrsqrt.f32 %v3143_v1  ;;  %v3141_v31 = vmul.f32 0.03125, %v3138_v45  ;;  %v3401_v1 = vld [vmem:[%s5929_s18 + $0x18] sm:$0xff] }
0x1385   :  { %v4405_v45 = vpack.c.bf16 %v3401_v1, %v3400_v25 }
0x1386   :  { %v3144_v39 = vadd.f32 1e-05, %v3141_v31 }
0x1388   :  { %4639 = vrsqrt.f32 %v3144_v39  ;;  %v3675_v39 = vld [vmem:[%s5928_s17 + $0x1] ss:$0 sm:$0xff]  ;;  %s4679_s17 = smov [#allocation3]  }
0x1389   :  { %s3506_s18 = sshll.u32 %s4679_s17, 4  ;;  %s3507_s18 = int_to_ptr.vmem [resolvable:$true] %s3506_s18 }
0x138a   :  { %v4636_v8 = vpop.eup %4635  ;;  %s4647_s12 = scalar_lea.vmem %s3507_s18, 256  ;;  %p4652_p1 = scmp.lt.s32.totalorder %s3507_s18, %s3507_s18 }
0x138b   :  { %v3148_v46 = vmul.f32 %v4636_v8, %v3124_v23  ;;  %p4648_p0 = scmp.ne.s32.totalorder %s3507_s18, %s4647_s12  ;;  %p4653_p2 = scmp.lt.s32.totalorder %s4647_s12, %s4647_s12 }
0x138d   :  { %v3157_v54 = vmul.f32 %v3652_v40, %v3148_v46  ;;  %p4654_p3 = por %p4653_p2, %p4652_p1 }
0x138e   :  { %v4638_v49 = vpop.eup %4637 }
0x138f   :  { %v3166_v43 = vadd.f32 %v3653_v62, %v3157_v54  ;;  %v3149_v27 = vmul.f32 %v4638_v49, %v3125_v4  ;;  %p4655_p4 = pnand %p4654_p3, %p4648_p0 }
0x1391   :  { %4226 = vmatmul.mubr.msk.f32.vlgmr.msra.gmra.mrb[68].mxu0 %vm338_vm13, %v3166_v43  ;;  %v3158_v29 = vmul.f32 %v3652_v40, %v3149_v27 }
0x1392   :  { %v4640_v36 = vpop.eup %4639  ;;  %4228 = vmatprep.mubr.msk.f32.mxu0 %vm4674_vm3, %v4675_v10  ;;  %4403 = vmatpush3.bf16.msra.mxu0 %v4402_v53 }
0x1393   :  { %v3167_v56 = vadd.f32 %v3653_v62, %v3158_v29  ;;  %v3150_v5 = vmul.f32 %v4640_v36, %v3126_v55  ;;  %4404 = vmatprep.subr.bf16.mxu0 %v4672_v6 }
0x1395   :  { %4229 = vmatmul.mubr.msk.f32.gmra.mrb[70].mxu0 %vm338_vm13, %v3167_v56  ;;  %v3159_v38 = vmul.f32 %v3652_v40, %v3150_v5 }
0x1396   :  { %4231 = vmatprep.mubr.msk.f32.mxu0 %vm4674_vm3, %v4675_v10  ;;  %4406 = vmatpush3.bf16.msra.mxu0 %v4405_v45 }
0x1397   :  { %v3168_v47 = vadd.f32 %v3653_v62, %v3159_v38 }
0x1399   :  { %4232 = vmatmul.mubr.msk.f32.gmra.mrb[72].mxu0 %vm338_vm13, %v3168_v47 }
0x139a   :  { %4267 = vmatprep.mubr.msk.f32.mxu0 %vm4674_vm3, %v4675_v10 }
0x1464   :  { %v3257_v23 = vpop.f32.mrb[68].mxu0 }
0x1465   :  { %v3258_v37 = vadd.f32 %v3659_v48, %v3257_v23  ;;  %v4227_v26 = vpop.f32.mrb[69].mxu0 }
0x1467   :  { %v3274_v16 = vmul.f32 0.70710677, %v3258_v37  ;;  %v3271_v30 = vmul.f32 0.5, %v3258_v37 }
0x1468   :  { %v3262_v4 = vpop.f32.mrb[70].mxu0 }
0x1469   :  { %4641 = verf.f32 %v3274_v16  ;;  %v3263_v58 = vadd.f32 %v3659_v48, %v3262_v4  ;;  %v4230_v22 = vpop.f32.mrb[71].mxu0 }
0x146b   :  { %v3275_v19 = vmul.f32 0.70710677, %v3263_v58  ;;  %v3272_v11 = vmul.f32 0.5, %v3263_v58 }
0x146c   :  { %v3267_v32 = vpop.f32.mrb[72].mxu0 }
0x146d   :  { %4643 = verf.f32 %v3275_v19  ;;  %v3268_v55 = vadd.f32 %v3659_v48, %v3267_v32  ;;  %v4233_v12 = vpop.f32.mrb[73].mxu0 }
0x146f   :  { %v3276_v21 = vmul.f32 0.70710677, %v3268_v55  ;;  %v3273_v33 = vmul.f32 0.5, %v3268_v55 }
0x1471   :  { %4645 = verf.f32 %v3276_v21 }
0x1473   :  { %v4642_v6 = vpop.eup %4641 }
0x1474   :  { %v3280_v35 = vadd.f32 1.0, %v4642_v6 }
0x1476   :  { %v3283_v17 = vmul.f32 %v3280_v35, %v3271_v30 }
0x1477   :  { %v4644_v15 = vpop.eup %4643 }
0x1478   :  { %v3281_v20 = vadd.f32 1.0, %v4644_v15  ;;  %4251 = vmatmul.mubr.msk.f32.vlgmr.msra.gmra.mrb[32].mxu1 %vm1769_vm0, %v3283_v17 }
0x1479   :  { %4253 = vmatprep.mubr.msk.f32.mxu1 %vm4674_vm3, %v4675_v10 }
0x147a   :  { %v3284_v52 = vmul.f32 %v3281_v20, %v3272_v11 }
0x147b   :  { %v4646_v51 = vpop.eup %4645 }
0x147c   :  { %v3282_v59 = vadd.f32 1.0, %v4646_v51  ;;  %4254 = vmatmul.mubr.msk.f32.gmra.mrb[34].mxu1 %vm1769_vm0, %v3284_v52 }
0x147d   :  { %4256 = vmatprep.mubr.msk.f32.mxu1 %vm4674_vm3, %v4675_v10 }
0x147e   :  { %v3285_v18 = vmul.f32 %v3282_v59, %v3273_v33 }
0x1480   :  { %4257 = vmatmul.mubr.msk.f32.gmra.mrb[36].mxu1 %vm1769_vm0, %v3285_v18 }
0x154b   :  { %v3370_v31 = vpop.f32.mrb[32].mxu1 }
0x154c   :  { %v3384_v8 = vadd.f32 %v3370_v31, %v5785_v57  ;;  %v4252_v40 = vpop.f32.mrb[33].mxu1 }
0x154e   :  { %v3395_v46 = vadd.f32 %v3675_v39, %v3384_v8 }
0x154f   :  { %v3375_v62 = vpop.f32.mrb[34].mxu1 }
0x1550   :  { %v3385_v54 = vadd.f32 %v3375_v62, %v5790_v61  ;;  %v4255_v49 = vpop.f32.mrb[35].mxu1  ;;  %4268 = vmatmul.mubr.msk.f32.vlgmr.msra.gmra.mrb[74].mxu0 %vm338_vm13, %v3395_v46  ;;  %v130_v61 = vsel %vm129_vm8, 1e+08, %v4675_v10 }
0x1551   :  { %4270 = vmatprep.mubr.msk.f32.mxu0 %vm4674_vm3, %v4675_v10  ;;  %3492 = vst.msk [vmem:[#allocation3] sm:$0x1] %vm3491_vm14, %v130_v61  ;;  %3496 = vst.msk [vmem:[#allocation3 + $0x8] sm:$0x1] %vm3491_vm14, %v130_v61 }
0x1552   :  { %v3396_v43 = vadd.f32 %v3675_v39, %v3385_v54 }
0x1553   :  { %v3380_v27 = vpop.f32.mrb[36].mxu1 }
0x1554   :  { %v3386_v29 = vadd.f32 %v3380_v27, %v5795_v2  ;;  %v4258_v36 = vpop.f32.mrb[37].mxu1  ;;  %4271 = vmatmul.mubr.msk.f32.gmra.mrb[76].mxu0 %vm338_vm13, %v3396_v43 }
0x1555   :  { %4273 = vmatprep.mubr.msk.f32.mxu0 %vm4674_vm3, %v4675_v10  ;;  %vm3499_vm3 = vcmask 91136  }
0x1556   :  { %v3397_v57 = vadd.f32 %v3675_v39, %v3386_v29 }
0x1558   :  { %4274 = vmatmul.mubr.msk.f32.gmra.mrb[78].mxu0 %vm338_vm13, %v3397_v57 }
0x1623   :  { %v3477_v56 = vpop.f32.mrb[74].mxu0 }
0x1624   :  { %3494 = vst.msk [vmem:[#allocation3 - $0x1] sm:$0xfc] %vm3493_vm1, %v3477_v56  ;;  %v4269_v2 = vpop.f32.mrb[75].mxu0 }
0x1627   :  { %v3482_v5 = vpop.f32.mrb[76].mxu0 }
0x1628   :  { %3495 = vst.msk [vmem:[#allocation3 + $0x7] sm:$0x1] %vm3491_vm14, %v3482_v5  ;;  %v4272_v38 = vpop.f32.mrb[77].mxu0 }
0x1629   :  { %3498 = vst.msk [vmem:[#allocation3 + $0x6] sm:$0xf8] %vm3497_vm2, %v3482_v5 }
0x162b   :  { %v3487_v47 = vpop.f32.mrb[78].mxu0 }
0x162c   :  { %3500 = vst.msk [vmem:[#allocation3 + $0xe] sm:$0x3] %vm3499_vm3, %v3487_v47  ;;  %v4275_v13 = vpop.f32.mrb[79].mxu0 }
0x162d   :  { %4658 = shalt.err (!%p4655_p4)
}
0x162e   :  { %s4659_s7 = scalar_lea.hbm %s5930_s19, 256 }
0x162f   :  { %p4660_p5 = scmp.ne.s32.totalorder %s5930_s19, %s4659_s7  ;;  %p4663_p6 = scmp.lt.u32.totalorder %s4659_s7, %s5930_s19 }
0x1631   :  { %p4665_p7 = pnand %p4663_p6, %p4660_p5 }
0x1633   :  { %4668 = shalt.err (!%p4665_p7)
}
0x1634   :  { %s4680_s29 = smov 128   ;;  %s4681_s0 = smov 8  }
0x1635   :  { %3512 = dma.vmem_to_hbm [thread:$0]  %s3507_s18, 256, %s5930_s19, [#allocation4], %s4680_s29, %s4680_s29, %s4681_s0  }
0x1636   :  { %4669 = dma.done.wait [#allocation4], 256  }
0x1637   :  { %4670 = vsyncadd [#allocation4], 4294967040 }
0x1638   :  { %3516 = vsyncpa [#allocation4], 1 }

</bundles_post_ra>
